<compile_context>
chip_gen: v5e
topology: v5e:2x2
jax: 0.10.0
libtpu: 0.0.40
codegen_flags: <defaults>
</compile_context>

<pallas_src>
import math

import numpy as np

import jax
import jax.numpy as jnp
from jax.experimental import pallas as pl
from jax.experimental.pallas import tpu as pltpu


def _gaussian_1d(window_size, sigma=1.5):
    g = [math.exp(-((x - window_size // 2) ** 2) / (2.0 * sigma ** 2))
         for x in range(window_size)]
    s = sum(g)
    return [v / s for v in g]


def _vmem_capacity_bytes():
    # 64 MiB per TensorCore on v7x, 128 MiB on v5e/v6e; fall back conservatively.
    try:
        return int(pltpu.get_tpu_info().vmem_capacity_bytes)
    except Exception:
        return 64 * 1024 * 1024


def _make_ssim_kernel(H, W, K, bc, nc_total, need_mask):
    Hp, Wp = H - K + 1, W - K + 1

    def kernel(c_ref, x1_ref, x2_ref, th_ref, tw_ref, o_ref):
        # C1, C2 are data-dependent (dynamic range of img1) -> SMEM scalars.
        c1 = c_ref[0]
        c2 = c_ref[1]

        # Banded Gaussian matrices, already broadcast to (bc, Hp, H)/(bc, W, Wp).
        th_b = th_ref[...]
        tw_b = tw_ref[...]

        def conv2(z):
            # Separable "valid" Gaussian conv as two batched MXU matmuls with
            # f32 accumulation (replaces the VPU FIR with lane-misaligned slices).
            t = jnp.einsum("bih,bhw->biw", th_b, z,
                           preferred_element_type=jnp.float32,
                           precision=jax.lax.Precision.HIGHEST)
            return jnp.einsum("biw,bwj->bij", t, tw_b,
                              preferred_element_type=jnp.float32,
                              precision=jax.lax.Precision.HIGHEST)

        # f32 needed for the products feeding the sigma terms (cancellation).
        x1 = x1_ref[...].astype(jnp.float32)   # (bc, H, W)
        x2 = x2_ref[...].astype(jnp.float32)

        mu1 = conv2(x1)
        mu2 = conv2(x2)
        s11 = conv2(x1 * x1)
        s22 = conv2(x2 * x2)
        s12 = conv2(x1 * x2)
        # x1 / x2 dead from here on -> shorter lifetimes, smaller working set.

        mu1_sq = mu1 * mu1
        mu2_sq = mu2 * mu2
        mu1_mu2 = mu1 * mu2
        sigma1_sq = s11 - mu1_sq
        sigma2_sq = s22 - mu2_sq
        sigma12 = s12 - mu1_mu2

        v1 = 2.0 * sigma12 + c2
        v2 = sigma1_sq + sigma2_sq + c2
        ssim_map = (2.0 * mu1_mu2 + c1) * v1 / ((mu1_sq + mu2_sq + c1) * v2)

        if need_mask:
            # Ragged last block: zero the contribution of out-of-range slices
            # (their input rows are garbage padding).
            base = pl.program_id(0) * bc
            idx = base + jax.lax.broadcasted_iota(jnp.int32, (bc, Hp, Wp), 0)
            ssim_map = jnp.where(idx < nc_total, ssim_map, 0.0)

        # One partial sum per grid block, written as a full lane-dense tile.
        o_ref[...] = jnp.full((1, 8, 128), jnp.sum(ssim_map), dtype=jnp.float32)

    return kernel


def min_ssim(img1, img2, window_size=11, size_average=True, val_range=None):
    """Pallas implementation of MINSSIM.forward(img1, img2) = 1 - ssim(...)."""
    if not size_average:
        # TODO(synk): per-sample reduction (size_average=False) not implemented;
        # the module default (size_average=True) is what is implemented here.
        raise NotImplementedError("size_average=False not supported")

    N, C, H, W = img1.shape
    K = window_size
    assert H >= K and W >= K, "spatial dims must be >= window_size"
    Hp, Wp = H - K + 1, W - K + 1
    NC = N * C

    x1 = img1.reshape(NC, H, W)
    x2 = img2.reshape(NC, H, W)

    # Dynamic-range (L) detection, identical to the reference.  It needs a
    # global max/min pre-pass over img1 (an extra HBM read) — pass val_range
    # explicitly when the caller knows the range to skip it.
    if val_range is None:
        max_val = jnp.where(jnp.max(img1) > 128, 255.0, 1.0)
        min_val = jnp.where(jnp.min(img1) < -0.5, -1.0, 0.0)
        L = max_val - min_val
    else:
        L = jnp.float32(val_range)
    c1 = (0.01 * L) ** 2
    c2 = (0.03 * L) ** 2
    consts = jnp.stack([c1, c2]).astype(jnp.float32)   # (2,) -> SMEM

    # ---- Block-size model: size bc from the true f32 working set against a
    # generation-aware VMEM budget (v7x: 64 MiB/core, v5e/v6e: 128 MiB). ----
    itemsize = img1.dtype.itemsize
    vmem_cap = _vmem_capacity_bytes()
    vmem_limit = int(min(vmem_cap * 3 // 4, 100 * 1024 * 1024))
    budget = vmem_limit // 2                       # headroom for compiler scratch
    per_slice = (
        4 * H * W * itemsize          # two inputs, double-buffered DMA copies
        + 3 * H * W * 4               # f32 copies of x1/x2 + one product transient
        + 2 * Hp * W * 4              # separable-conv H-pass intermediates
        + 10 * Hp * Wp * 4            # conv outputs + SSIM combine temporaries
        + (Hp * H + W * Wp) * 4       # banded Gaussian matmul operands
    )
    bc = max(1, min(NC, budget // per_slice))
    if NC >= 2:
        # Guarantee >=2 grid steps so the "parallel" axis can shard across
        # v7x's two TensorCores and the pipeline has overlap.
        bc = min(bc, -(-NC // 2))
    grid0 = -(-NC // bc)
    need_mask = (NC % bc) != 0

    # Banded Toeplitz matrices of the separable Gaussian (compile-time data),
    # pre-broadcast over the block's slice axis -> plain batched MXU matmuls.
    g = np.asarray(_gaussian_1d(K, 1.5), dtype=np.float32)
    th = np.zeros((Hp, H), np.float32)
    for i in range(Hp):
        th[i, i:i + K] = g
    tw = np.zeros((W, Wp), np.float32)
    for j in range(Wp):
        tw[j:j + K, j] = g
    th_b = jnp.asarray(np.broadcast_to(th[None], (bc, Hp, H)))
    tw_b = jnp.asarray(np.broadcast_to(tw[None], (bc, W, Wp)))

    kernel = _make_ssim_kernel(H, W, K, bc, NC, need_mask)

    partial = pl.pallas_call(
        kernel,
        out_shape=jax.ShapeDtypeStruct((grid0, 8, 128), jnp.float32),
        grid_spec=pltpu.PrefetchScalarGridSpec(
            num_scalar_prefetch=0,
            grid=(grid0,),
            in_specs=[
                pl.BlockSpec(memory_space=pltpu.MemorySpace.SMEM),   # (C1, C2)
                pl.BlockSpec((bc, H, W), lambda i: (i, 0, 0)),       # img1 slab
                pl.BlockSpec((bc, H, W), lambda i: (i, 0, 0)),       # img2 slab
                pl.BlockSpec((bc, Hp, H), lambda i: (0, 0, 0)),      # Th (resident)
                pl.BlockSpec((bc, W, Wp), lambda i: (0, 0, 0)),      # Tw (resident)
            ],
            out_specs=pl.BlockSpec((1, 8, 128), lambda i: (i, 0, 0)),
        ),
        compiler_params=pltpu.CompilerParams(
            dimension_semantics=("parallel",),
            vmem_limit_bytes=vmem_limit,
        ),
    )(consts, x1, x2, th_b, tw_b)

    mean_ssim = jnp.sum(partial[:, 0, 0]) / jnp.float32(NC * Hp * Wp)
    return (1.0 - mean_ssim).astype(jnp.float32)


def _min_ssim_ref(img1, img2, window_size=11, val_range=None):
    """Pure-JAX reference (grouped conv2d), mirrors the PyTorch ssim()."""
    x1 = img1.astype(jnp.float32)
    x2 = img2.astype(jnp.float32)
    N, C, H, W = x1.shape
    K = window_size

    g = jnp.asarray(_gaussian_1d(K, 1.5), dtype=jnp.float32)
    w2d = jnp.outer(g, g)
    window = jnp.broadcast_to(w2d, (C, 1, K, K)).astype(jnp.float32)

    def dwconv(z):
        return jax.lax.conv_general_dilated(
            z, window, window_strides=(1, 1), padding="VALID",
            dimension_numbers=("NCHW", "OIHW", "NCHW"),
            feature_group_count=C,
            precision=jax.lax.Precision.HIGHEST)

    if val_range is None:
        max_val = jnp.where(jnp.max(x1) > 128, 255.0, 1.0)
        min_val = jnp.where(jnp.min(x1) < -0.5, -1.0, 0.0)
        L = max_val - min_val
    else:
        L = jnp.float32(val_range)

    mu1 = dwconv(x1)
    mu2 = dwconv(x2)
    mu1_sq = mu1 ** 2
    mu2_sq = mu2 ** 2
    mu1_mu2 = mu1 * mu2
    sigma1_sq = dwconv(x1 * x1) - mu1_sq
    sigma2_sq = dwconv(x2 * x2) - mu2_sq
    sigma12 = dwconv(x1 * x2) - mu1_mu2

    C1 = (0.01 * L) ** 2
    C2 = (0.03 * L) ** 2
    v1 = 2.0 * sigma12 + C2
    v2 = sigma1_sq + sigma2_sq + C2
    ssim_map = (2 * mu1_mu2 + C1) * v1 / ((mu1_sq + mu2_sq + C1) * v2)
    return 1.0 - jnp.mean(ssim_map)


if __name__ == "__main__":
    key = jax.random.PRNGKey(0)
    k1, k2 = jax.random.split(key)
    N, C, H, W = 2, 4, 16, 16
    img1 = jax.random.normal(k1, (N, C, H, W), dtype=jnp.float32)
    img2 = jax.random.normal(k2, (N, C, H, W), dtype=jnp.float32)

    out = min_ssim(img1, img2, window_size=11)
    out = jax.block_until_ready(out)

    ref = _min_ssim_ref(img1, img2, window_size=11)
    ref = jax.block_until_ready(ref)

    assert jnp.allclose(out, ref, rtol=1e-4, atol=1e-4), (out, ref)

    print("KERNEL_OK")
</pallas_src>

<mosaic_0001>
module attributes {stable_mosaic.version = 11 : i64} {
  func.func @kernel(%arg0: i32, %arg1: memref<2xf32, #tpu.memory_space<smem>>, %arg2: memref<4x16x16xf32, #tpu.memory_space<vmem>>, %arg3: memref<4x16x16xf32, #tpu.memory_space<vmem>>, %arg4: memref<4x6x16xf32, #tpu.memory_space<vmem>>, %arg5: memref<4x16x6xf32, #tpu.memory_space<vmem>>, %arg6: memref<1x8x128xf32, #tpu.memory_space<vmem>>) attributes {dimension_semantics = [#tpu.dimension_semantics<parallel>], iteration_bounds = array<i64: 2>, scalar_prefetch = 0 : i64, scratch_operands = 0 : i64, tpu.core_type = #tpu.core_type<tc>, window_params = [{transform_indices = @transform_0, window_bounds = array<i64: 2>}, {transform_indices = @transform_1, window_bounds = array<i64: 4, 16, 16>}, {transform_indices = @transform_2, window_bounds = array<i64: 4, 16, 16>}, {pipeline_mode = #tpu.pipeline_mode<synchronous>, transform_indices = @transform_3, window_bounds = array<i64: 4, 6, 16>}, {pipeline_mode = #tpu.pipeline_mode<synchronous>, transform_indices = @transform_4, window_bounds = array<i64: 4, 16, 6>}, {transform_indices = @transform_5, window_bounds = array<i64: 1, 8, 128>}]} {
    %c0 = arith.constant 0 : index
    %0 = memref.load %arg1[%c0] : memref<2xf32, #tpu.memory_space<smem>>
    %c1 = arith.constant 1 : index
    %1 = memref.load %arg1[%c1] : memref<2xf32, #tpu.memory_space<smem>>
    %c0_0 = arith.constant 0 : index
    %c0_1 = arith.constant 0 : index
    %c0_2 = arith.constant 0 : index
    %2 = vector.load %arg4[%c0_0, %c0_1, %c0_2] : memref<4x6x16xf32, #tpu.memory_space<vmem>>, vector<4x6x16xf32>
    %c0_3 = arith.constant 0 : index
    %c0_4 = arith.constant 0 : index
    %c0_5 = arith.constant 0 : index
    %3 = vector.load %arg5[%c0_3, %c0_4, %c0_5] : memref<4x16x6xf32, #tpu.memory_space<vmem>>, vector<4x16x6xf32>
    %c0_6 = arith.constant 0 : index
    %c0_7 = arith.constant 0 : index
    %c0_8 = arith.constant 0 : index
    %4 = vector.load %arg2[%c0_6, %c0_7, %c0_8] : memref<4x16x16xf32, #tpu.memory_space<vmem>>, vector<4x16x16xf32>
    %c0_9 = arith.constant 0 : index
    %c0_10 = arith.constant 0 : index
    %c0_11 = arith.constant 0 : index
    %5 = vector.load %arg3[%c0_9, %c0_10, %c0_11] : memref<4x16x16xf32, #tpu.memory_space<vmem>>, vector<4x16x16xf32>
    "tpu.trace_start"() <{level = 10 : i32, message = "bih,bhw->biw"}> : () -> ()
    %cst = arith.constant dense<0.000000e+00> : vector<4x6x16xf32>
    %6 = tpu.matmul %2, %4, %cst {dimension_numbers = #tpu.dot_dimension_numbers<[2], [1], [1], [2], [0, 0, 0, 1, 1, 2], [0], [0]>, precision = #tpu.contract_precision<fp32>} : vector<4x6x16xf32>, vector<4x16x16xf32>, vector<4x6x16xf32> -> vector<4x6x16xf32>
    "tpu.trace_stop"() : () -> ()
    "tpu.trace_start"() <{level = 10 : i32, message = "biw,bwj->bij"}> : () -> ()
    %cst_12 = arith.constant dense<0.000000e+00> : vector<4x6x6xf32>
    %7 = tpu.matmul %6, %3, %cst_12 {dimension_numbers = #tpu.dot_dimension_numbers<[2], [1], [1], [2], [0, 0, 0, 1, 1, 2], [0], [0]>, precision = #tpu.contract_precision<fp32>} : vector<4x6x16xf32>, vector<4x16x6xf32>, vector<4x6x6xf32> -> vector<4x6x6xf32>
    "tpu.trace_stop"() : () -> ()
    "tpu.trace_start"() <{level = 10 : i32, message = "bih,bhw->biw"}> : () -> ()
    %cst_13 = arith.constant dense<0.000000e+00> : vector<4x6x16xf32>
    %8 = tpu.matmul %2, %5, %cst_13 {dimension_numbers = #tpu.dot_dimension_numbers<[2], [1], [1], [2], [0, 0, 0, 1, 1, 2], [0], [0]>, precision = #tpu.contract_precision<fp32>} : vector<4x6x16xf32>, vector<4x16x16xf32>, vector<4x6x16xf32> -> vector<4x6x16xf32>
    "tpu.trace_stop"() : () -> ()
    "tpu.trace_start"() <{level = 10 : i32, message = "biw,bwj->bij"}> : () -> ()
    %cst_14 = arith.constant dense<0.000000e+00> : vector<4x6x6xf32>
    %9 = tpu.matmul %8, %3, %cst_14 {dimension_numbers = #tpu.dot_dimension_numbers<[2], [1], [1], [2], [0, 0, 0, 1, 1, 2], [0], [0]>, precision = #tpu.contract_precision<fp32>} : vector<4x6x16xf32>, vector<4x16x6xf32>, vector<4x6x6xf32> -> vector<4x6x6xf32>
    "tpu.trace_stop"() : () -> ()
    %10 = arith.mulf %4, %4 : vector<4x16x16xf32>
    "tpu.trace_start"() <{level = 10 : i32, message = "bih,bhw->biw"}> : () -> ()
    %cst_15 = arith.constant dense<0.000000e+00> : vector<4x6x16xf32>
    %11 = tpu.matmul %2, %10, %cst_15 {dimension_numbers = #tpu.dot_dimension_numbers<[2], [1], [1], [2], [0, 0, 0, 1, 1, 2], [0], [0]>, precision = #tpu.contract_precision<fp32>} : vector<4x6x16xf32>, vector<4x16x16xf32>, vector<4x6x16xf32> -> vector<4x6x16xf32>
    "tpu.trace_stop"() : () -> ()
    "tpu.trace_start"() <{level = 10 : i32, message = "biw,bwj->bij"}> : () -> ()
    %cst_16 = arith.constant dense<0.000000e+00> : vector<4x6x6xf32>
    %12 = tpu.matmul %11, %3, %cst_16 {dimension_numbers = #tpu.dot_dimension_numbers<[2], [1], [1], [2], [0, 0, 0, 1, 1, 2], [0], [0]>, precision = #tpu.contract_precision<fp32>} : vector<4x6x16xf32>, vector<4x16x6xf32>, vector<4x6x6xf32> -> vector<4x6x6xf32>
    "tpu.trace_stop"() : () -> ()
    %13 = arith.mulf %5, %5 : vector<4x16x16xf32>
    "tpu.trace_start"() <{level = 10 : i32, message = "bih,bhw->biw"}> : () -> ()
    %cst_17 = arith.constant dense<0.000000e+00> : vector<4x6x16xf32>
    %14 = tpu.matmul %2, %13, %cst_17 {dimension_numbers = #tpu.dot_dimension_numbers<[2], [1], [1], [2], [0, 0, 0, 1, 1, 2], [0], [0]>, precision = #tpu.contract_precision<fp32>} : vector<4x6x16xf32>, vector<4x16x16xf32>, vector<4x6x16xf32> -> vector<4x6x16xf32>
    "tpu.trace_stop"() : () -> ()
    "tpu.trace_start"() <{level = 10 : i32, message = "biw,bwj->bij"}> : () -> ()
    %cst_18 = arith.constant dense<0.000000e+00> : vector<4x6x6xf32>
    %15 = tpu.matmul %14, %3, %cst_18 {dimension_numbers = #tpu.dot_dimension_numbers<[2], [1], [1], [2], [0, 0, 0, 1, 1, 2], [0], [0]>, precision = #tpu.contract_precision<fp32>} : vector<4x6x16xf32>, vector<4x16x6xf32>, vector<4x6x6xf32> -> vector<4x6x6xf32>
    "tpu.trace_stop"() : () -> ()
    %16 = arith.mulf %4, %5 : vector<4x16x16xf32>
    "tpu.trace_start"() <{level = 10 : i32, message = "bih,bhw->biw"}> : () -> ()
    %cst_19 = arith.constant dense<0.000000e+00> : vector<4x6x16xf32>
    %17 = tpu.matmul %2, %16, %cst_19 {dimension_numbers = #tpu.dot_dimension_numbers<[2], [1], [1], [2], [0, 0, 0, 1, 1, 2], [0], [0]>, precision = #tpu.contract_precision<fp32>} : vector<4x6x16xf32>, vector<4x16x16xf32>, vector<4x6x16xf32> -> vector<4x6x16xf32>
    "tpu.trace_stop"() : () -> ()
    "tpu.trace_start"() <{level = 10 : i32, message = "biw,bwj->bij"}> : () -> ()
    %cst_20 = arith.constant dense<0.000000e+00> : vector<4x6x6xf32>
    %18 = tpu.matmul %17, %3, %cst_20 {dimension_numbers = #tpu.dot_dimension_numbers<[2], [1], [1], [2], [0, 0, 0, 1, 1, 2], [0], [0]>, precision = #tpu.contract_precision<fp32>} : vector<4x6x16xf32>, vector<4x16x6xf32>, vector<4x6x6xf32> -> vector<4x6x6xf32>
    "tpu.trace_stop"() : () -> ()
    %19 = arith.mulf %7, %7 : vector<4x6x6xf32>
    %20 = arith.mulf %9, %9 : vector<4x6x6xf32>
    %21 = arith.mulf %7, %9 : vector<4x6x6xf32>
    %22 = arith.subf %12, %19 : vector<4x6x6xf32>
    %23 = arith.subf %15, %20 : vector<4x6x6xf32>
    %24 = arith.subf %18, %21 : vector<4x6x6xf32>
    %cst_21 = arith.constant 2.000000e+00 : f32
    %25 = vector.broadcast %cst_21 : f32 to vector<4x6x6xf32>
    %26 = arith.mulf %25, %24 : vector<4x6x6xf32>
    %27 = vector.broadcast %1 : f32 to vector<4x6x6xf32>
    %28 = arith.addf %26, %27 : vector<4x6x6xf32>
    %29 = arith.addf %22, %23 : vector<4x6x6xf32>
    %30 = vector.broadcast %1 : f32 to vector<4x6x6xf32>
    %31 = arith.addf %29, %30 : vector<4x6x6xf32>
    %cst_22 = arith.constant 2.000000e+00 : f32
    %32 = vector.broadcast %cst_22 : f32 to vector<4x6x6xf32>
    %33 = arith.mulf %32, %21 : vector<4x6x6xf32>
    %34 = vector.broadcast %0 : f32 to vector<4x6x6xf32>
    %35 = arith.addf %33, %34 : vector<4x6x6xf32>
    %36 = arith.mulf %35, %28 : vector<4x6x6xf32>
    %37 = arith.addf %19, %20 : vector<4x6x6xf32>
    %38 = vector.broadcast %0 : f32 to vector<4x6x6xf32>
    %39 = arith.addf %37, %38 : vector<4x6x6xf32>
    %40 = arith.mulf %39, %31 : vector<4x6x6xf32>
    %41 = arith.divf %36, %40 : vector<4x6x6xf32>
    %42 = vector.shape_cast %41 : vector<4x6x6xf32> to vector<1x4x6x6xf32>
    %cst_23 = arith.constant dense<0.000000e+00> : vector<1xf32>
    %43 = vector.multi_reduction <add>, %42, %cst_23 [1, 2, 3] : vector<1x4x6x6xf32> to vector<1xf32>
    %44 = vector.shape_cast %43 : vector<1xf32> to vector<1x1x1x1xf32>
    %45 = vector.extract %44[0, 0, 0, 0] : f32 from vector<1x1x1x1xf32>
    %46 = vector.broadcast %45 : f32 to vector<1x8x128xf32>
    %c0_24 = arith.constant 0 : index
    %c0_25 = arith.constant 0 : index
    %c0_26 = arith.constant 0 : index
    %47 = vector.load %arg6[%c0_24, %c0_25, %c0_26] : memref<1x8x128xf32, #tpu.memory_space<vmem>>, vector<1x8x128xf32>
    tpu.vector_store %arg6[%c0_24, %c0_25, %c0_26], %46 {strides = array<i32>} : memref<1x8x128xf32, #tpu.memory_space<vmem>>, vector<1x8x128xf32>,
    return
  }
  func.func @transform_0(%arg0: i32) -> i32 {
    %c0_i32 = arith.constant 0 : i32
    %c0_i32_0 = arith.constant 0 : i32
    return %c0_i32 : i32
  }
  func.func @transform_1(%arg0: i32) -> (i32, i32, i32) {
    %c0_i32 = arith.constant 0 : i32
    %c0_i32_0 = arith.constant 0 : i32
    %c0_i32_1 = arith.constant 0 : i32
    return %arg0, %c0_i32, %c0_i32_0 : i32, i32, i32
  }
  func.func @transform_2(%arg0: i32) -> (i32, i32, i32) {
    %c0_i32 = arith.constant 0 : i32
    %c0_i32_0 = arith.constant 0 : i32
    %c0_i32_1 = arith.constant 0 : i32
    return %arg0, %c0_i32, %c0_i32_0 : i32, i32, i32
  }
  func.func @transform_3(%arg0: i32) -> (i32, i32, i32) {
    %c0_i32 = arith.constant 0 : i32
    %c0_i32_0 = arith.constant 0 : i32
    %c0_i32_1 = arith.constant 0 : i32
    %c0_i32_2 = arith.constant 0 : i32
    return %c0_i32, %c0_i32_0, %c0_i32_1 : i32, i32, i32
  }
  func.func @transform_4(%arg0: i32) -> (i32, i32, i32) {
    %c0_i32 = arith.constant 0 : i32
    %c0_i32_0 = arith.constant 0 : i32
    %c0_i32_1 = arith.constant 0 : i32
    %c0_i32_2 = arith.constant 0 : i32
    return %c0_i32, %c0_i32_0, %c0_i32_1 : i32, i32, i32
  }
  func.func @transform_5(%arg0: i32) -> (i32, i32, i32) {
    %c0_i32 = arith.constant 0 : i32
    %c0_i32_0 = arith.constant 0 : i32
    %c0_i32_1 = arith.constant 0 : i32
    return %arg0, %c0_i32, %c0_i32_0 : i32, i32, i32
  }
}

</mosaic_0001>

<bundles_post_ra>
// kernel: tpu_custom_call.1
= control target key start
LH: loop header
LB: loop body
LE: loop exit
PB: predicated region body
PF: predicated region fallthrough
CT: control target
= control target key end

     0   :  { %s8894_s0 = inlined_call_operand.vmem [shape: f32[2], index: 0, kind: input, shape index: {}]   ;;  %s8895_s1 = inlined_call_operand.hbm [shape: f32[8,16,16], index: 1, kind: input, shape index: {}]   ;;  %s8896_s2 = inlined_call_operand.hbm [shape: f32[8,16,16], index: 2, kind: input, shape index: {}]   ;;  %s8897_s3 = inlined_call_operand.vmem [shape: f32[4,6,16], index: 3, kind: input, shape index: {}]   ;;  %s8898_s4 = inlined_call_operand.vmem [shape: f32[4,16,6], index: 4, kind: input, shape index: {}]   ;;  %s8899_s5 = inlined_call_operand.hbm [shape: f32[2,8,128], index: 5, kind: output, shape index: {}]  }
   0x1   :  { %8945 = sst [smem:[#allocation106_spill]] %s8894_s0 }
   0x2   :  { %10 = vsyncpa [#allocation5], 0 }
   0x3   :  { %11 = vsyncpa [#allocation3], 0 }
   0x4   :  { %13 = vsyncpa [#allocation3 + $0x1], 0 }
   0x5   :  { %14 = vsyncpa [#allocation8], 0 }
   0x6   :  { %16 = vsyncpa [#allocation8 + $0x1], 0 }
   0x7   :  { %17 = vsyncpa [#allocation4], 0 }
   0x8   :  { %19 = vsyncpa [#allocation4 + $0x1], 0  ;;  %s7366_s18 = smov 0   ;;  %s7368_s19 = smov 0  }
   0x9   :  { %s7370_s20 = smov 0   ;;  %s7372_s21 = smov 0  }
   0xa LB: > { %8946 = sst [smem:[#allocation14_spill]] %s7327_s20  ;;  %s7387_s22 = sadd.s32 4294967295, %s7331_s21   ;;  %s7331_s21 = sphi %s7372_s21, %s9175_s21   ;;  %s7327_s20 = sphi %s7370_s20, %s9177_s20   ;;  %s7323_s19 = sphi %s7368_s19, %s9179_s19   ;;  %s7319_s18 = sphi %s7366_s18, %s9178_s18  }
   0xb   : > { %s7058_s23 = sadd.s32 4294967294, %s7331_s21   ;;  %s7391_s24 = sadd.s32 1, %s7331_s21  }
   0xc   : > { %8947 = sst [smem:[#allocation15_spill]] %s7391_s24  ;;  %s53_s25 = sadd.s32 1, %s7327_s20 }
   0xd   : > { %s50_s26 = ssub.s32 %s7331_s21, %s7391_s24  ;;  %p60_p0 = scmp.ne.s32.totalorder %s7327_s20, %s7323_s19 }
   0xe   : > { %p51_p1 = scmp.eq.s32.totalorder %s50_s26, 0  ;;  %p61_p2 = scmp.eq.s32.totalorder %s7331_s21, 0 }
   0xf   : > { %p66_p3 = scmp.ne.s32.totalorder %s7323_s19, %s7319_s18  ;;  %p67_p4 = scmp.eq.s32.totalorder %s7387_s22, 0 }
  0x10   : > { %s7403_s27 = scalar_select %p51_p1, %s7327_s20, %s53_s25  }
  0x11   : > { %p7405_p5 = por %p61_p2, %p60_p0  ;;  %p7411_p6 = por %p67_p4, %p66_p3 }
  0x12   : > { %8948 = sst [smem:[#allocation16_spill]] %s7403_s27  ;;  %p158_p7 = scmp.eq.s32.totalorder %s7387_s22, 1 }
  0x13   : > { %p164_p8 = scmp.eq.s32.totalorder %s7058_s23, 1  ;;  %p7059_p9 = scmp.ge.s32.totalorder %s7331_s21, 1 }
  0x14   : > { %p171_p10 = scmp.lt.s32.totalorder %s7331_s21, 3  ;;  %p7418_p11 = por %p158_p7, %p60_p0 }
  0x15   : > { %p7422_p12 = por %p164_p8, %p66_p3  ;;  %s8954_s0 = sld [smem:[#allocation106_spill]] }
  0x16   : > { %p7426_p13 = pnand %p7059_p9, %p171_p10  ;;  %p7112_p2 = scmp.lt.s32.totalorder %s7331_s21, 2 }
  0x17   : > { %s7440_s11 = sand.u32 1, %s7327_s20   ;;  %s7333_s14 = smov [#allocation2]  }
  0x18   : > { %p7096_p1 = pneg %p7426_p13  ;;  %p7444_p3 = pnand %p7112_p2, %p7405_p5 }
  0x19   : > { %s8900_s13 = sshll.u32 %s7440_s11, 6  ;;  %s7081_s15 = sshll.u32 %s7331_s21, 6 }
  0x1a   : > { %p7097_p7 = pnand %p7096_p1, %p67_p4  ;;  %s204_s16 = scalar_lea.vmem [#allocation6], %s8900_s13 }
  0x1b   : > { %s183_s10 = sshll.u32 %s8954_s0, 4  ;;  %s213_s17 = sshll.u32 %s204_s16, 4  ;;  %s184_s10 = int_to_ptr.vmem [resolvable:$true] %s183_s10  ;;  %s214_s17 = int_to_ptr.vmem [resolvable:$true] %s213_s17 }
  0x1c   : > { %7099 = dma.vmem_to_smem (!%p7097_p7), %s184_s10, 16, %s7333_s14, [#allocation5]  }
  0x1d   : > { %s210_s26 = scalar_lea.hbm %s8895_s1, %s7081_s15  ;;  %s201_s8 = scalar_lea.sflag [#allocation3], %s7440_s11 }
  0x1e   : > { %s211_s28 = sshll.u32 %s210_s26, 4  ;;  %p7201_p8 = pneg %p7444_p3  ;;  %s212_s28 = int_to_ptr.hbm [resolvable:$true] %s211_s28 }
  0x1f   : > { %s7197_s9 = sshra.s32 %s212_s28, 4  ;;  %s7204_s16 = scalar_lea.hbm %s8895_s1, 128  ;;  %s7198_s9 = int_to_ptr.hbm [resolvable:$true] %s7197_s9 }
  0x20   : > { %s7199_s0 = scalar_lea.hbm %s7198_s9, 64  ;;  %p7205_p1 = scmp.lt.s32.totalorder %s7198_s9, %s8895_s1 }
  0x21   : > { %p7200_p5 = scmp.ne.s32.totalorder %s7198_s9, %s7199_s0  ;;  %p7206_p2 = scmp.lt.s32.totalorder %s7204_s16, %s7199_s0 }
  0x23   : > { %p7202_p9 = pnand %p7201_p8, %p7200_p5  ;;  %p7207_p7 = por %p7206_p2, %p7205_p1 }
  0x25   : > { %p7203_p10 = pneg %p7202_p9 }
  0x27   : > { %p7208_p0 = pnand %p7207_p7, %p7203_p10 }
  0x29   : > { %7211 = shalt.err (!%p7208_p0)
}
  0x2a   : > { %s7334_s26 = smov 128   ;;  %s7335_s13 = smov 8  }
  0x2b   : > { %7103 = dma.hbm_to_vmem [thread:$0]  (!%p7444_p3), %s212_s28, 1024, %s214_s17, %s201_s8, %s7334_s26, %s7334_s26, %s7335_s13  }
  0x2c   : > { %s233_s10 = scalar_lea.hbm %s8896_s2, %s7081_s15  ;;  %s8956_s14 = sshll.u32 %s7440_s11, 6 }
  0x2d   : > { %s227_s24 = scalar_lea.vmem [#allocation7], %s8956_s14  ;;  %s234_s9 = sshll.u32 %s233_s10, 4  ;;  %s235_s9 = int_to_ptr.hbm [resolvable:$true] %s234_s9 }
  0x2e   : > { %s236_s23 = sshll.u32 %s227_s24, 4  ;;  %s224_s0 = scalar_lea.sflag [#allocation8], %s7440_s11  ;;  %s237_s23 = int_to_ptr.vmem [resolvable:$true] %s236_s23 }
  0x2f   : > { %s7227_s16 = sshra.s32 %s235_s9, 4  ;;  %s7234_s20 = scalar_lea.hbm %s8896_s2, 128  ;;  %s7228_s16 = int_to_ptr.hbm [resolvable:$true] %s7227_s16 }
  0x30   : > { %s7229_s25 = scalar_lea.hbm %s7228_s16, 64  ;;  %p7235_p10 = scmp.lt.s32.totalorder %s7228_s16, %s8896_s2 }
  0x31   : > { %p7230_p0 = scmp.ne.s32.totalorder %s7228_s16, %s7229_s25  ;;  %p7236_p1 = scmp.lt.s32.totalorder %s7234_s20, %s7229_s25 }
  0x33   : > { %p7232_p5 = pnand %p7230_p0, %p7201_p8  ;;  %p7237_p2 = por %p7236_p1, %p7235_p10 }
  0x35   : > { %p7233_p9 = pneg %p7232_p5 }
  0x37   : > { %p7238_p7 = pnand %p7237_p2, %p7233_p9 }
  0x39   : > { %7241 = shalt.err (!%p7238_p7)
}
  0x3a   : > { %7106 = dma.hbm_to_vmem [thread:$0]  (!%p7444_p3), %s235_s9, 1024, %s237_s23, %s224_s0, %s7334_s26, %s7334_s26, %s7335_s13  }
  0x3b   : > { %248 = sbr.rel (%p7426_p13) target bundleno = 1422 (0x58e), region = 40 }
  0x40   : > { %7302 = dma.done.wait (%p67_p4), [#allocation5], 16  }
  0x41   : > { %7304 = vsyncadd (%p67_p4), [#allocation5], 4294967280  ;;  %s7493_s24 = sand.u32 1, %s7323_s19  }
  0x42   : > { %s7072_s11 = sshll.u32 %s7493_s24, 6  ;;  %s256_s8 = scalar_lea.sflag [#allocation3], %s7493_s24 }
  0x43   : > { %s7497_s10 = scalar_lea.vmem [#allocation6], %s7072_s11 }
  0x44   : > { %7306 = dma.done.wait (%p7411_p6), %s256_s8, 1024  }
  0x45   : > { %7308 = vsyncadd (%p7411_p6), %s256_s8, 4294966272  ;;  %s266_s7 = scalar_lea.sflag [#allocation8], %s7493_s24  ;;  %s7504_s12 = scalar_lea.vmem [#allocation7], %s7072_s11 }
  0x46   : > { %7310 = dma.done.wait (%p7411_p6), %s266_s7, 1024  }
  0x47   : > { %7312 = vsyncadd (%p7411_p6), %s266_s7, 4294966272 }
  0x48   : > { %275 = sfence }
  0x49   : > { %v320_v0 = vld [vmem:[%s7497_s10 + $0x8] sm:$0xff]  ;;  %v319_v1 = vld [vmem:[%s7497_s10] sm:$0xff]  ;;  %vm335_vm0 = vcmask 130048   ;;  %v322_v6 = vld [vmem:[%s7497_s10 + $0x18] sm:$0xff]  ;;  %vm6918_vm9 = vcmask 46080   ;;  %s7074_s16 = sshll.u32 %s7493_s24, 3 }
  0x4a   : > { %v307_v2 = vld [vmem:[%s8897_s3] sm:$0x3f]  ;;  %v7515_v3 = vand.u32 4294901760, %v320_v0  ;;  %v7517_v4 = vand.u32 4294901760, %v319_v1  ;;  %v321_v7 = vld [vmem:[%s7497_s10 + $0x10] sm:$0xff]  ;;  %v324_v8 = vld [vmem:[%s7497_s10 + $0x28] sm:$0xff] }
  0x4b   : > { %v337_v5 = vsel %vm335_vm0, %v307_v2, 0  ;;  %v7525_v10 = vand.u32 4294901760, %v322_v6  ;;  %v7527_v11 = vand.u32 4294901760, %v321_v7  ;;  %v308_v12 = vld [vmem:[%s8897_s3 + $0x8] sm:$0x3f]  ;;  %v7537_v16 = vand.u32 4294901760, %v324_v8 }
  0x4c   : > { %v7523_v9 = vand.u32 4294901760, %v337_v5  ;;  %v381_v13 = vsub.f32 %v320_v0, %v7515_v3  ;;  %438 = vmatpush.msra.mxu3 %v7515_v3  ;;  %354 = vmatpush.msra.mxu0 %v7515_v3  ;;  %v387_v14 = vsub.f32 %v319_v1, %v7517_v4  ;;  %v499_v15 = vsel %vm335_vm0, %v308_v12, 0  ;;  %v323_v17 = vld [vmem:[%s7497_s10 + $0x20] sm:$0xff]  ;;  %v326_v36 = vld [vmem:[%s7497_s10 + $0x38] sm:$0xff]  ;;  %v325_v40 = vld [vmem:[%s7497_s10 + $0x30] sm:$0xff]  ;;  %s7077_s25 = sshll.u32 %s7387_s22, 3 }
  0x4d   : > { %v543_v19 = vsub.f32 %v322_v6, %v7525_v10  ;;  %v7545_v20 = vsub.f32 %v321_v7, %v7527_v11  ;;  %v7547_v21 = vand.u32 4294901760, %v499_v15  ;;  %v7550_v24 = vand.u32 4294901760, %v323_v17  ;;  %v309_v45 = vld [vmem:[%s8897_s3 + $0x10] sm:$0x3f]  ;;  %v310_v54 = vld [vmem:[%s8897_s3 + $0x18] sm:$0x3f]  ;;  %s6948_s20 = scalar_lea.hbm %s8899_s5, %s7077_s25 }
  0x4e   : > { %v7541_v18 = vsub.f32 %v337_v5, %v7523_v9  ;;  %413 = vmatpush.msra.mxu2 %v381_v13  ;;  %440 = vmatpush.msra.mxu3 %v7517_v4  ;;  %v382_v22 = vand.u32 4294901760, %v381_v13  ;;  %v388_v23 = vand.u32 4294901760, %v387_v14  ;;  %v7561_v31 = vsub.f32 %v324_v8, %v7537_v16  ;;  %s302_s27 = scalar_lea.vmem [#allocation9], %s7074_s16  ;;  %s6952_s11 = sshll.u32 %s6948_s20, 4  ;;  %s6953_s11 = int_to_ptr.hbm [resolvable:$true] %s6952_s11 }
  0x4f   : > { %356 = vmatpush.msra.mxu0 %v7517_v4  ;;  %v544_v26 = vand.u32 4294901760, %v543_v19  ;;  %v550_v27 = vand.u32 4294901760, %v7545_v20  ;;  %v7558_v28 = vsub.f32 %v499_v15, %v7547_v21  ;;  %v7574_v39 = vsub.f32 %v323_v17, %v7550_v24  ;;  %v311_v15 = vld [vmem:[%s8898_s4] sm:$0xff]  ;;  %s6950_s15 = sshll.u32 %s302_s27, 4  ;;  %s6938_s7 = scalar_lea.sflag [#allocation4], %s7493_s24  ;;  %s6951_s15 = int_to_ptr.vmem [resolvable:$true] %s6950_s15 }
  0x50   : > { %v7553_v25 = vand.u32 4294901760, %v7541_v18  ;;  %416 = vmatpush.msra.mxu2 %v387_v14  ;;  %v383_v29 = vsub.f32 %v381_v13, %v382_v22  ;;  %v389_v30 = vsub.f32 %v387_v14, %v388_v23  ;;  %v706_v46 = vand.u32 4294901760, %v7561_v31  ;;  %v312_v13 = vld [vmem:[%s8898_s4 + $0x8] sm:$0xff]  ;;  %s7271_s13 = sshra.s32 %s6953_s11, 4  ;;  %s7277_s14 = scalar_lea.hbm %s8899_s5, 16  ;;  %s7272_s13 = int_to_ptr.hbm [resolvable:$true] %s7271_s13 }
  0x51   : > { %465 = vmatpush.msrb.mxu0 %v382_v22  ;;  %419 = vmatmul.f32.vlgmr.msra.gmra.mxu2 %v7541_v18  ;;  %v545_v33 = vsub.f32 %v543_v19, %v544_v26  ;;  %v551_v34 = vsub.f32 %v7545_v20, %v550_v27  ;;  %v7569_v35 = vand.u32 4294901760, %v7558_v28  ;;  %v7586_v47 = vand.u32 4294901760, %v326_v36  ;;  %s7273_s26 = scalar_lea.hbm %s7272_s13, 8  ;;  %p7278_p3 = scmp.lt.s32.totalorder %s7272_s13, %s8899_s5 }
  0x52   : > { %444 = vmatmul.f32.vlgmr.msra.gmra.mxu3 %v7553_v25  ;;  %v360_v32 = vsub.f32 %v7541_v18, %v7553_v25  ;;  %516 = vmatpush.msrb.mxu2 %v7525_v10  ;;  %v384_v37 = vand.u32 4294901760, %v383_v29  ;;  %v390_v38 = vand.u32 4294901760, %v389_v30  ;;  %v7591_v49 = vand.u32 4294901760, %v325_v40  ;;  %v314_v29 = vld [vmem:[%s8898_s4 + $0x18] sm:$0xff]  ;;  %p7274_p4 = scmp.ne.s32.totalorder %s7272_s13, %s7273_s26  ;;  %p7279_p8 = scmp.lt.s32.totalorder %s7277_s14, %s7273_s26 }
  0x53   : > { %469 = vmatpush.msrb.mxu0 %v388_v23  ;;  %v546_v42 = vand.u32 4294901760, %v545_v33  ;;  %v552_v43 = vand.u32 4294901760, %v551_v34  ;;  %v522_v44 = vsub.f32 %v7558_v28, %v7569_v35  ;;  %v661_v50 = vsel %vm335_vm0, %v309_v45, 0 }
  0x54   : > { %v7577_v41 = vand.u32 4294901760, %v360_v32  ;;  %385 = vmatpush.msra.mxu1 %v384_v37  ;;  %518 = vmatpush.msrb.mxu2 %v7527_v11  ;;  %v7595_v51 = vsub.f32 %v326_v36, %v7586_v47  ;;  %v712_v52 = vand.u32 4294901760, %v7574_v39  ;;  %v7600_v53 = vsub.f32 %v325_v40, %v7591_v49  ;;  %p7275_p6 = pnand %p7274_p4, %p7418_p11  ;;  %p7280_p0 = por %p7279_p8, %p7278_p3 }
  0x55   : > { %547 = vmatpush.msrb.mxu3 %v546_v42  ;;  %v7589_v48 = vand.u32 4294901760, %v522_v44  ;;  %v707_v55 = vsub.f32 %v7561_v31, %v706_v46  ;;  %v7610_v57 = vand.u32 4294901760, %v661_v50  ;;  %v823_v59 = vsel %vm335_vm0, %v310_v54, 0 }
  0x56   : > { %362 = vmatmul.f32.vlgmr.msra.gmra.mxu0 %v7577_v41  ;;  %391 = vmatpush.msra.mxu1 %v390_v38  ;;  %v868_v56 = vand.u32 4294901760, %v7595_v51  ;;  %v874_v58 = vand.u32 4294901760, %v7600_v53  ;;  %v713_v60 = vsub.f32 %v7574_v39, %v712_v52  ;;  %v7626_v0 = vand.u32 4294901760, %v823_v59  ;;  %p7276_p13 = pneg %p7275_p6 }
  0x57   : > { %627 = vmatpush.msra.mxu2 %v544_v26  ;;  %393 = vmatmul.f32.vlgmr.msra.gmra.mxu1 %v7523_v9  ;;  %v708_v61 = vand.u32 4294901760, %v707_v55  ;;  %v7624_v63 = vsub.f32 %v661_v50, %v7610_v57  ;;  %v7682_v14 = vand.u32 4294901760, %v312_v13  ;;  %v7690_v17 = vand.u32 4294901760, %v311_v15  ;;  %v315_v50 = vld [vmem:[%s8898_s4 + $0x20] sm:$0xff] }
  0x58   : > { %553 = vmatpush.msrb.mxu3 %v552_v43  ;;  %490 = vmatpush.msrb.mxu1 %v7515_v3  ;;  %v869_v62 = vsub.f32 %v7595_v51, %v868_v56  ;;  %v875_v1 = vsub.f32 %v7600_v53, %v874_v58  ;;  %v714_v2 = vand.u32 4294901760, %v713_v60  ;;  %v7640_v5 = vsub.f32 %v823_v59, %v7626_v0  ;;  %p7281_p5 = pnand %p7280_p0, %p7276_p13 }
  0x59   : > { %575 = vmatpush.msra.mxu0 %v543_v19  ;;  %524 = vmatmul.f32.vlgmr.msrb.gmra.mxu2 %v7589_v48  ;;  %v7722_v30 = vand.u32 4294901760, %v314_v29  ;;  %v7763_v54 = vand.u32 4294901760, %v315_v50 }
  0x5a   : > { %555 = vmatmul.f32.vlgmr.msrb.gmra.mxu3 %v7547_v21  ;;  %492 = vmatpush.msrb.mxu1 %v7517_v4  ;;  %v870_v3 = vand.u32 4294901760, %v869_v62  ;;  %v7637_v4 = vand.u32 4294901760, %v7624_v63  ;;  %v876_v6 = vand.u32 4294901760, %v875_v1  ;;  %v7650_v8 = vand.u32 4294901760, %v7640_v5 }
  0x5b   : > { %652 = vmatpush.msra.mxu3 %v7525_v10  ;;  %631 = vmatpush.msra.mxu2 %v550_v27  ;;  %v7729_v32 = vsub.f32 %v314_v29, %v7722_v30  ;;  %8959 = vst [vmem:[#allocation19_spill] sm:$0xff] %v7763_v54  ;;  %v7769_v1 = vsub.f32 %v315_v50, %v7763_v54 }
  0x5c   : > { %600 = vmatpush.msra.mxu1 %v7525_v10  ;;  %578 = vmatpush.msra.mxu0 %v7545_v20  ;;  %v684_v7 = vsub.f32 %v7624_v63, %v7637_v4  ;;  %v7698_v20 = vsub.f32 %v311_v15, %v7690_v17 }
  0x5d   : > { %654 = vmatpush.msra.mxu3 %v7527_v11  ;;  %737 = vmatpush.msrb.mxu2 %v7561_v31  ;;  %v313_v31 = vld [vmem:[%s8898_s4 + $0x10] sm:$0xff]  ;;  %v7736_v34 = vand.u32 4294901760, %v7729_v32  ;;  %8961 = vst [vmem:[#allocation21_spill] sm:$0xff] %v7769_v1 }
  0x5e   : > { %471 = vmatmul.f32.vlgmr.msrb.gmra.mxu0 %v7523_v9  ;;  %602 = vmatpush.msra.mxu1 %v7527_v11  ;;  %v7656_v10 = vand.u32 4294901760, %v684_v7  ;;  %v846_v11 = vsub.f32 %v7640_v5, %v7650_v8  ;;  %v7706_v23 = vand.u32 4294901760, %v7698_v20  ;;  %v7731_v33 = vand.u32 4294901760, %v313_v31  ;;  %v318_v7 = vld [vmem:[%s8898_s4 + $0x38] sm:$0xff] }
  0x5f   : > { %678 = vmatpush.msrb.mxu0 %v7537_v16  ;;  %494 = vmatmul.f32.vlgmr.msrb.gmra.mxu1 %v7523_v9  ;;  %v1193_v37 = vsub.f32 %v7729_v32, %v7736_v34 }
  0x60   : > { %762 = vmatpush.msrb.mxu3 %v7537_v16  ;;  %709 = vmatpush.msrb.mxu1 %v708_v61  ;;  %v7663_v12 = vand.u32 4294901760, %v846_v11  ;;  %v1037_v26 = vsub.f32 %v7698_v20, %v7706_v23  ;;  %v7739_v36 = vsub.f32 %v313_v31, %v7731_v33 }
  0x61   : > { %740 = vmatpush.msrb.mxu2 %v7574_v39  ;;  %680 = vmatpush.msrb.mxu0 %v7550_v24  ;;  %v7747_v39 = vand.u32 4294901760, %v1193_v37  ;;  %v7787_v37 = vand.u32 4294901760, %v318_v7 }
  0x62   : > { %633 = vmatmul.f32.vlgmr.msra.gmra.mxu2 %v7547_v21  ;;  %656 = vmatmul.f32.vlgmr.msra.gmra.mxu3 %v7547_v21  ;;  %v7716_v27 = vand.u32 4294901760, %v1037_v26  ;;  %8957 = vst [vmem:[#allocation17_spill] sm:$0xff] %v7739_v36  ;;  %v7745_v38 = vand.u32 4294901760, %v7739_v36  ;;  %v317_v26 = vld [vmem:[%s8898_s4 + $0x30] sm:$0xff] }
  0x63   : > { %764 = vmatpush.msrb.mxu3 %v7550_v24  ;;  %715 = vmatpush.msrb.mxu1 %v714_v2 }
  0x64   : > { %840 = vmatpush.msra.mxu2 %v7586_v47  ;;  %v1199_v40 = vsub.f32 %v7739_v36, %v7745_v38 }
  0x65   : > { %871 = vmatpush.msra.mxu3 %v870_v3 }
  0x66   : > { %581 = vmatmul.f32.vlgmr.msra.gmra.mxu0 %v7558_v28  ;;  %842 = vmatpush.msra.mxu2 %v7591_v49  ;;  %v7752_v42 = vand.u32 4294901760, %v1199_v40 }
  0x67   : > { %789 = vmatpush.msra.mxu0 %v706_v46  ;;  %877 = vmatpush.msra.mxu3 %v876_v6  ;;  %v316_v46 = vld [vmem:[%s8898_s4 + $0x28] sm:$0xff] }
  0x68   : > { %606 = vmatmul.f32.vlgmr.msra.gmra.mxu1 %v7569_v35 }
  0x69   : > { %814 = vmatpush.msra.mxu1 %v7537_v16  ;;  %793 = vmatpush.msra.mxu0 %v712_v52  ;;  %v7688_v16 = vsub.f32 %v312_v13, %v7682_v14  ;;  %v7761_v52 = vand.u32 4294901760, %v316_v46  ;;  %v7779_v13 = vand.u32 4294901760, %v7769_v1 }
  0x6a   : > { %743 = vmatmul.f32.vlgmr.msrb.gmra.mxu2 %v7624_v63  ;;  %768 = vmatmul.f32.vlgmr.msrb.gmra.mxu3 %v7637_v4 }
  0x6b   : > { %816 = vmatpush.msra.mxu1 %v7550_v24  ;;  %951 = vmatpush.msrb.mxu2 %v868_v56  ;;  %v7695_v19 = vand.u32 4294901760, %v7688_v16  ;;  %8958 = vst [vmem:[#allocation18_spill] sm:$0xff] %v7761_v52 }
  0x6c   : > { %976 = vmatpush.msrb.mxu3 %v7586_v47  ;;  %8963 = vst [vmem:[#allocation23_spill] sm:$0xff] %v7779_v13 }
  0x6d   : > { %955 = vmatpush.msrb.mxu2 %v874_v58  ;;  %v1031_v22 = vsub.f32 %v7688_v16, %v7695_v19  ;;  %v7766_v58 = vsub.f32 %v316_v46, %v7761_v52 }
  0x6e   : > { %686 = vmatmul.f32.vlgmr.msrb.gmra.mxu0 %v7656_v10  ;;  %978 = vmatpush.msrb.mxu3 %v7591_v49 }
  0x6f   : > { %899 = vmatpush.msrb.mxu0 %v7595_v51  ;;  %v7710_v24 = vand.u32 4294901760, %v1031_v22  ;;  %8960 = vst [vmem:[#allocation20_spill] sm:$0xff] %v7766_v58  ;;  %v7773_v3 = vand.u32 4294901760, %v7766_v58 }
  0x70   : > { %717 = vmatmul.f32.vlgmr.msrb.gmra.mxu1 %v7610_v57 }
  0x71   : > { %924 = vmatpush.msrb.mxu1 %v7586_v47  ;;  %902 = vmatpush.msrb.mxu0 %v7600_v53  ;;  %8962 = vst [vmem:[#allocation22_spill] sm:$0xff] %v7773_v3  ;;  %v1355_v31 = vsub.f32 %v7766_v58, %v7773_v3 }
  0x72   : > { %848 = vmatmul.f32.vlgmr.msra.gmra.mxu2 %v7663_v12  ;;  %879 = vmatmul.f32.vlgmr.msra.gmra.mxu3 %v7626_v0 }
  0x73   : > { %926 = vmatpush.msrb.mxu1 %v7591_v49  ;;  %1086 = vmatpush.msra.mxu3 %v7682_v14 }
  0x74   : > { %1061 = vmatpush.msra.mxu2 %v7688_v16 }
  0x75   : > { %1088 = vmatpush.msra.mxu3 %v7690_v17 }
  0x76   : > { %795 = vmatmul.f32.vlgmr.msra.gmra.mxu0 %v7610_v57  ;;  %1064 = vmatpush.msra.mxu2 %v7698_v20 }
  0x77   : > { %1002 = vmatpush.msra.mxu0 %v7682_v14 }
  0x78   : > { %818 = vmatmul.f32.vlgmr.msra.gmra.mxu1 %v7610_v57 }
  0x79   : > { %1004 = vmatpush.msra.mxu0 %v7690_v17  ;;  %1033 = vmatpush.msra.mxu1 %v7710_v24 }
  0x7a   : > { %957 = vmatmul.f32.vlgmr.msrb.gmra.mxu2 %v7626_v0  ;;  %980 = vmatmul.f32.vlgmr.msrb.gmra.mxu3 %v7626_v0 }
  0x7b   : > { %1039 = vmatpush.msra.mxu1 %v7716_v27  ;;  %1164 = vmatpush.msrb.mxu2 %v7722_v30 }
  0x7c   : > { %1195 = vmatpush.msrb.mxu3 %v7747_v39 }
  0x7d   : > { %1166 = vmatpush.msrb.mxu2 %v7731_v33 }
  0x7e   : > { %905 = vmatmul.f32.vlgmr.msrb.gmra.mxu0 %v7640_v5  ;;  %1201 = vmatpush.msrb.mxu3 %v7752_v42 }
  0x7f   : > { %1113 = vmatpush.msrb.mxu0 %v7695_v19 }
  0x80   : > { %930 = vmatmul.f32.vlgmr.msrb.gmra.mxu1 %v7650_v8 }
  0x81   : > { %1117 = vmatpush.msrb.mxu0 %v7706_v23  ;;  %1138 = vmatpush.msrb.mxu1 %v7682_v14 }
  0x83   : > { %1140 = vmatpush.msrb.mxu1 %v7690_v17 }
  0xd3   : > { %v363_v43 = vpop.f32.mrf.mxu0 }
  0xd4   : > { %v394_v44 = vpop.f32.mrf.mxu1  ;;  %v420_v45 = vpop.f32.mrf.mxu2 }
  0xd5   : > { %v395_v47 = vadd.f32 %v394_v44, %v363_v43  ;;  %v445_v49 = vpop.f32.mrf.mxu3 }
  0xd7   : > { %v421_v51 = vadd.f32 %v420_v45, %v395_v47  ;;  %v1361_v47 = vsub.f32 %v7769_v1, %v7779_v13 }
  0xd9   : > { %v446_v53 = vadd.f32 %v445_v49, %v421_v51  ;;  %v7793_v49 = vand.u32 4294901760, %v317_v26 }
  0xdb   : > { %v472_v55 = vpop.f32.mrf.mxu0 }
  0xdc   : > { %v473_v56 = vadd.f32 %v472_v55, %v446_v53  ;;  %v495_v59 = vpop.f32.mrf.mxu1  ;;  %v525_v60 = vpop.f32.mrf.mxu2  ;;  %v7796_v53 = vand.u32 4294901760, %v1355_v31  ;;  %v7800_v55 = vsub.f32 %v318_v7, %v7787_v37 }
  0xdd   : > { %v556_v62 = vpop.f32.mrf.mxu3 }
  0xde   : > { %v496_v61 = vadd.f32 %v495_v59, %v473_v56  ;;  %v557_v11 = vadd.f32 %v556_v62, %v525_v60  ;;  %8964 = vst [vmem:[#allocation24_spill] sm:$0xff] %v7796_v53  ;;  %v7803_v60 = vand.u32 4294901760, %v1361_v47  ;;  %v7812_v7 = vand.u32 4294901760, %v7800_v55 }
  0xe0   : > { %v985_v2 = vsel %vm335_vm0, %v496_v61, 0  ;;  %8965 = vst [vmem:[#allocation25_spill] sm:$0xff] %v7803_v60  ;;  %v7806_v61 = vsub.f32 %v317_v26, %v7793_v49 }
  0xe1   : > { %v1005_v6 = vand.u32 4294901760, %v985_v2 }
  0xe2   : > { %v7819_v26 = vand.u32 4294901760, %v7806_v61 }
  0xe3   : > { %v1006_v15 = vsub.f32 %v985_v2, %v1005_v6  ;;  %v582_v22 = vpop.f32.mrf.mxu0  ;;  %1041 = vmatmul.f32.vlgmr.msra.gmra.mxu1 %v1005_v6 }
  0xe4   : > { %v583_v29 = vadd.f32 %v582_v22, %v557_v11  ;;  %1248 = vmatpush.msra.mxu1 %v7722_v30  ;;  %v1523_v47 = vsub.f32 %v7806_v61, %v7819_v26 }
  0xe5   : > { %v607_v40 = vpop.f32.mrf.mxu1  ;;  %1067 = vmatmul.f32.vlgmr.msra.gmra.mxu2 %v1006_v15  ;;  %v634_v43 = vpop.f32.mrf.mxu2  ;;  %v1007_v44 = vand.u32 4294901760, %v1006_v15 }
  0xe6   : > { %v608_v45 = vadd.f32 %v607_v40, %v583_v29  ;;  %v657_v46 = vpop.f32.mrf.mxu3  ;;  %1250 = vmatpush.msra.mxu1 %v7731_v33  ;;  %1275 = vmatpush.msra.mxu2 %v7736_v34 }
  0xe7   : > { %1092 = vmatmul.f32.vlgmr.msra.gmra.mxu3 %v1007_v44  ;;  %v1008_v50 = vsub.f32 %v1006_v15, %v1007_v44  ;;  %v1517_v44 = vsub.f32 %v7800_v55, %v7812_v7 }
  0xe8   : > { %v635_v51 = vadd.f32 %v634_v43, %v608_v45  ;;  %1300 = vmatpush.msra.mxu3 %v7722_v30  ;;  %1279 = vmatpush.msra.mxu2 %v7745_v38 }
  0xe9   : > { %v1009_v56 = vand.u32 4294901760, %v1008_v50 }
  0xea   : > { %v658_v59 = vadd.f32 %v657_v46, %v635_v51  ;;  %1302 = vmatpush.msra.mxu3 %v7731_v33 }
  0xeb   : > { %v687_v62 = vpop.f32.mrf.mxu0  ;;  %1010 = vmatmul.f32.vlgmr.msra.gmra.mxu0 %v1009_v56  ;;  %1142 = vmatmul.f32.vlgmr.msrb.gmra.mxu1 %v1005_v6  ;;  %v328_v56 = vld [vmem:[%s7504_s12 + $0x8] sm:$0xff] }
  0xec   : > { %v1147_v2 = vsel %vm335_vm0, %v658_v59, 0  ;;  %1223 = vmatpush.msra.mxu0 %v7729_v32  ;;  %1357 = vmatpush.msrb.mxu1 %v7796_v53 }
  0xed   : > { %v7814_v11 = vand.u32 4294901760, %v1147_v2  ;;  %v718_v15 = vpop.f32.mrf.mxu1  ;;  %v744_v22 = vpop.f32.mrf.mxu2 }
  0xee   : > { %v719_v29 = vadd.f32 %v718_v15, %v687_v62  ;;  %v769_v31 = vpop.f32.mrf.mxu3  ;;  %1226 = vmatpush.msra.mxu0 %v7739_v36  ;;  %1363 = vmatpush.msrb.mxu1 %v7803_v60  ;;  %v7832_v62 = vand.u32 4294901760, %v1517_v44 }
  0xef   : > { %v1168_v40 = vsub.f32 %v1147_v2, %v7814_v11  ;;  %1203 = vmatmul.f32.vlgmr.msrb.gmra.mxu3 %v7814_v11  ;;  %v7834_v2 = vand.u32 4294901760, %v328_v56 }
  0xf0   : > { %v745_v43 = vadd.f32 %v744_v22, %v719_v29  ;;  %1410 = vmatpush.msrb.mxu3 %v7761_v52  ;;  %8966 = vst [vmem:[#allocation26_spill] sm:$0xff] %v7832_v62 }
  0xf1   : > { %v1169_v45 = vand.u32 4294901760, %v1168_v40 }
  0xf2   : > { %v770_v46 = vadd.f32 %v769_v31, %v745_v43  ;;  %1412 = vmatpush.msrb.mxu3 %v7763_v54  ;;  %v327_v31 = vld [vmem:[%s7504_s12] sm:$0xff] }
  0xf3   : > { %v796_v50 = vpop.f32.mrf.mxu0  ;;  %1119 = vmatmul.f32.vlgmr.msrb.gmra.mxu0 %v1005_v6  ;;  %1254 = vmatmul.f32.vlgmr.msra.gmra.mxu1 %v1169_v45  ;;  %v1170_v51 = vsub.f32 %v1168_v40, %v1169_v45  ;;  %v7839_v6 = vand.u32 4294901760, %v1523_v47  ;;  %v7842_v45 = vsub.f32 %v328_v56, %v7834_v2 }
  0xf4   : > { %v797_v59 = vadd.f32 %v796_v50, %v770_v46  ;;  %1326 = vmatpush.msrb.mxu0 %v7761_v52  ;;  %1462 = vmatpush.msra.mxu1 %v7761_v52  ;;  %v7844_v46 = vand.u32 4294901760, %v327_v31 }
  0xf5   : > { %v819_v15 = vpop.f32.mrf.mxu1  ;;  %v849_v22 = vpop.f32.mrf.mxu2  ;;  %v1171_v29 = vand.u32 4294901760, %v1170_v51  ;;  %8967 = vst [vmem:[#allocation27_spill] sm:$0xff] %v7839_v6  ;;  %v8914_v51 = vand.u32 4294901760, %v7842_v45 }
  0xf6   : > { %v820_v43 = vadd.f32 %v819_v15, %v797_v59  ;;  %1328 = vmatpush.msrb.mxu0 %v7763_v54  ;;  %1464 = vmatpush.msra.mxu1 %v7763_v54  ;;  %v880_v44 = vpop.f32.mrf.mxu3  ;;  %v7852_v47 = vsub.f32 %v327_v31, %v7844_v46  ;;  %v330_v59 = vld [vmem:[%s7504_s12 + $0x18] sm:$0xff] }
  0xf7   : > { %1172 = vmatmul.f32.vlgmr.msrb.gmra.mxu2 %v1171_v29  ;;  %1304 = vmatmul.f32.vlgmr.msra.gmra.mxu3 %v7814_v11  ;;  %v881_v15 = vadd.f32 %v880_v44, %v849_v22  ;;  %v1676_v22 = vsub.f32 %v7842_v45, %v8914_v51  ;;  %v7864_v31 = vand.u32 4294901760, %v330_v59 }
  0xf8   : > { %v1309_v50 = vsel %vm335_vm0, %v820_v43, 0  ;;  %1385 = vmatpush.msrb.mxu2 %v7766_v58  ;;  %1519 = vmatpush.msra.mxu3 %v7832_v62  ;;  %v329_v58 = vld [vmem:[%s7504_s12 + $0x10] sm:$0xff] }
  0xf9   : > { %v1329_v56 = vand.u32 4294901760, %v1309_v50 }
  0xfa   : > { %1388 = vmatpush.msrb.mxu2 %v7769_v1  ;;  %1525 = vmatpush.msra.mxu3 %v7839_v6 }
  0xfb   : > { %v1330_v54 = vsub.f32 %v1309_v50, %v1329_v56  ;;  %v906_v43 = vpop.f32.mrf.mxu0  ;;  %1229 = vmatmul.f32.vlgmr.msra.gmra.mxu0 %v1168_v40  ;;  %1365 = vmatmul.f32.vlgmr.msrb.gmra.mxu1 %v1329_v56  ;;  %v8968_v40 = vand.u32 4294901760, %v7852_v47 }
  0xfc   : > { %v907_v62 = vadd.f32 %v906_v43, %v881_v15  ;;  %1437 = vmatpush.msra.mxu0 %v7773_v3  ;;  %1572 = vmatpush.msrb.mxu1 %v7787_v37  ;;  %v7871_v15 = vand.u32 4294901760, %v329_v58 }
  0xfd   : > { %v931_v44 = vpop.f32.mrf.mxu1  ;;  %v958_v6 = vpop.f32.mrf.mxu2  ;;  %v1331_v1 = vand.u32 4294901760, %v1330_v54  ;;  %v1682_v50 = vsub.f32 %v7852_v47, %v8968_v40 }
  0xfe   : > { %v932_v29 = vadd.f32 %v931_v44, %v907_v62  ;;  %1441 = vmatpush.msra.mxu0 %v7779_v13  ;;  %1574 = vmatpush.msrb.mxu1 %v7793_v49  ;;  %v981_v43 = vpop.f32.mrf.mxu3  ;;  %v1677_v62 = vand.u32 4294901760, %v1676_v22  ;;  %v7877_v44 = vsub.f32 %v330_v59, %v7864_v31 }
  0xff   : > { %1281 = vmatmul.f32.vlgmr.msra.gmra.mxu2 %v7814_v11  ;;  %1416 = vmatmul.f32.vlgmr.msrb.gmra.mxu3 %v1331_v1  ;;  %v1332_v51 = vsub.f32 %v1330_v54, %v1331_v1  ;;  %v1683_v40 = vand.u32 4294901760, %v1682_v50  ;;  %v7882_v11 = vsub.f32 %v329_v58, %v7871_v15 }
 0x100   : > { %v959_v3 = vadd.f32 %v958_v6, %v932_v29  ;;  %1488 = vmatpush.msra.mxu2 %v7787_v37  ;;  %1624 = vmatpush.msrb.mxu3 %v7787_v37  ;;  %v1834_v6 = vand.u32 4294901760, %v7877_v44  ;;  %v332_v29 = vld [vmem:[%s7504_s12 + $0x28] sm:$0xff] }
 0x101   : > { %v1333_v13 = vand.u32 4294901760, %v1332_v51  ;;  %v1964_v50 = vand.u32 4294901760, %v332_v29 }
 0x102   : > { %v982_v52 = vadd.f32 %v981_v43, %v959_v3  ;;  %1490 = vmatpush.msra.mxu2 %v7793_v49  ;;  %1626 = vmatpush.msrb.mxu3 %v7793_v49  ;;  %v1840_v3 = vand.u32 4294901760, %v7882_v11 }
 0x103   : > { %1334 = vmatmul.f32.vlgmr.msrb.gmra.mxu0 %v1333_v13  ;;  %1466 = vmatmul.f32.vlgmr.msra.gmra.mxu1 %v1329_v56 }
 0x104   : > { %v1471_v1 = vsel %vm335_vm0, %v982_v52, 0  ;;  %1547 = vmatpush.msrb.mxu0 %v7800_v55  ;;  %1678 = vmatpush.msra.mxu1 %v1677_v62  ;;  %v1835_v52 = vsub.f32 %v7877_v44, %v1834_v6  ;;  %v1841_v13 = vsub.f32 %v7882_v11, %v1840_v3  ;;  %v331_v62 = vld [vmem:[%s7504_s12 + $0x20] sm:$0xff] }
 0x105   : > { %v1491_v59 = vand.u32 4294901760, %v1471_v1 }
 0x106   : > { %1550 = vmatpush.msrb.mxu0 %v7806_v61  ;;  %1684 = vmatpush.msra.mxu1 %v1683_v40  ;;  %v1836_v22 = vand.u32 4294901760, %v1835_v52  ;;  %v1842_v40 = vand.u32 4294901760, %v1841_v13  ;;  %v8969_v13 = vand.u32 4294901760, %v7842_v45 }
 0x107   : > { %v1492_v51 = vsub.f32 %v1471_v1, %v1491_v59  ;;  %1391 = vmatmul.f32.vlgmr.msrb.gmra.mxu2 %v1330_v54  ;;  %1527 = vmatmul.f32.vlgmr.msra.gmra.mxu3 %v1491_v59  ;;  %v7905_v1 = vsub.f32 %v332_v29, %v1964_v50 }
 0x108   : > { %1599 = vmatpush.msrb.mxu2 %v7812_v7  ;;  %1731 = vmatpush.msra.mxu3 %v7834_v2 }
 0x109   : > { %v1493_v58 = vand.u32 4294901760, %v1492_v51  ;;  %v1993_v52 = vand.u32 4294901760, %v7905_v1 }
 0x10a   : > { %1603 = vmatpush.msrb.mxu2 %v7819_v26  ;;  %1733 = vmatpush.msra.mxu3 %v7844_v46 }
 0x10b   : > { %1443 = vmatmul.f32.vlgmr.msra.gmra.mxu0 %v1329_v56  ;;  %1578 = vmatmul.f32.vlgmr.msrb.gmra.mxu1 %v1493_v58  ;;  %v1494_v54 = vsub.f32 %v1492_v51, %v1493_v58  ;;  %v1966_v56 = vand.u32 4294901760, %v331_v62  ;;  %v334_v58 = vld [vmem:[%s7504_s12 + $0x38] sm:$0xff]  ;;  %v1994_v29 = vsub.f32 %v7905_v1, %v1993_v52 }
 0x10c   : > { %1647 = vmatpush.msra.mxu0 %v7834_v2  ;;  %1783 = vmatpush.msrb.mxu1 %v7834_v2 }
 0x10d   : > { %v1495_v43 = vand.u32 4294901760, %v1494_v54  ;;  %v1998_v2 = vsub.f32 %v331_v62, %v1966_v56 }
 0x10e   : > { %1649 = vmatpush.msra.mxu0 %v7844_v46  ;;  %1785 = vmatpush.msrb.mxu1 %v7844_v46  ;;  %v333_v46 = vld [vmem:[%s7504_s12 + $0x30] sm:$0xff] }
 0x10f   : > { %1496 = vmatmul.f32.vlgmr.msra.gmra.mxu2 %v1495_v43  ;;  %1628 = vmatmul.f32.vlgmr.msrb.gmra.mxu3 %v1491_v59  ;;  %v1999_v54 = vand.u32 4294901760, %v1998_v2  ;;  %v8970_v43 = vand.u32 4294901760, %v7852_v47 }
 0x110   : > { %1706 = vmatpush.msra.mxu2 %v7842_v45  ;;  %1837 = vmatpush.msrb.mxu3 %v1836_v22  ;;  %v2123_v22 = vand.u32 4294901760, %v334_v58  ;;  %v1995_v45 = vand.u32 4294901760, %v1994_v29 }
 0x111   : > { %v2000_v62 = vsub.f32 %v1998_v2, %v1999_v54 }
 0x112   : > { %1709 = vmatpush.msra.mxu2 %v7852_v47  ;;  %1843 = vmatpush.msrb.mxu3 %v1842_v40  ;;  %v2125_v40 = vand.u32 4294901760, %v333_v46 }
 0x113   : > { %1553 = vmatmul.f32.vlgmr.msrb.gmra.mxu0 %v1492_v51  ;;  %1686 = vmatmul.f32.vlgmr.msra.gmra.mxu1 %v7523_v9  ;;  %v2151_v51 = vsub.f32 %v334_v58, %v2123_v22 }
 0x114   : > { %1758 = vmatpush.msrb.mxu0 %v8969_v13  ;;  %1890 = vmatpush.msra.mxu1 %v7864_v31  ;;  %v2001_v13 = vand.u32 4294901760, %v2000_v62  ;;  %v2157_v47 = vsub.f32 %v333_v46, %v2125_v40 }
 0x116   : > { %1762 = vmatpush.msrb.mxu0 %v8970_v43  ;;  %1892 = vmatpush.msra.mxu1 %v7871_v15 }
 0x117   : > { %1605 = vmatmul.f32.vlgmr.msrb.gmra.mxu2 %v1491_v59  ;;  %1737 = vmatmul.f32.vlgmr.msra.gmra.mxu3 %v7553_v25  ;;  %v2152_v59 = vand.u32 4294901760, %v2151_v51 }
 0x118   : > { %1806 = vmatpush.msrb.mxu2 %v7864_v31  ;;  %1942 = vmatpush.msra.mxu3 %v7864_v31  ;;  %v2158_v31 = vand.u32 4294901760, %v2157_v47 }
 0x11a   : > { %1808 = vmatpush.msrb.mxu2 %v7871_v15  ;;  %1944 = vmatpush.msra.mxu3 %v7871_v15  ;;  %v2153_v15 = vsub.f32 %v2151_v51, %v2152_v59  ;;  %v2159_v58 = vsub.f32 %v2157_v47, %v2158_v31 }
 0x11b   : > { %1655 = vmatmul.f32.vlgmr.msra.gmra.mxu0 %v7577_v41  ;;  %1787 = vmatmul.f32.vlgmr.msrb.gmra.mxu1 %v7523_v9 }
 0x11c   : > { %1865 = vmatpush.msra.mxu0 %v7877_v44  ;;  %1996 = vmatpush.msrb.mxu1 %v1995_v45  ;;  %v2154_v46 = vand.u32 4294901760, %v2153_v15  ;;  %v2160_v29 = vand.u32 4294901760, %v2159_v58 }
 0x11e   : > { %1868 = vmatpush.msra.mxu0 %v7882_v11  ;;  %2002 = vmatpush.msrb.mxu1 %v2001_v13 }
 0x11f   : > { %1712 = vmatmul.f32.vlgmr.msra.gmra.mxu2 %v7541_v18  ;;  %1845 = vmatmul.f32.vlgmr.msrb.gmra.mxu3 %v7547_v21 }
 0x120   : > { %1917 = vmatpush.msra.mxu2 %v1834_v6  ;;  %2049 = vmatpush.msrb.mxu3 %v1964_v50 }
 0x122   : > { %1921 = vmatpush.msra.mxu2 %v1840_v3  ;;  %2051 = vmatpush.msrb.mxu3 %v1966_v56 }
 0x123   : > { %1764 = vmatmul.f32.vlgmr.msrb.gmra.mxu0 %v7523_v9  ;;  %1896 = vmatmul.f32.vlgmr.msra.gmra.mxu1 %v7569_v35 }
 0x124   : > { %1965 = vmatpush.msrb.mxu0 %v1964_v50  ;;  %2101 = vmatpush.msra.mxu1 %v1964_v50 }
 0x126   : > { %1967 = vmatpush.msrb.mxu0 %v1966_v56  ;;  %2103 = vmatpush.msra.mxu1 %v1966_v56 }
 0x127   : > { %1814 = vmatmul.f32.vlgmr.msrb.gmra.mxu2 %v7589_v48  ;;  %1946 = vmatmul.f32.vlgmr.msra.gmra.mxu3 %v7547_v21 }
 0x128   : > { %2024 = vmatpush.msrb.mxu2 %v7905_v1  ;;  %2155 = vmatpush.msra.mxu3 %v2154_v46 }
 0x12a   : > { %2027 = vmatpush.msrb.mxu2 %v1998_v2  ;;  %2161 = vmatpush.msra.mxu3 %v2160_v29 }
 0x12b   : > { %1871 = vmatmul.f32.vlgmr.msra.gmra.mxu0 %v7558_v28  ;;  %2004 = vmatmul.f32.vlgmr.msrb.gmra.mxu1 %v7610_v57 }
 0x12c   : > { %2076 = vmatpush.msra.mxu0 %v1993_v52  ;;  %2208 = vmatpush.msrb.mxu1 %v2123_v22 }
 0x12e   : > { %2080 = vmatpush.msra.mxu0 %v1999_v54  ;;  %2210 = vmatpush.msrb.mxu1 %v2125_v40 }
 0x12f   : > { %1923 = vmatmul.f32.vlgmr.msra.gmra.mxu2 %v7547_v21  ;;  %2055 = vmatmul.f32.vlgmr.msrb.gmra.mxu3 %v7637_v4 }
 0x130   : > { %2124 = vmatpush.msra.mxu2 %v2123_v22  ;;  %2260 = vmatpush.msrb.mxu3 %v2123_v22 }
 0x132   : > { %2126 = vmatpush.msra.mxu2 %v2125_v40  ;;  %2262 = vmatpush.msrb.mxu3 %v2125_v40 }
 0x133   : > { %1973 = vmatmul.f32.vlgmr.msrb.gmra.mxu0 %v7656_v10  ;;  %2105 = vmatmul.f32.vlgmr.msra.gmra.mxu1 %v7610_v57 }
 0x134   : > { %2183 = vmatpush.msrb.mxu0 %v2151_v51  ;;  %2317 = vmatpush.msra.mxu1 %v7710_v24 }
 0x136   : > { %2186 = vmatpush.msrb.mxu0 %v2157_v47  ;;  %2323 = vmatpush.msra.mxu1 %v7716_v27 }
 0x137   : > { %2030 = vmatmul.f32.vlgmr.msrb.gmra.mxu2 %v7624_v63  ;;  %2163 = vmatmul.f32.vlgmr.msra.gmra.mxu3 %v7626_v0 }
 0x138   : > { %2235 = vmatpush.msrb.mxu2 %v2152_v59  ;;  %2370 = vmatpush.msra.mxu3 %v7682_v14 }
 0x13a   : > { %2239 = vmatpush.msrb.mxu2 %v2158_v31  ;;  %2372 = vmatpush.msra.mxu3 %v7690_v17 }
 0x13b   : > { %2082 = vmatmul.f32.vlgmr.msra.gmra.mxu0 %v7610_v57  ;;  %2214 = vmatmul.f32.vlgmr.msrb.gmra.mxu1 %v7650_v8 }
 0x13c   : > { %2286 = vmatpush.msra.mxu0 %v7682_v14  ;;  %2422 = vmatpush.msrb.mxu1 %v7682_v14 }
 0x13e   : > { %2288 = vmatpush.msra.mxu0 %v7690_v17  ;;  %2424 = vmatpush.msrb.mxu1 %v7690_v17 }
 0x13f   : > { %2132 = vmatmul.f32.vlgmr.msra.gmra.mxu2 %v7663_v12  ;;  %2264 = vmatmul.f32.vlgmr.msrb.gmra.mxu3 %v7626_v0 }
 0x140   : > { %2345 = vmatpush.msra.mxu2 %v7688_v16  ;;  %2479 = vmatpush.msrb.mxu3 %v7747_v39 }
 0x142   : > { %2348 = vmatpush.msra.mxu2 %v7698_v20  ;;  %2485 = vmatpush.msrb.mxu3 %v7752_v42 }
 0x143   : > { %2189 = vmatmul.f32.vlgmr.msrb.gmra.mxu0 %v7640_v5 }
 0x144   : > { %2397 = vmatpush.msrb.mxu0 %v7695_v19 }
 0x146   : > { %2401 = vmatpush.msrb.mxu0 %v7706_v23 }
 0x147   : > { %2241 = vmatmul.f32.vlgmr.msrb.gmra.mxu2 %v7626_v0 }
 0x148   : > { %2448 = vmatpush.msrb.mxu2 %v7722_v30 }
 0x14a   : > { %2450 = vmatpush.msrb.mxu2 %v7731_v33 }
 0x160   : > { %v7970_v44 = vpop.f32.mrf.mxu1 }
 0x161   : > { %8971 = vst [vmem:[#allocation28_spill] sm:$0xff] %v7970_v44  ;;  %v8999_v44 = vld [vmem:[#allocation21_spill] sm:$0xff] }
 0x168   : > { %v7972_v11 = vpop.f32.mrf.mxu0  ;;  %v7974_v6 = vpop.f32.mrf.mxu1 }
 0x169   : > { %8972 = vst [vmem:[#allocation29_spill] sm:$0xff] %v7972_v11  ;;  %v7982_v56 = vpop.f32.mrf.mxu2  ;;  %v9000_v11 = vld [vmem:[#allocation27_spill] sm:$0xff] }
 0x16a   : > { %8973 = vst [vmem:[#allocation30_spill] sm:$0xff] %v7974_v6  ;;  %v7976_v3 = vpop.f32.mrf.mxu3 }
 0x16b   : > { %8974 = vst [vmem:[#allocation31_spill] sm:$0xff] %v7976_v3 }
 0x16c   : > { %8977 = vst [vmem:[#allocation34_spill] sm:$0xff] %v7982_v56 }
 0x170   : > { %v7978_v50 = vpop.f32.mrf.mxu0  ;;  %v7980_v1 = vpop.f32.mrf.mxu1 }
 0x171   : > { %8975 = vst [vmem:[#allocation32_spill] sm:$0xff] %v7978_v50 }
 0x172   : > { %8976 = vst [vmem:[#allocation33_spill] sm:$0xff] %v7980_v1  ;;  %v7984_v52 = vpop.f32.mrf.mxu3 }
 0x173   : > { %8978 = vst [vmem:[#allocation35_spill] sm:$0xff] %v7984_v52 }
 0x178   : > { %v7986_v2 = vpop.f32.mrf.mxu0  ;;  %v7988_v54 = vpop.f32.mrf.mxu1 }
 0x179   : > { %8979 = vst [vmem:[#allocation36_spill] sm:$0xff] %v7986_v2 }
 0x17a   : > { %8980 = vst [vmem:[#allocation37_spill] sm:$0xff] %v7988_v54  ;;  %v7990_v22 = vpop.f32.mrf.mxu2  ;;  %v7992_v43 = vpop.f32.mrf.mxu3 }
 0x17b   : > { %8981 = vst [vmem:[#allocation38_spill] sm:$0xff] %v7990_v22 }
 0x17c   : > { %8982 = vst [vmem:[#allocation39_spill] sm:$0xff] %v7992_v43 }
 0x180   : > { %v7994_v62 = vpop.f32.mrf.mxu0  ;;  %v7996_v40 = vpop.f32.mrf.mxu1 }
 0x181   : > { %8983 = vst [vmem:[#allocation40_spill] sm:$0xff] %v7994_v62 }
 0x182   : > { %8984 = vst [vmem:[#allocation41_spill] sm:$0xff] %v7996_v40  ;;  %v7998_v45 = vpop.f32.mrf.mxu2  ;;  %v8000_v51 = vpop.f32.mrf.mxu3 }
 0x183   : > { %8985 = vst [vmem:[#allocation42_spill] sm:$0xff] %v7998_v45 }
 0x184   : > { %8986 = vst [vmem:[#allocation43_spill] sm:$0xff] %v8000_v51 }
 0x188   : > { %v8002_v13 = vpop.f32.mrf.mxu0  ;;  %v8008_v31 = vpop.f32.mrf.mxu1 }
 0x189   : > { %8987 = vst [vmem:[#allocation44_spill] sm:$0xff] %v8002_v13 }
 0x18a   : > { %v8004_v47 = vpop.f32.mrf.mxu2  ;;  %v8006_v59 = vpop.f32.mrf.mxu3  ;;  %8990 = vst [vmem:[#allocation47_spill] sm:$0xff] %v8008_v31 }
 0x18b   : > { %8988 = vst [vmem:[#allocation45_spill] sm:$0xff] %v8004_v47 }
 0x18c   : > { %8989 = vst [vmem:[#allocation46_spill] sm:$0xff] %v8006_v59 }
 0x190   : > { %v8010_v15 = vpop.f32.mrf.mxu0  ;;  %v1687_v29 = vpop.f32.mrf.mxu1 }
 0x191   : > { %8991 = vst [vmem:[#allocation48_spill] sm:$0xff] %v8010_v15 }
 0x192   : > { %v8012_v58 = vpop.f32.mrf.mxu2  ;;  %v8014_v46 = vpop.f32.mrf.mxu3 }
 0x193   : > { %8992 = vst [vmem:[#allocation49_spill] sm:$0xff] %v8012_v58 }
 0x194   : > { %8993 = vst [vmem:[#allocation50_spill] sm:$0xff] %v8014_v46 }
 0x198   : > { %v1656_v40 = vpop.f32.mrf.mxu0  ;;  %v1788_v51 = vpop.f32.mrf.mxu1 }
 0x199   : > { %v1688_v13 = vadd.f32 %v1687_v29, %v1656_v40 }
 0x19a   : > { %v8016_v43 = vpop.f32.mrf.mxu2  ;;  %v1738_v54 = vpop.f32.mrf.mxu3 }
 0x19b   : > { %8994 = vst [vmem:[#allocation51_spill] sm:$0xff] %v8016_v43 }
 0x1a0   : > { %v1765_v62 = vpop.f32.mrf.mxu0  ;;  %v1897_v50 = vpop.f32.mrf.mxu1 }
 0x1a2   : > { %v1713_v6 = vpop.f32.mrf.mxu2  ;;  %v1846_v47 = vpop.f32.mrf.mxu3 }
 0x1a3   : > { %v1714_v45 = vadd.f32 %v1713_v6, %v1688_v13 }
 0x1a5   : > { %v1739_v59 = vadd.f32 %v1738_v54, %v1714_v45 }
 0x1a7   : > { %v1766_v1 = vadd.f32 %v1765_v62, %v1739_v59 }
 0x1a8   : > { %v1872_v31 = vpop.f32.mrf.mxu0  ;;  %v2005_v54 = vpop.f32.mrf.mxu1 }
 0x1a9   : > { %v1789_v15 = vadd.f32 %v1788_v51, %v1766_v1 }
 0x1aa   : > { %v1815_v3 = vpop.f32.mrf.mxu2  ;;  %v1947_v56 = vpop.f32.mrf.mxu3 }
 0x1ab   : > { %v2269_v58 = vsel %vm335_vm0, %v1789_v15, 0  ;;  %v1847_v46 = vadd.f32 %v1846_v47, %v1815_v3  ;;  %v8995_v15 = vld [vmem:[#allocation18_spill] sm:$0xff] }
 0x1ac   : > { %v2289_v2 = vand.u32 4294901760, %v2269_v58 }
 0x1ad   : > { %v1873_v52 = vadd.f32 %v1872_v31, %v1847_v46 }
 0x1ae   : > { %v2290_v43 = vsub.f32 %v2269_v58, %v2289_v2  ;;  %2325 = vmatmul.f32.vlgmr.msra.gmra.mxu1 %v2289_v2 }
 0x1af   : > { %2532 = vmatpush.msra.mxu1 %v7722_v30  ;;  %v1898_v6 = vadd.f32 %v1897_v50, %v1873_v52 }
 0x1b0   : > { %2351 = vmatmul.f32.vlgmr.msra.gmra.mxu2 %v2290_v43  ;;  %v2291_v40 = vand.u32 4294901760, %v2290_v43  ;;  %v1974_v29 = vpop.f32.mrf.mxu0  ;;  %v2106_v58 = vpop.f32.mrf.mxu1 }
 0x1b1   : > { %2534 = vmatpush.msra.mxu1 %v7731_v33  ;;  %2559 = vmatpush.msra.mxu2 %v7736_v34  ;;  %v2006_v47 = vadd.f32 %v2005_v54, %v1974_v29 }
 0x1b2   : > { %v1924_v1 = vpop.f32.mrf.mxu2  ;;  %2376 = vmatmul.f32.vlgmr.msra.gmra.mxu3 %v2291_v40  ;;  %v2292_v62 = vsub.f32 %v2290_v43, %v2291_v40  ;;  %v2056_v50 = vpop.f32.mrf.mxu3 }
 0x1b3   : > { %v1925_v3 = vadd.f32 %v1924_v1, %v1898_v6  ;;  %2584 = vmatpush.msra.mxu3 %v7722_v30  ;;  %2563 = vmatpush.msra.mxu2 %v7745_v38  ;;  %v8996_v6 = vld [vmem:[#allocation19_spill] sm:$0xff]  ;;  %v7158_v1 = vld [vmem:[%s7497_s10 + $0x8] sm:$0xff] }
 0x1b4   : > { %v2293_v45 = vand.u32 4294901760, %v2292_v62  ;;  %v2917_v54 = vmul.f32 %v7158_v1, %v7158_v1 }
 0x1b5   : > { %v1948_v51 = vadd.f32 %v1947_v56, %v1925_v3  ;;  %2586 = vmatpush.msra.mxu3 %v7731_v33 }
 0x1b6   : > { %2294 = vmatmul.f32.vlgmr.msra.gmra.mxu0 %v2293_v45  ;;  %2426 = vmatmul.f32.vlgmr.msrb.gmra.mxu1 %v2289_v2 }
 0x1b7   : > { %v2431_v52 = vsel %vm335_vm0, %v1948_v51, 0  ;;  %2507 = vmatpush.msra.mxu0 %v7729_v32  ;;  %2641 = vmatpush.msrb.mxu1 %v7796_v53  ;;  %v8039_v51 = vand.u32 4294901760, %v2917_v54 }
 0x1b8   : > { %v8028_v13 = vand.u32 4294901760, %v2431_v52  ;;  %v2083_v43 = vpop.f32.mrf.mxu0 }
 0x1b9   : > { %2510 = vmatpush.msra.mxu0 %v7739_v36  ;;  %2647 = vmatpush.msrb.mxu1 %v7803_v60 }
 0x1ba   : > { %v2452_v56 = vsub.f32 %v2431_v52, %v8028_v13  ;;  %v2031_v59 = vpop.f32.mrf.mxu2  ;;  %2487 = vmatmul.f32.vlgmr.msrb.gmra.mxu3 %v8028_v13  ;;  %v2164_v3 = vpop.f32.mrf.mxu3  ;;  %v7159_v52 = vld [vmem:[%s7497_s10] sm:$0xff] }
 0x1bb   : > { %v2032_v31 = vadd.f32 %v2031_v59, %v2006_v47  ;;  %2694 = vmatpush.msrb.mxu3 %v8995_v15  ;;  %v2916_v47 = vmul.f32 %v7159_v52, %v7159_v52  ;;  %v7160_v52 = vld [vmem:[%s7497_s10 + $0x18] sm:$0xff] }
 0x1bc   : > { %v2453_v46 = vand.u32 4294901760, %v2452_v56  ;;  %v2919_v22 = vmul.f32 %v7160_v52, %v7160_v52 }
 0x1bd   : > { %v2057_v40 = vadd.f32 %v2056_v50, %v2032_v31  ;;  %2696 = vmatpush.msrb.mxu3 %v8996_v6  ;;  %v8048_v31 = vand.u32 4294901760, %v2916_v47 }
 0x1be   : > { %2403 = vmatmul.f32.vlgmr.msrb.gmra.mxu0 %v2289_v2  ;;  %2538 = vmatmul.f32.vlgmr.msra.gmra.mxu1 %v2453_v46  ;;  %v2454_v29 = vsub.f32 %v2452_v56, %v2453_v46  ;;  %v8066_v52 = vand.u32 4294901760, %v2919_v22 }
 0x1bf   : > { %v2084_v62 = vadd.f32 %v2083_v43, %v2057_v40  ;;  %2610 = vmatpush.msrb.mxu0 %v8995_v15  ;;  %2746 = vmatpush.msra.mxu1 %v8995_v15  ;;  %v8046_v43 = vsub.f32 %v2917_v54, %v8039_v51 }
 0x1c0   : > { %v2455_v45 = vand.u32 4294901760, %v2454_v29  ;;  %v2190_v50 = vpop.f32.mrf.mxu0  ;;  %v8997_v29 = vld [vmem:[#allocation20_spill] sm:$0xff] }
 0x1c1   : > { %v2107_v59 = vadd.f32 %v2106_v58, %v2084_v62  ;;  %2612 = vmatpush.msrb.mxu0 %v8996_v6  ;;  %2748 = vmatpush.msra.mxu1 %v8996_v6  ;;  %v8998_v58 = vld [vmem:[#allocation26_spill] sm:$0xff]  ;;  %v8921_v62 = vand.u32 4294901760, %v8046_v43 }
 0x1c2   : > { %v2133_v2 = vpop.f32.mrf.mxu2  ;;  %2456 = vmatmul.f32.vlgmr.msrb.gmra.mxu2 %v2455_v45  ;;  %2588 = vmatmul.f32.vlgmr.msra.gmra.mxu3 %v8028_v13  ;;  %v8055_v45 = vsub.f32 %v2916_v47, %v8048_v31 }
 0x1c3   : > { %v2593_v46 = vsel %vm335_vm0, %v2107_v59, 0  ;;  %v2165_v40 = vadd.f32 %v2164_v3, %v2133_v2  ;;  %2669 = vmatpush.msrb.mxu2 %v8997_v29  ;;  %2803 = vmatpush.msra.mxu3 %v8998_v58  ;;  %v2215_v3 = vpop.f32.mrf.mxu1  ;;  %v9001_v58 = vld [vmem:[#allocation22_spill] sm:$0xff]  ;;  %v2968_v47 = vsub.f32 %v8046_v43, %v8921_v62  ;;  %v2265_v62 = vpop.f32.mrf.mxu3 }
 0x1c4   : > { %v2613_v1 = vand.u32 4294901760, %v2593_v46  ;;  %v8924_v2 = vand.u32 4294901760, %v8055_v45 }
 0x1c5   : > { %v2191_v54 = vadd.f32 %v2190_v50, %v2165_v40  ;;  %2672 = vmatpush.msrb.mxu2 %v8999_v44  ;;  %2809 = vmatpush.msra.mxu3 %v9000_v11  ;;  %v7161_v50 = vld [vmem:[%s7497_s10 + $0x10] sm:$0xff] }
 0x1c6   : > { %v2614_v59 = vsub.f32 %v2593_v46, %v2613_v1  ;;  %2513 = vmatmul.f32.vlgmr.msra.gmra.mxu0 %v2452_v56  ;;  %2649 = vmatmul.f32.vlgmr.msrb.gmra.mxu1 %v2613_v1  ;;  %v2918_v40 = vmul.f32 %v7161_v50, %v7161_v50  ;;  %v9002_v46 = vld [vmem:[#allocation23_spill] sm:$0xff]  ;;  %v2974_v56 = vsub.f32 %v8055_v45, %v8924_v2 }
 0x1c7   : > { %2721 = vmatpush.msra.mxu0 %v9001_v58  ;;  %2856 = vmatpush.msrb.mxu1 %v7787_v37  ;;  %v2216_v11 = vadd.f32 %v2215_v3, %v2191_v54  ;;  %v2969_v54 = vand.u32 4294901760, %v2968_v47  ;;  %v8080_v3 = vsub.f32 %v2919_v22, %v8066_v52  ;;  %v7162_v47 = vld [vmem:[%s7497_s10 + $0x28] sm:$0xff] }
 0x1c8   : > { %v2615_v44 = vand.u32 4294901760, %v2614_v59  ;;  %v8074_v58 = vand.u32 4294901760, %v2918_v40  ;;  %v2975_v2 = vand.u32 4294901760, %v2974_v56 }
 0x1c9   : > { %2725 = vmatpush.msra.mxu0 %v9002_v46  ;;  %2858 = vmatpush.msrb.mxu1 %v7793_v49 }
 0x1ca   : > { %v2242_v29 = vpop.f32.mrf.mxu2  ;;  %2565 = vmatmul.f32.vlgmr.msra.gmra.mxu2 %v8028_v13  ;;  %2700 = vmatmul.f32.vlgmr.msrb.gmra.mxu3 %v2615_v44  ;;  %v2616_v6 = vsub.f32 %v2614_v59, %v2615_v44  ;;  %v8085_v13 = vsub.f32 %v2918_v40, %v8074_v58  ;;  %v2921_v40 = vmul.f32 %v7162_v47, %v7162_v47 }
 0x1cb   : > { %v2243_v15 = vadd.f32 %v2242_v29, %v2216_v11  ;;  %2772 = vmatpush.msra.mxu2 %v7787_v37  ;;  %2908 = vmatpush.msrb.mxu3 %v7787_v37  ;;  %v8925_v11 = vand.u32 4294901760, %v8080_v3 }
 0x1cc   : > { %v2617_v50 = vand.u32 4294901760, %v2616_v6 }
 0x1cd   : > { %v2266_v46 = vadd.f32 %v2265_v62, %v2243_v15  ;;  %2774 = vmatpush.msra.mxu2 %v7793_v49  ;;  %2910 = vmatpush.msrb.mxu3 %v7793_v49  ;;  %v3132_v15 = vand.u32 4294901760, %v8085_v13  ;;  %v3127_v29 = vsub.f32 %v8080_v3, %v8925_v11 }
 0x1ce   : > { %2618 = vmatmul.f32.vlgmr.msrb.gmra.mxu0 %v2617_v50  ;;  %2750 = vmatmul.f32.vlgmr.msra.gmra.mxu1 %v2613_v1  ;;  %v7163_v50 = vld [vmem:[%s7497_s10 + $0x20] sm:$0xff] }
 0x1cf   : > { %v2755_v44 = vsel %vm335_vm0, %v2266_v46, 0  ;;  %2831 = vmatpush.msrb.mxu0 %v7800_v55  ;;  %2970 = vmatpush.msra.mxu1 %v2969_v54  ;;  %v3128_v46 = vand.u32 4294901760, %v3127_v29  ;;  %v3256_v54 = vand.u32 4294901760, %v2921_v40 }
 0x1d0   : > { %v2775_v22 = vand.u32 4294901760, %v2755_v44 }
 0x1d1   : > { %2834 = vmatpush.msrb.mxu0 %v7806_v61  ;;  %2976 = vmatpush.msra.mxu1 %v2975_v2  ;;  %v3133_v2 = vsub.f32 %v8085_v13, %v3132_v15 }
 0x1d2   : > { %v2776_v6 = vsub.f32 %v2755_v44, %v2775_v22  ;;  %2675 = vmatmul.f32.vlgmr.msrb.gmra.mxu2 %v2614_v59  ;;  %2811 = vmatmul.f32.vlgmr.msra.gmra.mxu3 %v2775_v22  ;;  %v2920_v44 = vmul.f32 %v7163_v50, %v7163_v50 }
 0x1d3   : > { %2883 = vmatpush.msrb.mxu2 %v7812_v7  ;;  %3023 = vmatpush.msra.mxu3 %v8039_v51  ;;  %v3134_v11 = vand.u32 4294901760, %v3133_v2  ;;  %v7165_v2 = vld [vmem:[%s7497_s10 + $0x30] sm:$0xff] }
 0x1d4   : > { %v2777_v62 = vand.u32 4294901760, %v2776_v6 }
 0x1d5   : > { %2887 = vmatpush.msrb.mxu2 %v7819_v26  ;;  %3025 = vmatpush.msra.mxu3 %v8048_v31 }
 0x1d6   : > { %2727 = vmatmul.f32.vlgmr.msra.gmra.mxu0 %v2613_v1  ;;  %2862 = vmatmul.f32.vlgmr.msrb.gmra.mxu1 %v2777_v62  ;;  %v2778_v59 = vsub.f32 %v2776_v6, %v2777_v62  ;;  %v8108_v1 = vsub.f32 %v2921_v40, %v3256_v54  ;;  %v3258_v62 = vand.u32 4294901760, %v2920_v44  ;;  %v9003_v40 = vand.u32 4294901760, %v8046_v43 }
 0x1d7   : > { %2939 = vmatpush.msra.mxu0 %v8039_v51  ;;  %3075 = vmatpush.msrb.mxu1 %v8039_v51 }
 0x1d8   : > { %v2779_v56 = vand.u32 4294901760, %v2778_v59  ;;  %v3285_v51 = vand.u32 4294901760, %v8108_v1  ;;  %v3290_v29 = vsub.f32 %v2920_v44, %v3258_v62  ;;  %v7164_v59 = vld [vmem:[%s7497_s10 + $0x38] sm:$0xff]  ;;  %v9004_v44 = vand.u32 4294901760, %v8055_v45 }
 0x1d9   : > { %2941 = vmatpush.msra.mxu0 %v8048_v31  ;;  %3077 = vmatpush.msrb.mxu1 %v8048_v31  ;;  %v2923_v47 = vmul.f32 %v7164_v59, %v7164_v59 }
 0x1da   : > { %2780 = vmatmul.f32.vlgmr.msra.gmra.mxu2 %v2779_v56  ;;  %2912 = vmatmul.f32.vlgmr.msrb.gmra.mxu3 %v2775_v22  ;;  %v3291_v31 = vand.u32 4294901760, %v3290_v29  ;;  %v2922_v56 = vmul.f32 %v7165_v2, %v7165_v2 }
 0x1db   : > { %2998 = vmatpush.msra.mxu2 %v8046_v43  ;;  %3129 = vmatpush.msrb.mxu3 %v3128_v46  ;;  %v3286_v46 = vsub.f32 %v8108_v1, %v3285_v51  ;;  %v3415_v50 = vand.u32 4294901760, %v2923_v47 }
 0x1dd   : > { %3001 = vmatpush.msra.mxu2 %v8055_v45  ;;  %3135 = vmatpush.msrb.mxu3 %v3134_v11  ;;  %v3292_v11 = vsub.f32 %v3290_v29, %v3291_v31  ;;  %v3287_v43 = vand.u32 4294901760, %v3286_v46  ;;  %v3443_v59 = vsub.f32 %v2923_v47, %v3415_v50 }
 0x1de   : > { %2837 = vmatmul.f32.vlgmr.msrb.gmra.mxu0 %v2776_v6  ;;  %2978 = vmatmul.f32.vlgmr.msra.gmra.mxu1 %v7523_v9  ;;  %v3417_v6 = vand.u32 4294901760, %v2922_v56 }
 0x1df   : > { %3050 = vmatpush.msrb.mxu0 %v9003_v40  ;;  %3182 = vmatpush.msra.mxu1 %v8066_v52  ;;  %v3293_v2 = vand.u32 4294901760, %v3292_v11 }
 0x1e0   : > { %v3449_v45 = vsub.f32 %v2922_v56, %v3417_v6 }
 0x1e1   : > { %3054 = vmatpush.msrb.mxu0 %v9004_v44  ;;  %3184 = vmatpush.msra.mxu1 %v8074_v58 }
 0x1e2   : > { %2889 = vmatmul.f32.vlgmr.msrb.gmra.mxu2 %v2775_v22  ;;  %3029 = vmatmul.f32.vlgmr.msra.gmra.mxu3 %v7553_v25  ;;  %v3444_v22 = vand.u32 4294901760, %v3443_v59 }
 0x1e3   : > { %3098 = vmatpush.msrb.mxu2 %v8066_v52  ;;  %3234 = vmatpush.msra.mxu3 %v8066_v52  ;;  %v3450_v52 = vand.u32 4294901760, %v3449_v45 }
 0x1e4   : > { %v3445_v47 = vsub.f32 %v3443_v59, %v3444_v22 }
 0x1e5   : > { %3100 = vmatpush.msrb.mxu2 %v8074_v58  ;;  %3236 = vmatpush.msra.mxu3 %v8074_v58  ;;  %v9005_v58 = vand.u32 4294901760, %v8080_v3  ;;  %v3451_v56 = vsub.f32 %v3449_v45, %v3450_v52 }
 0x1e6   : > { %2947 = vmatmul.f32.vlgmr.msra.gmra.mxu0 %v7577_v41  ;;  %3079 = vmatmul.f32.vlgmr.msrb.gmra.mxu1 %v7523_v9  ;;  %v3446_v40 = vand.u32 4294901760, %v3445_v47 }
 0x1e7   : > { %3157 = vmatpush.msra.mxu0 %v8080_v3  ;;  %3288 = vmatpush.msrb.mxu1 %v3287_v43  ;;  %v3452_v46 = vand.u32 4294901760, %v3451_v56 }
 0x1e9   : > { %3160 = vmatpush.msra.mxu0 %v8085_v13  ;;  %3294 = vmatpush.msrb.mxu1 %v3293_v2 }
 0x1ea   : > { %3004 = vmatmul.f32.vlgmr.msra.gmra.mxu2 %v7541_v18  ;;  %3137 = vmatmul.f32.vlgmr.msrb.gmra.mxu3 %v7547_v21 }
 0x1eb   : > { %3209 = vmatpush.msra.mxu2 %v9005_v58  ;;  %3341 = vmatpush.msrb.mxu3 %v3256_v54 }
 0x1ed   : > { %3213 = vmatpush.msra.mxu2 %v3132_v15  ;;  %3343 = vmatpush.msrb.mxu3 %v3258_v62 }
 0x1ee   : > { %3056 = vmatmul.f32.vlgmr.msrb.gmra.mxu0 %v7523_v9  ;;  %3188 = vmatmul.f32.vlgmr.msra.gmra.mxu1 %v7569_v35 }
 0x1ef   : > { %3257 = vmatpush.msrb.mxu0 %v3256_v54  ;;  %3393 = vmatpush.msra.mxu1 %v3256_v54 }
 0x1f1   : > { %3259 = vmatpush.msrb.mxu0 %v3258_v62  ;;  %3395 = vmatpush.msra.mxu1 %v3258_v62 }
 0x1f2   : > { %3106 = vmatmul.f32.vlgmr.msrb.gmra.mxu2 %v7589_v48  ;;  %3238 = vmatmul.f32.vlgmr.msra.gmra.mxu3 %v7547_v21 }
 0x1f3   : > { %3316 = vmatpush.msrb.mxu2 %v8108_v1  ;;  %3447 = vmatpush.msra.mxu3 %v3446_v40 }
 0x1f5   : > { %3319 = vmatpush.msrb.mxu2 %v3290_v29  ;;  %3453 = vmatpush.msra.mxu3 %v3452_v46 }
 0x1f6   : > { %3163 = vmatmul.f32.vlgmr.msra.gmra.mxu0 %v7558_v28  ;;  %3296 = vmatmul.f32.vlgmr.msrb.gmra.mxu1 %v7610_v57 }
 0x1f7   : > { %3368 = vmatpush.msra.mxu0 %v3285_v51  ;;  %3500 = vmatpush.msrb.mxu1 %v3415_v50 }
 0x1f9   : > { %3372 = vmatpush.msra.mxu0 %v3291_v31  ;;  %3502 = vmatpush.msrb.mxu1 %v3417_v6 }
 0x1fa   : > { %3215 = vmatmul.f32.vlgmr.msra.gmra.mxu2 %v7547_v21  ;;  %3347 = vmatmul.f32.vlgmr.msrb.gmra.mxu3 %v7637_v4 }
 0x1fb   : > { %3416 = vmatpush.msra.mxu2 %v3415_v50  ;;  %3552 = vmatpush.msrb.mxu3 %v3415_v50 }
 0x1fd   : > { %3418 = vmatpush.msra.mxu2 %v3417_v6  ;;  %3554 = vmatpush.msrb.mxu3 %v3417_v6 }
 0x1fe   : > { %3265 = vmatmul.f32.vlgmr.msrb.gmra.mxu0 %v7656_v10  ;;  %3397 = vmatmul.f32.vlgmr.msra.gmra.mxu1 %v7610_v57 }
 0x1ff   : > { %3475 = vmatpush.msrb.mxu0 %v3443_v59  ;;  %3609 = vmatpush.msra.mxu1 %v7710_v24 }
 0x201   : > { %3478 = vmatpush.msrb.mxu0 %v3449_v45  ;;  %3615 = vmatpush.msra.mxu1 %v7716_v27 }
 0x202   : > { %3322 = vmatmul.f32.vlgmr.msrb.gmra.mxu2 %v7624_v63  ;;  %3455 = vmatmul.f32.vlgmr.msra.gmra.mxu3 %v7626_v0 }
 0x203   : > { %3527 = vmatpush.msrb.mxu2 %v3444_v22  ;;  %3662 = vmatpush.msra.mxu3 %v7682_v14 }
 0x205   : > { %3531 = vmatpush.msrb.mxu2 %v3450_v52  ;;  %3664 = vmatpush.msra.mxu3 %v7690_v17 }
 0x206   : > { %3374 = vmatmul.f32.vlgmr.msra.gmra.mxu0 %v7610_v57  ;;  %3506 = vmatmul.f32.vlgmr.msrb.gmra.mxu1 %v7650_v8 }
 0x207   : > { %3578 = vmatpush.msra.mxu0 %v7682_v14  ;;  %3714 = vmatpush.msrb.mxu1 %v7682_v14 }
 0x209   : > { %3580 = vmatpush.msra.mxu0 %v7690_v17  ;;  %3716 = vmatpush.msrb.mxu1 %v7690_v17 }
 0x20a   : > { %3424 = vmatmul.f32.vlgmr.msra.gmra.mxu2 %v7663_v12  ;;  %3556 = vmatmul.f32.vlgmr.msrb.gmra.mxu3 %v7626_v0 }
 0x20b   : > { %3637 = vmatpush.msra.mxu2 %v7688_v16  ;;  %3771 = vmatpush.msrb.mxu3 %v7747_v39 }
 0x20d   : > { %3640 = vmatpush.msra.mxu2 %v7698_v20  ;;  %3777 = vmatpush.msrb.mxu3 %v7752_v42 }
 0x20e   : > { %3481 = vmatmul.f32.vlgmr.msrb.gmra.mxu0 %v7640_v5 }
 0x20f   : > { %3689 = vmatpush.msrb.mxu0 %v7695_v19 }
 0x211   : > { %3693 = vmatpush.msrb.mxu0 %v7706_v23 }
 0x212   : > { %3533 = vmatmul.f32.vlgmr.msrb.gmra.mxu2 %v7626_v0 }
 0x213   : > { %3740 = vmatpush.msrb.mxu2 %v7722_v30 }
 0x215   : > { %3742 = vmatpush.msrb.mxu2 %v7731_v33 }
 0x22b   : > { %v8173_v3 = vpop.f32.mrf.mxu1 }
 0x22c   : > { %9006 = vst [vmem:[#allocation52_spill] sm:$0xff] %v8173_v3  ;;  %v8269_v3 = vld [vmem:[%s7504_s12 + $0x18] sm:$0xff] }
 0x22d   : > { %9036 = vst [vmem:[#allocation78_spill] sm:$0xff] %v8269_v3 }
 0x233   : > { %v8175_v13 = vpop.f32.mrf.mxu0  ;;  %v8177_v15 = vpop.f32.mrf.mxu1 }
 0x234   : > { %9007 = vst [vmem:[#allocation53_spill] sm:$0xff] %v8175_v13  ;;  %v8185_v51 = vpop.f32.mrf.mxu2 }
 0x235   : > { %9008 = vst [vmem:[#allocation54_spill] sm:$0xff] %v8177_v15  ;;  %v8179_v54 = vpop.f32.mrf.mxu3 }
 0x236   : > { %9009 = vst [vmem:[#allocation55_spill] sm:$0xff] %v8179_v54 }
 0x237   : > { %9012 = vst [vmem:[#allocation58_spill] sm:$0xff] %v8185_v51 }
 0x23b   : > { %v8181_v1 = vpop.f32.mrf.mxu0  ;;  %v8183_v62 = vpop.f32.mrf.mxu1 }
 0x23c   : > { %9010 = vst [vmem:[#allocation56_spill] sm:$0xff] %v8181_v1 }
 0x23d   : > { %9011 = vst [vmem:[#allocation57_spill] sm:$0xff] %v8183_v62  ;;  %v8187_v29 = vpop.f32.mrf.mxu3 }
 0x23e   : > { %9013 = vst [vmem:[#allocation59_spill] sm:$0xff] %v8187_v29 }
 0x243   : > { %v8189_v31 = vpop.f32.mrf.mxu0  ;;  %v8191_v50 = vpop.f32.mrf.mxu1 }
 0x244   : > { %9014 = vst [vmem:[#allocation60_spill] sm:$0xff] %v8189_v31 }
 0x245   : > { %9015 = vst [vmem:[#allocation61_spill] sm:$0xff] %v8191_v50  ;;  %v8193_v44 = vpop.f32.mrf.mxu2  ;;  %v8195_v11 = vpop.f32.mrf.mxu3 }
 0x246   : > { %9016 = vst [vmem:[#allocation62_spill] sm:$0xff] %v8193_v44 }
 0x247   : > { %9017 = vst [vmem:[#allocation63_spill] sm:$0xff] %v8195_v11 }
 0x24b   : > { %v8197_v6 = vpop.f32.mrf.mxu0  ;;  %v8199_v43 = vpop.f32.mrf.mxu1 }
 0x24c   : > { %9018 = vst [vmem:[#allocation64_spill] sm:$0xff] %v8197_v6 }
 0x24d   : > { %9019 = vst [vmem:[#allocation65_spill] sm:$0xff] %v8199_v43  ;;  %v8201_v59 = vpop.f32.mrf.mxu2  ;;  %v8203_v2 = vpop.f32.mrf.mxu3 }
 0x24e   : > { %9020 = vst [vmem:[#allocation66_spill] sm:$0xff] %v8201_v59 }
 0x24f   : > { %9021 = vst [vmem:[#allocation67_spill] sm:$0xff] %v8203_v2 }
 0x253   : > { %v8205_v45 = vpop.f32.mrf.mxu0  ;;  %v8211_v58 = vpop.f32.mrf.mxu1 }
 0x254   : > { %9022 = vst [vmem:[#allocation68_spill] sm:$0xff] %v8205_v45 }
 0x255   : > { %v8207_v22 = vpop.f32.mrf.mxu2  ;;  %v8209_v52 = vpop.f32.mrf.mxu3  ;;  %9025 = vst [vmem:[#allocation71_spill] sm:$0xff] %v8211_v58 }
 0x256   : > { %9023 = vst [vmem:[#allocation69_spill] sm:$0xff] %v8207_v22 }
 0x257   : > { %9024 = vst [vmem:[#allocation70_spill] sm:$0xff] %v8209_v52 }
 0x25b   : > { %v8213_v47 = vpop.f32.mrf.mxu0  ;;  %v2979_v46 = vpop.f32.mrf.mxu1 }
 0x25c   : > { %9026 = vst [vmem:[#allocation72_spill] sm:$0xff] %v8213_v47 }
 0x25d   : > { %v8215_v56 = vpop.f32.mrf.mxu2  ;;  %v8217_v40 = vpop.f32.mrf.mxu3 }
 0x25e   : > { %9027 = vst [vmem:[#allocation73_spill] sm:$0xff] %v8215_v56 }
 0x25f   : > { %9028 = vst [vmem:[#allocation74_spill] sm:$0xff] %v8217_v40 }
 0x263   : > { %v2948_v43 = vpop.f32.mrf.mxu0  ;;  %v3080_v2 = vpop.f32.mrf.mxu1 }
 0x264   : > { %v2980_v45 = vadd.f32 %v2979_v46, %v2948_v43 }
 0x265   : > { %v8219_v11 = vpop.f32.mrf.mxu2  ;;  %v3030_v50 = vpop.f32.mrf.mxu3 }
 0x266   : > { %9029 = vst [vmem:[#allocation75_spill] sm:$0xff] %v8219_v11 }
 0x26b   : > { %v3057_v6 = vpop.f32.mrf.mxu0  ;;  %v3189_v1 = vpop.f32.mrf.mxu1 }
 0x26d   : > { %v3005_v15 = vpop.f32.mrf.mxu2  ;;  %v3138_v22 = vpop.f32.mrf.mxu3 }
 0x26e   : > { %v3006_v59 = vadd.f32 %v3005_v15, %v2980_v45 }
 0x270   : > { %v3031_v52 = vadd.f32 %v3030_v50, %v3006_v59 }
 0x272   : > { %v3058_v62 = vadd.f32 %v3057_v6, %v3031_v52 }
 0x273   : > { %v3164_v58 = vpop.f32.mrf.mxu0  ;;  %v3297_v6 = vpop.f32.mrf.mxu1 }
 0x274   : > { %v3081_v47 = vadd.f32 %v3080_v2, %v3058_v62 }
 0x275   : > { %v3107_v54 = vpop.f32.mrf.mxu2  ;;  %v3239_v51 = vpop.f32.mrf.mxu3 }
 0x276   : > { %v3561_v56 = vsel %vm335_vm0, %v3081_v47, 0  ;;  %v3139_v40 = vadd.f32 %v3138_v22, %v3107_v54  ;;  %v9030_v47 = vld [vmem:[#allocation18_spill] sm:$0xff] }
 0x277   : > { %v3581_v31 = vand.u32 4294901760, %v3561_v56 }
 0x278   : > { %v3165_v29 = vadd.f32 %v3164_v58, %v3139_v40 }
 0x279   : > { %v3582_v11 = vsub.f32 %v3561_v56, %v3581_v31  ;;  %3617 = vmatmul.f32.vlgmr.msra.gmra.mxu1 %v3581_v31 }
 0x27a   : > { %3824 = vmatpush.msra.mxu1 %v7722_v30  ;;  %v3190_v15 = vadd.f32 %v3189_v1, %v3165_v29 }
 0x27b   : > { %v3583_v43 = vand.u32 4294901760, %v3582_v11  ;;  %3643 = vmatmul.f32.vlgmr.msra.gmra.mxu2 %v3582_v11  ;;  %v3266_v46 = vpop.f32.mrf.mxu0  ;;  %v3398_v40 = vpop.f32.mrf.mxu1 }
 0x27c   : > { %3826 = vmatpush.msra.mxu1 %v7731_v33  ;;  %3851 = vmatpush.msra.mxu2 %v7736_v34  ;;  %v3298_v22 = vadd.f32 %v3297_v6, %v3266_v46  ;;  %v8240_v46 = vld [vmem:[%s7504_s12 + $0x8] sm:$0xff] }
 0x27d   : > { %v3584_v62 = vsub.f32 %v3582_v11, %v3583_v43  ;;  %v3216_v50 = vpop.f32.mrf.mxu2  ;;  %3668 = vmatmul.f32.vlgmr.msra.gmra.mxu3 %v3583_v43  ;;  %v3348_v1 = vpop.f32.mrf.mxu3  ;;  %9032 = vst [vmem:[#allocation76_spill] sm:$0xff] %v8240_v46 }
 0x27e   : > { %v3217_v54 = vadd.f32 %v3216_v50, %v3190_v15  ;;  %3876 = vmatpush.msra.mxu3 %v7722_v30  ;;  %3855 = vmatpush.msra.mxu2 %v7745_v38  ;;  %v9031_v15 = vld [vmem:[#allocation19_spill] sm:$0xff]  ;;  %v4209_v50 = vmul.f32 %v8240_v46, %v8240_v46 }
 0x27f   : > { %v3585_v59 = vand.u32 4294901760, %v3584_v62 }
 0x280   : > { %v3240_v2 = vadd.f32 %v3239_v51, %v3217_v54  ;;  %3878 = vmatpush.msra.mxu3 %v7731_v33 }
 0x281   : > { %3586 = vmatmul.f32.vlgmr.msra.gmra.mxu0 %v3585_v59  ;;  %3718 = vmatmul.f32.vlgmr.msrb.gmra.mxu1 %v3581_v31 }
 0x282   : > { %v3723_v29 = vsel %vm335_vm0, %v3240_v2, 0  ;;  %3799 = vmatpush.msra.mxu0 %v7729_v32  ;;  %3933 = vmatpush.msrb.mxu1 %v7796_v53  ;;  %v8246_v2 = vand.u32 4294901760, %v4209_v50 }
 0x283   : > { %v8231_v11 = vand.u32 4294901760, %v3723_v29  ;;  %v3375_v45 = vpop.f32.mrf.mxu0 }
 0x284   : > { %3802 = vmatpush.msra.mxu0 %v7739_v36  ;;  %3939 = vmatpush.msrb.mxu1 %v7803_v60 }
 0x285   : > { %v3744_v51 = vsub.f32 %v3723_v29, %v8231_v11  ;;  %v3323_v52 = vpop.f32.mrf.mxu2  ;;  %3779 = vmatmul.f32.vlgmr.msrb.gmra.mxu3 %v8231_v11  ;;  %v3456_v59 = vpop.f32.mrf.mxu3 }
 0x286   : > { %v3324_v58 = vadd.f32 %v3323_v52, %v3298_v22  ;;  %3986 = vmatpush.msrb.mxu3 %v9030_v47  ;;  %v8257_v52 = vsub.f32 %v4209_v50, %v8246_v2  ;;  %v4211_v50 = vmul.f32 %v8269_v3, %v8269_v3 }
 0x287   : > { %v3745_v56 = vand.u32 4294901760, %v3744_v51 }
 0x288   : > { %v3349_v43 = vadd.f32 %v3348_v1, %v3324_v58  ;;  %3988 = vmatpush.msrb.mxu3 %v9031_v15  ;;  %v8249_v1 = vld [vmem:[%s7504_s12] sm:$0xff]  ;;  %v8281_v3 = vand.u32 4294901760, %v4211_v50 }
 0x289   : > { %v3746_v62 = vsub.f32 %v3744_v51, %v3745_v56  ;;  %3695 = vmatmul.f32.vlgmr.msrb.gmra.mxu0 %v3581_v31  ;;  %3830 = vmatmul.f32.vlgmr.msra.gmra.mxu1 %v3745_v56  ;;  %9033 = vst [vmem:[#allocation77_spill] sm:$0xff] %v8249_v1  ;;  %v4208_v31 = vmul.f32 %v8249_v1, %v8249_v1  ;;  %v9037_v1 = vld [vmem:[#allocation21_spill] sm:$0xff] }
 0x28a   : > { %v3376_v6 = vadd.f32 %v3375_v45, %v3349_v43  ;;  %3902 = vmatpush.msrb.mxu0 %v9030_v47  ;;  %4038 = vmatpush.msra.mxu1 %v9030_v47 }
 0x28b   : > { %v3747_v54 = vand.u32 4294901760, %v3746_v62  ;;  %v3482_v22 = vpop.f32.mrf.mxu0  ;;  %v8259_v58 = vand.u32 4294901760, %v4208_v31  ;;  %v9034_v62 = vld [vmem:[#allocation20_spill] sm:$0xff] }
 0x28c   : > { %v3399_v29 = vadd.f32 %v3398_v40, %v3376_v6  ;;  %3904 = vmatpush.msrb.mxu0 %v9031_v15  ;;  %4040 = vmatpush.msra.mxu1 %v9031_v15  ;;  %v9035_v40 = vld [vmem:[#allocation26_spill] sm:$0xff] }
 0x28d   : > { %v3425_v45 = vpop.f32.mrf.mxu2  ;;  %3748 = vmatmul.f32.vlgmr.msrb.gmra.mxu2 %v3747_v54  ;;  %3880 = vmatmul.f32.vlgmr.msra.gmra.mxu3 %v8231_v11  ;;  %v8266_v54 = vsub.f32 %v4208_v31, %v8259_v58  ;;  %v9040_v31 = vand.u32 4294901760, %v8257_v52  ;;  %v3557_v15 = vpop.f32.mrf.mxu3 }
 0x28e   : > { %v3885_v56 = vsel %vm335_vm0, %v3399_v29, 0  ;;  %v3457_v43 = vadd.f32 %v3456_v59, %v3425_v45  ;;  %3961 = vmatpush.msrb.mxu2 %v9034_v62  ;;  %4095 = vmatpush.msra.mxu3 %v9035_v40  ;;  %v9038_v59 = vld [vmem:[#allocation27_spill] sm:$0xff]  ;;  %v3507_v45 = vpop.f32.mrf.mxu1  ;;  %v9039_v40 = vld [vmem:[#allocation22_spill] sm:$0xff] }
 0x28f   : > { %v3905_v6 = vand.u32 4294901760, %v3885_v56  ;;  %v8932_v44 = vand.u32 4294901760, %v8266_v54  ;;  %v4260_v62 = vsub.f32 %v8257_v52, %v9040_v31 }
 0x290   : > { %v3483_v13 = vadd.f32 %v3482_v22, %v3457_v43  ;;  %3964 = vmatpush.msrb.mxu2 %v9037_v1  ;;  %4101 = vmatpush.msra.mxu3 %v9038_v59  ;;  %v8284_v22 = vld [vmem:[%s7504_s12 + $0x10] sm:$0xff]  ;;  %v9042_v59 = vld [vmem:[#allocation23_spill] sm:$0xff] }
 0x291   : > { %v3906_v29 = vsub.f32 %v3885_v56, %v3905_v6  ;;  %3805 = vmatmul.f32.vlgmr.msra.gmra.mxu0 %v3744_v51  ;;  %3941 = vmatmul.f32.vlgmr.msrb.gmra.mxu1 %v3905_v6  ;;  %9041 = vst [vmem:[#allocation79_spill] sm:$0xff] %v8284_v22  ;;  %v4210_v56 = vmul.f32 %v8284_v22, %v8284_v22 }
 0x292   : > { %4013 = vmatpush.msra.mxu0 %v9039_v40  ;;  %4148 = vmatpush.msrb.mxu1 %v7787_v37  ;;  %v3508_v51 = vadd.f32 %v3507_v45, %v3483_v13  ;;  %v4266_v40 = vsub.f32 %v8266_v54, %v8932_v44  ;;  %v4261_v13 = vand.u32 4294901760, %v4260_v62  ;;  %v8299_v45 = vsub.f32 %v4211_v50, %v8281_v3 }
 0x293   : > { %v3907_v43 = vand.u32 4294901760, %v3906_v29  ;;  %v8293_v1 = vand.u32 4294901760, %v4210_v56 }
 0x294   : > { %4017 = vmatpush.msra.mxu0 %v9042_v59  ;;  %4150 = vmatpush.msrb.mxu1 %v7793_v49  ;;  %v4267_v44 = vand.u32 4294901760, %v4266_v40  ;;  %v8934_v62 = vand.u32 4294901760, %v8299_v45 }
 0x295   : > { %v3908_v31 = vsub.f32 %v3906_v29, %v3907_v43  ;;  %v3534_v46 = vpop.f32.mrf.mxu2  ;;  %3857 = vmatmul.f32.vlgmr.msra.gmra.mxu2 %v8231_v11  ;;  %3992 = vmatmul.f32.vlgmr.msrb.gmra.mxu3 %v3907_v43  ;;  %v8304_v11 = vsub.f32 %v4210_v56, %v8293_v1 }
 0x296   : > { %v3535_v47 = vadd.f32 %v3534_v46, %v3508_v51  ;;  %4064 = vmatpush.msra.mxu2 %v7787_v37  ;;  %4200 = vmatpush.msrb.mxu3 %v7787_v37  ;;  %v4419_v40 = vsub.f32 %v8299_v45, %v8934_v62 }
 0x297   : > { %v3909_v59 = vand.u32 4294901760, %v3908_v31 }
 0x298   : > { %v3558_v22 = vadd.f32 %v3557_v15, %v3535_v47  ;;  %4066 = vmatpush.msra.mxu2 %v7793_v49  ;;  %4202 = vmatpush.msrb.mxu3 %v7793_v49  ;;  %v8933_v47 = vand.u32 4294901760, %v8304_v11  ;;  %v4420_v43 = vand.u32 4294901760, %v4419_v40 }
 0x299   : > { %3910 = vmatmul.f32.vlgmr.msrb.gmra.mxu0 %v3909_v59  ;;  %4042 = vmatmul.f32.vlgmr.msra.gmra.mxu1 %v3905_v6 }
 0x29a   : > { %v4047_v46 = vsel %vm335_vm0, %v3558_v22, 0  ;;  %4123 = vmatpush.msrb.mxu0 %v7800_v55  ;;  %4262 = vmatpush.msra.mxu1 %v4261_v13  ;;  %v8322_v22 = vld [vmem:[%s7504_s12 + $0x28] sm:$0xff]  ;;  %v8329_v13 = vld [vmem:[%s7504_s12 + $0x20] sm:$0xff] }
 0x29b   : > { %v4067_v50 = vand.u32 4294901760, %v4047_v46  ;;  %v4213_v56 = vmul.f32 %v8322_v22, %v8322_v22 }
 0x29c   : > { %4126 = vmatpush.msrb.mxu0 %v7806_v61  ;;  %4268 = vmatpush.msra.mxu1 %v4267_v44  ;;  %v4425_v44 = vsub.f32 %v8304_v11, %v8933_v47  ;;  %v8340_v47 = vld [vmem:[%s7504_s12 + $0x38] sm:$0xff] }
 0x29d   : > { %v4068_v15 = vsub.f32 %v4047_v46, %v4067_v50  ;;  %3967 = vmatmul.f32.vlgmr.msrb.gmra.mxu2 %v3906_v29  ;;  %4103 = vmatmul.f32.vlgmr.msra.gmra.mxu3 %v4067_v50  ;;  %v4548_v31 = vand.u32 4294901760, %v4213_v56  ;;  %v4212_v46 = vmul.f32 %v8329_v13, %v8329_v13  ;;  %9043 = vst [vmem:[#allocation80_spill] sm:$0xff] %v8340_v47 }
 0x29e   : > { %4175 = vmatpush.msrb.mxu2 %v7812_v7  ;;  %4315 = vmatpush.msra.mxu3 %v8246_v2  ;;  %v4215_v62 = vmul.f32 %v8340_v47, %v8340_v47  ;;  %v9046_v47 = vand.u32 4294901760, %v8266_v54 }
 0x29f   : > { %v4069_v59 = vand.u32 4294901760, %v4068_v15  ;;  %v4550_v40 = vand.u32 4294901760, %v4212_v46 }
 0x2a0   : > { %4179 = vmatpush.msrb.mxu2 %v7819_v26  ;;  %4317 = vmatpush.msra.mxu3 %v8259_v58 }
 0x2a1   : > { %v4070_v29 = vsub.f32 %v4068_v15, %v4069_v59  ;;  %4019 = vmatmul.f32.vlgmr.msra.gmra.mxu0 %v3905_v6  ;;  %4154 = vmatmul.f32.vlgmr.msrb.gmra.mxu1 %v4069_v59  ;;  %v4426_v6 = vand.u32 4294901760, %v4425_v44  ;;  %v8335_v59 = vsub.f32 %v4213_v56, %v4548_v31  ;;  %v8347_v44 = vld [vmem:[%s7504_s12 + $0x30] sm:$0xff]  ;;  %s305_s12 = sld [smem:[#allocation2]] }
 0x2a2   : > { %4231 = vmatpush.msra.mxu0 %v8246_v2  ;;  %4367 = vmatpush.msrb.mxu1 %v8246_v2  ;;  %9044 = vst [vmem:[#allocation81_spill] sm:$0xff] %v8347_v44  ;;  %v4214_v56 = vmul.f32 %v8347_v44, %v8347_v44 }
 0x2a3   : > { %v4071_v51 = vand.u32 4294901760, %v4070_v29  ;;  %v4577_v2 = vand.u32 4294901760, %v8335_v59  ;;  %v4582_v29 = vsub.f32 %v4212_v46, %v4550_v40  ;;  %v4707_v46 = vand.u32 4294901760, %v4215_v62 }
 0x2a4   : > { %4233 = vmatpush.msra.mxu0 %v8259_v58  ;;  %4369 = vmatpush.msrb.mxu1 %v8259_v58 }
 0x2a5   : > { %4072 = vmatmul.f32.vlgmr.msra.gmra.mxu2 %v4071_v51  ;;  %4204 = vmatmul.f32.vlgmr.msrb.gmra.mxu3 %v4067_v50  ;;  %v4583_v58 = vand.u32 4294901760, %v4582_v29  ;;  %v4578_v51 = vsub.f32 %v8335_v59, %v4577_v2 }
 0x2a6   : > { %4290 = vmatpush.msra.mxu2 %v8257_v52  ;;  %4421 = vmatpush.msrb.mxu3 %v4420_v43  ;;  %v9045_v43 = vand.u32 4294901760, %v8257_v52 }
 0x2a7   : > { %v4579_v52 = vand.u32 4294901760, %v4578_v51 }
 0x2a8   : > { %4293 = vmatpush.msra.mxu2 %v8266_v54  ;;  %4427 = vmatpush.msrb.mxu3 %v4426_v6  ;;  %v4709_v6 = vand.u32 4294901760, %v4214_v56 }
 0x2a9   : > { %4129 = vmatmul.f32.vlgmr.msrb.gmra.mxu0 %v4068_v15  ;;  %4270 = vmatmul.f32.vlgmr.msra.gmra.mxu1 %v7523_v9  ;;  %v4584_v15 = vsub.f32 %v4582_v29, %v4583_v58 }
 0x2aa   : > { %4342 = vmatpush.msrb.mxu0 %v9045_v43  ;;  %4474 = vmatpush.msra.mxu1 %v8281_v3  ;;  %v4735_v43 = vsub.f32 %v4215_v62, %v4707_v46  ;;  %v4741_v54 = vsub.f32 %v4214_v56, %v4709_v6 }
 0x2ab   : > { %v4585_v44 = vand.u32 4294901760, %v4584_v15 }
 0x2ac   : > { %4346 = vmatpush.msrb.mxu0 %v9046_v47  ;;  %4476 = vmatpush.msra.mxu1 %v8293_v1  ;;  %v9048_v47 = vand.u32 4294901760, %v8304_v11 }
 0x2ad   : > { %4181 = vmatmul.f32.vlgmr.msrb.gmra.mxu2 %v4067_v50  ;;  %4321 = vmatmul.f32.vlgmr.msra.gmra.mxu3 %v7553_v25  ;;  %v4736_v50 = vand.u32 4294901760, %v4735_v43 }
 0x2ae   : > { %4390 = vmatpush.msrb.mxu2 %v8281_v3  ;;  %4526 = vmatpush.msra.mxu3 %v8281_v3  ;;  %v4742_v3 = vand.u32 4294901760, %v4741_v54 }
 0x2af   : > { %v4737_v62 = vsub.f32 %v4735_v43, %v4736_v50 }
 0x2b0   : > { %4392 = vmatpush.msrb.mxu2 %v8293_v1  ;;  %4528 = vmatpush.msra.mxu3 %v8293_v1  ;;  %v9047_v1 = vand.u32 4294901760, %v8299_v45  ;;  %v4743_v56 = vsub.f32 %v4741_v54, %v4742_v3 }
 0x2b1   : > { %4239 = vmatmul.f32.vlgmr.msra.gmra.mxu0 %v7577_v41  ;;  %4371 = vmatmul.f32.vlgmr.msrb.gmra.mxu1 %v7523_v9 }
 0x2b2   : > { %4449 = vmatpush.msra.mxu0 %v8299_v45  ;;  %4580 = vmatpush.msrb.mxu1 %v4579_v52  ;;  %v4744_v51 = vand.u32 4294901760, %v4743_v56 }
 0x2b4   : > { %4452 = vmatpush.msra.mxu0 %v8304_v11  ;;  %4586 = vmatpush.msrb.mxu1 %v4585_v44  ;;  %v4738_v44 = vand.u32 4294901760, %v4737_v62 }
 0x2b5   : > { %4296 = vmatmul.f32.vlgmr.msra.gmra.mxu2 %v7541_v18  ;;  %4429 = vmatmul.f32.vlgmr.msrb.gmra.mxu3 %v7547_v21 }
 0x2b6   : > { %4501 = vmatpush.msra.mxu2 %v9047_v1  ;;  %4633 = vmatpush.msrb.mxu3 %v4548_v31 }
 0x2b8   : > { %4505 = vmatpush.msra.mxu2 %v9048_v47  ;;  %4635 = vmatpush.msrb.mxu3 %v4550_v40 }
 0x2b9   : > { %4348 = vmatmul.f32.vlgmr.msrb.gmra.mxu0 %v7523_v9  ;;  %4480 = vmatmul.f32.vlgmr.msra.gmra.mxu1 %v7569_v35 }
 0x2ba   : > { %4549 = vmatpush.msrb.mxu0 %v4548_v31  ;;  %4685 = vmatpush.msra.mxu1 %v4548_v31 }
 0x2bc   : > { %4551 = vmatpush.msrb.mxu0 %v4550_v40  ;;  %4687 = vmatpush.msra.mxu1 %v4550_v40 }
 0x2bd   : > { %4398 = vmatmul.f32.vlgmr.msrb.gmra.mxu2 %v7589_v48  ;;  %4530 = vmatmul.f32.vlgmr.msra.gmra.mxu3 %v7547_v21 }
 0x2be   : > { %4608 = vmatpush.msrb.mxu2 %v8335_v59  ;;  %4739 = vmatpush.msra.mxu3 %v4738_v44 }
 0x2c0   : > { %4611 = vmatpush.msrb.mxu2 %v4582_v29  ;;  %4745 = vmatpush.msra.mxu3 %v4744_v51 }
 0x2c1   : > { %4455 = vmatmul.f32.vlgmr.msra.gmra.mxu0 %v7558_v28  ;;  %4588 = vmatmul.f32.vlgmr.msrb.gmra.mxu1 %v7610_v57 }
 0x2c2   : > { %4660 = vmatpush.msra.mxu0 %v4577_v2  ;;  %4792 = vmatpush.msrb.mxu1 %v4707_v46 }
 0x2c4   : > { %4664 = vmatpush.msra.mxu0 %v4583_v58  ;;  %4794 = vmatpush.msrb.mxu1 %v4709_v6 }
 0x2c5   : > { %4507 = vmatmul.f32.vlgmr.msra.gmra.mxu2 %v7547_v21  ;;  %4639 = vmatmul.f32.vlgmr.msrb.gmra.mxu3 %v7637_v4 }
 0x2c6   : > { %4708 = vmatpush.msra.mxu2 %v4707_v46  ;;  %4844 = vmatpush.msrb.mxu3 %v4707_v46 }
 0x2c8   : > { %4710 = vmatpush.msra.mxu2 %v4709_v6  ;;  %4846 = vmatpush.msrb.mxu3 %v4709_v6 }
 0x2c9   : > { %4557 = vmatmul.f32.vlgmr.msrb.gmra.mxu0 %v7656_v10  ;;  %4689 = vmatmul.f32.vlgmr.msra.gmra.mxu1 %v7610_v57 }
 0x2ca   : > { %4767 = vmatpush.msrb.mxu0 %v4735_v43  ;;  %4901 = vmatpush.msra.mxu1 %v7710_v24 }
 0x2cc   : > { %4770 = vmatpush.msrb.mxu0 %v4741_v54  ;;  %4907 = vmatpush.msra.mxu1 %v7716_v27 }
 0x2cd   : > { %4614 = vmatmul.f32.vlgmr.msrb.gmra.mxu2 %v7624_v63  ;;  %4747 = vmatmul.f32.vlgmr.msra.gmra.mxu3 %v7626_v0 }
 0x2ce   : > { %4819 = vmatpush.msrb.mxu2 %v4736_v50  ;;  %4954 = vmatpush.msra.mxu3 %v7682_v14 }
 0x2d0   : > { %4823 = vmatpush.msrb.mxu2 %v4742_v3  ;;  %4956 = vmatpush.msra.mxu3 %v7690_v17 }
 0x2d1   : > { %4666 = vmatmul.f32.vlgmr.msra.gmra.mxu0 %v7610_v57  ;;  %4798 = vmatmul.f32.vlgmr.msrb.gmra.mxu1 %v7650_v8 }
 0x2d2   : > { %4870 = vmatpush.msra.mxu0 %v7682_v14  ;;  %5006 = vmatpush.msrb.mxu1 %v7682_v14 }
 0x2d4   : > { %4872 = vmatpush.msra.mxu0 %v7690_v17  ;;  %5008 = vmatpush.msrb.mxu1 %v7690_v17 }
 0x2d5   : > { %4716 = vmatmul.f32.vlgmr.msra.gmra.mxu2 %v7663_v12  ;;  %4848 = vmatmul.f32.vlgmr.msrb.gmra.mxu3 %v7626_v0 }
 0x2d6   : > { %4929 = vmatpush.msra.mxu2 %v7688_v16  ;;  %5063 = vmatpush.msrb.mxu3 %v7747_v39 }
 0x2d8   : > { %4932 = vmatpush.msra.mxu2 %v7698_v20  ;;  %5069 = vmatpush.msrb.mxu3 %v7752_v42 }
 0x2d9   : > { %4773 = vmatmul.f32.vlgmr.msrb.gmra.mxu0 %v7640_v5 }
 0x2da   : > { %4981 = vmatpush.msrb.mxu0 %v7695_v19 }
 0x2dc   : > { %4985 = vmatpush.msrb.mxu0 %v7706_v23 }
 0x2dd   : > { %4825 = vmatmul.f32.vlgmr.msrb.gmra.mxu2 %v7626_v0 }
 0x2de   : > { %5032 = vmatpush.msrb.mxu2 %v7722_v30 }
 0x2e0   : > { %5034 = vmatpush.msrb.mxu2 %v7731_v33 }
 0x2f6   : > { %v8408_v45 = vpop.f32.mrf.mxu1 }
 0x2f7   : > { %9049 = vst [vmem:[#allocation82_spill] sm:$0xff] %v8408_v45 }
 0x2fe   : > { %v8410_v11 = vpop.f32.mrf.mxu0  ;;  %v8412_v31 = vpop.f32.mrf.mxu1 }
 0x2ff   : > { %9050 = vst [vmem:[#allocation83_spill] sm:$0xff] %v8410_v11  ;;  %v8420_v29 = vpop.f32.mrf.mxu2  ;;  %v9079_v11 = vld [vmem:[#allocation78_spill] sm:$0xff] }
 0x300   : > { %9051 = vst [vmem:[#allocation84_spill] sm:$0xff] %v8412_v31  ;;  %v8414_v59 = vpop.f32.mrf.mxu3 }
 0x301   : > { %9052 = vst [vmem:[#allocation85_spill] sm:$0xff] %v8414_v59 }
 0x302   : > { %9055 = vst [vmem:[#allocation88_spill] sm:$0xff] %v8420_v29 }
 0x306   : > { %v8416_v40 = vpop.f32.mrf.mxu0  ;;  %v8418_v2 = vpop.f32.mrf.mxu1 }
 0x307   : > { %9053 = vst [vmem:[#allocation86_spill] sm:$0xff] %v8416_v40 }
 0x308   : > { %9054 = vst [vmem:[#allocation87_spill] sm:$0xff] %v8418_v2  ;;  %v8422_v58 = vpop.f32.mrf.mxu3 }
 0x309   : > { %9056 = vst [vmem:[#allocation89_spill] sm:$0xff] %v8422_v58 }
 0x30e   : > { %v8424_v46 = vpop.f32.mrf.mxu0  ;;  %v8426_v15 = vpop.f32.mrf.mxu1 }
 0x30f   : > { %9057 = vst [vmem:[#allocation90_spill] sm:$0xff] %v8424_v46 }
 0x310   : > { %9058 = vst [vmem:[#allocation91_spill] sm:$0xff] %v8426_v15  ;;  %v8428_v6 = vpop.f32.mrf.mxu2  ;;  %v8430_v52 = vpop.f32.mrf.mxu3 }
 0x311   : > { %9059 = vst [vmem:[#allocation92_spill] sm:$0xff] %v8428_v6 }
 0x312   : > { %9060 = vst [vmem:[#allocation93_spill] sm:$0xff] %v8430_v52 }
 0x316   : > { %v8432_v43 = vpop.f32.mrf.mxu0  ;;  %v8434_v54 = vpop.f32.mrf.mxu1 }
 0x317   : > { %9061 = vst [vmem:[#allocation94_spill] sm:$0xff] %v8432_v43 }
 0x318   : > { %9062 = vst [vmem:[#allocation95_spill] sm:$0xff] %v8434_v54  ;;  %v8436_v50 = vpop.f32.mrf.mxu2  ;;  %v8438_v3 = vpop.f32.mrf.mxu3 }
 0x319   : > { %9063 = vst [vmem:[#allocation96_spill] sm:$0xff] %v8436_v50 }
 0x31a   : > { %9064 = vst [vmem:[#allocation97_spill] sm:$0xff] %v8438_v3 }
 0x31e   : > { %v8440_v1 = vpop.f32.mrf.mxu0  ;;  %v8446_v56 = vpop.f32.mrf.mxu1 }
 0x31f   : > { %9065 = vst [vmem:[#allocation98_spill] sm:$0xff] %v8440_v1 }
 0x320   : > { %v8442_v62 = vpop.f32.mrf.mxu2  ;;  %v8444_v47 = vpop.f32.mrf.mxu3  ;;  %9068 = vst [vmem:[#allocation101_spill] sm:$0xff] %v8446_v56 }
 0x321   : > { %9066 = vst [vmem:[#allocation99_spill] sm:$0xff] %v8442_v62 }
 0x322   : > { %9067 = vst [vmem:[#allocation100_spill] sm:$0xff] %v8444_v47 }
 0x326   : > { %v8448_v44 = vpop.f32.mrf.mxu0  ;;  %v4271_v15 = vpop.f32.mrf.mxu1 }
 0x327   : > { %9069 = vst [vmem:[#allocation102_spill] sm:$0xff] %v8448_v44 }
 0x328   : > { %v8450_v51 = vpop.f32.mrf.mxu2  ;;  %v8452_v52 = vpop.f32.mrf.mxu3 }
 0x329   : > { %9070 = vst [vmem:[#allocation103_spill] sm:$0xff] %v8450_v51 }
 0x32a   : > { %9071 = vst [vmem:[#allocation104_spill] sm:$0xff] %v8452_v52 }
 0x32e   : > { %v4240_v54 = vpop.f32.mrf.mxu0  ;;  %v4372_v3 = vpop.f32.mrf.mxu1 }
 0x32f   : > { %v4272_v1 = vadd.f32 %v4271_v15, %v4240_v54 }
 0x330   : > { %v8454_v43 = vpop.f32.mrf.mxu2  ;;  %v4322_v31 = vpop.f32.mrf.mxu3 }
 0x331   : > { %9072 = vst [vmem:[#allocation105_spill] sm:$0xff] %v8454_v43 }
 0x336   : > { %v4349_v50 = vpop.f32.mrf.mxu0  ;;  %v4481_v46 = vpop.f32.mrf.mxu1 }
 0x338   : > { %v4297_v2 = vpop.f32.mrf.mxu2  ;;  %v4430_v62 = vpop.f32.mrf.mxu3 }
 0x339   : > { %v4298_v40 = vadd.f32 %v4297_v2, %v4272_v1 }
 0x33b   : > { %v4323_v47 = vadd.f32 %v4322_v31, %v4298_v40 }
 0x33d   : > { %v4350_v59 = vadd.f32 %v4349_v50, %v4323_v47 }
 0x33e   : > { %v4456_v56 = vpop.f32.mrf.mxu0  ;;  %v4589_v40 = vpop.f32.mrf.mxu1 }
 0x33f   : > { %v4373_v44 = vadd.f32 %v4372_v3, %v4350_v59 }
 0x340   : > { %v4399_v29 = vpop.f32.mrf.mxu2  ;;  %v4531_v6 = vpop.f32.mrf.mxu3 }
 0x341   : > { %v4853_v51 = vsel %vm335_vm0, %v4373_v44, 0  ;;  %v4431_v52 = vadd.f32 %v4430_v62, %v4399_v29 }
 0x342   : > { %v4873_v58 = vand.u32 4294901760, %v4853_v51 }
 0x343   : > { %v4457_v45 = vadd.f32 %v4456_v56, %v4431_v52  ;;  %v9073_v56 = vld [vmem:[#allocation18_spill] sm:$0xff] }
 0x344   : > { %v4874_v43 = vsub.f32 %v4853_v51, %v4873_v58  ;;  %4909 = vmatmul.f32.vlgmr.msra.gmra.mxu1 %v4873_v58 }
 0x345   : > { %5116 = vmatpush.msra.mxu1 %v7722_v30  ;;  %v4482_v2 = vadd.f32 %v4481_v46, %v4457_v45 }
 0x346   : > { %v4875_v15 = vand.u32 4294901760, %v4874_v43  ;;  %4935 = vmatmul.f32.vlgmr.msra.gmra.mxu2 %v4874_v43  ;;  %v4558_v54 = vpop.f32.mrf.mxu0  ;;  %v4690_v51 = vpop.f32.mrf.mxu1 }
 0x347   : > { %5118 = vmatpush.msra.mxu1 %v7731_v33  ;;  %5143 = vmatpush.msra.mxu2 %v7736_v34  ;;  %v4590_v1 = vadd.f32 %v4589_v40, %v4558_v54  ;;  %v7174_v54 = vld [vmem:[%s7497_s10 + $0x8] sm:$0xff] }
 0x348   : > { %v4876_v31 = vsub.f32 %v4874_v43, %v4875_v15  ;;  %v4508_v59 = vpop.f32.mrf.mxu2  ;;  %4960 = vmatmul.f32.vlgmr.msra.gmra.mxu3 %v4875_v15  ;;  %v4640_v45 = vpop.f32.mrf.mxu3 }
 0x349   : > { %v4509_v29 = vadd.f32 %v4508_v59, %v4482_v2  ;;  %5168 = vmatpush.msra.mxu3 %v7722_v30  ;;  %5147 = vmatpush.msra.mxu2 %v7745_v38  ;;  %v9074_v2 = vld [vmem:[#allocation19_spill] sm:$0xff]  ;;  %v9075_v59 = vld [vmem:[#allocation76_spill] sm:$0xff] }
 0x34a   : > { %v4877_v52 = vand.u32 4294901760, %v4876_v31  ;;  %v5501_v40 = vmul.f32 %v7174_v54, %v9075_v59  ;;  %v9077_v59 = vld [vmem:[#allocation20_spill] sm:$0xff] }
 0x34b   : > { %v4532_v50 = vadd.f32 %v4531_v6, %v4509_v29  ;;  %5170 = vmatpush.msra.mxu3 %v7731_v33 }
 0x34c   : > { %4878 = vmatmul.f32.vlgmr.msra.gmra.mxu0 %v4877_v52  ;;  %5010 = vmatmul.f32.vlgmr.msrb.gmra.mxu1 %v4873_v58 }
 0x34d   : > { %v5015_v46 = vsel %vm335_vm0, %v4532_v50, 0  ;;  %5091 = vmatpush.msra.mxu0 %v7729_v32  ;;  %5225 = vmatpush.msrb.mxu1 %v7796_v53 }
 0x34e   : > { %v8466_v43 = vand.u32 4294901760, %v5015_v46  ;;  %v4667_v3 = vpop.f32.mrf.mxu0 }
 0x34f   : > { %5094 = vmatpush.msra.mxu0 %v7739_v36  ;;  %5231 = vmatpush.msrb.mxu1 %v7803_v60  ;;  %v9081_v60 = vld [vmem:[#allocation27_spill] sm:$0xff] }
 0x350   : > { %v5036_v6 = vsub.f32 %v5015_v46, %v8466_v43  ;;  %v4615_v62 = vpop.f32.mrf.mxu2  ;;  %5071 = vmatmul.f32.vlgmr.msrb.gmra.mxu3 %v8466_v43  ;;  %v4748_v50 = vpop.f32.mrf.mxu3  ;;  %v8478_v46 = vand.u32 4294901760, %v5501_v40 }
 0x351   : > { %v4616_v47 = vadd.f32 %v4615_v62, %v4590_v1  ;;  %5278 = vmatpush.msrb.mxu3 %v9073_v56  ;;  %v7175_v1 = vld [vmem:[%s7497_s10] sm:$0xff]  ;;  %v9076_v62 = vld [vmem:[#allocation77_spill] sm:$0xff] }
 0x352   : > { %v5037_v44 = vand.u32 4294901760, %v5036_v6 }
 0x353   : > { %v4641_v15 = vadd.f32 %v4640_v45, %v4616_v47  ;;  %5280 = vmatpush.msrb.mxu3 %v9074_v2  ;;  %v5500_v45 = vmul.f32 %v7175_v1, %v9076_v62  ;;  %v7176_v62 = vld [vmem:[%s7497_s10 + $0x18] sm:$0xff] }
 0x354   : > { %v5038_v31 = vsub.f32 %v5036_v6, %v5037_v44  ;;  %4987 = vmatmul.f32.vlgmr.msrb.gmra.mxu0 %v4873_v58  ;;  %5122 = vmatmul.f32.vlgmr.msra.gmra.mxu1 %v5037_v44  ;;  %v8486_v44 = vsub.f32 %v5501_v40, %v8478_v46  ;;  %v5503_v40 = vmul.f32 %v7176_v62, %v9079_v11 }
 0x355   : > { %v4668_v29 = vadd.f32 %v4667_v3, %v4641_v15  ;;  %5194 = vmatpush.msrb.mxu0 %v9073_v56  ;;  %5330 = vmatpush.msra.mxu1 %v9073_v56  ;;  %v8488_v15 = vand.u32 4294901760, %v5500_v45  ;;  %v9080_v56 = vld [vmem:[#allocation21_spill] sm:$0xff] }
 0x356   : > { %v5039_v52 = vand.u32 4294901760, %v5038_v31  ;;  %v4774_v3 = vpop.f32.mrf.mxu0  ;;  %v8941_v1 = vand.u32 4294901760, %v8486_v44  ;;  %v8507_v11 = vand.u32 4294901760, %v5503_v40 }
 0x357   : > { %v4691_v47 = vadd.f32 %v4690_v51, %v4668_v29  ;;  %5196 = vmatpush.msrb.mxu0 %v9074_v2  ;;  %5332 = vmatpush.msra.mxu1 %v9074_v2  ;;  %v9078_v51 = vld [vmem:[#allocation26_spill] sm:$0xff] }
 0x358   : > { %v4717_v58 = vpop.f32.mrf.mxu2  ;;  %5040 = vmatmul.f32.vlgmr.msrb.gmra.mxu2 %v5039_v52  ;;  %5172 = vmatmul.f32.vlgmr.msra.gmra.mxu3 %v8466_v43  ;;  %v8495_v52 = vsub.f32 %v5500_v45, %v8488_v15  ;;  %v5552_v45 = vsub.f32 %v8486_v44, %v8941_v1  ;;  %v4849_v1 = vpop.f32.mrf.mxu3 }
 0x359   : > { %v5177_v31 = vsel %vm335_vm0, %v4691_v47, 0  ;;  %v4749_v54 = vadd.f32 %v4748_v50, %v4717_v58  ;;  %5253 = vmatpush.msrb.mxu2 %v9077_v59  ;;  %5387 = vmatpush.msra.mxu3 %v9078_v51  ;;  %v4799_v47 = vpop.f32.mrf.mxu1  ;;  %v9082_v51 = vld [vmem:[#allocation22_spill] sm:$0xff] }
 0x35a   : > { %v5197_v29 = vand.u32 4294901760, %v5177_v31  ;;  %v8943_v58 = vand.u32 4294901760, %v8495_v52 }
 0x35b   : > { %v4775_v2 = vadd.f32 %v4774_v3, %v4749_v54  ;;  %5256 = vmatpush.msrb.mxu2 %v9080_v56  ;;  %5393 = vmatpush.msra.mxu3 %v9081_v60  ;;  %v7177_v3 = vld [vmem:[%s7497_s10 + $0x10] sm:$0xff]  ;;  %v9083_v54 = vld [vmem:[#allocation79_spill] sm:$0xff] }
 0x35c   : > { %v5198_v50 = vsub.f32 %v5177_v31, %v5197_v29  ;;  %5097 = vmatmul.f32.vlgmr.msra.gmra.mxu0 %v5036_v6  ;;  %5233 = vmatmul.f32.vlgmr.msrb.gmra.mxu1 %v5197_v29  ;;  %v5502_v62 = vmul.f32 %v7177_v3, %v9083_v54  ;;  %v9084_v56 = vld [vmem:[#allocation23_spill] sm:$0xff]  ;;  %v5558_v6 = vsub.f32 %v8495_v52, %v8943_v58 }
 0x35d   : > { %5305 = vmatpush.msra.mxu0 %v9082_v51  ;;  %5440 = vmatpush.msrb.mxu1 %v7787_v37  ;;  %v4800_v31 = vadd.f32 %v4799_v47, %v4775_v2  ;;  %v5553_v2 = vand.u32 4294901760, %v5552_v45  ;;  %v8522_v47 = vsub.f32 %v5503_v40, %v8507_v11 }
 0x35e   : > { %v5199_v60 = vand.u32 4294901760, %v5198_v50  ;;  %v8516_v51 = vand.u32 4294901760, %v5502_v62  ;;  %v5559_v58 = vand.u32 4294901760, %v5558_v6 }
 0x35f   : > { %5309 = vmatpush.msra.mxu0 %v9084_v56  ;;  %5442 = vmatpush.msrb.mxu1 %v7793_v49 }
 0x360   : > { %v5200_v59 = vsub.f32 %v5198_v50, %v5199_v60  ;;  %v4826_v36 = vpop.f32.mrf.mxu2  ;;  %5149 = vmatmul.f32.vlgmr.msra.gmra.mxu2 %v8466_v43  ;;  %5284 = vmatmul.f32.vlgmr.msrb.gmra.mxu3 %v5199_v60  ;;  %v8527_v43 = vsub.f32 %v5502_v62, %v8516_v51  ;;  %v5710_v60 = vand.u32 4294901760, %v8522_v47  ;;  %v7178_v62 = vld [vmem:[%s7497_s10 + $0x28] sm:$0xff] }
 0x361   : > { %v4827_v53 = vadd.f32 %v4826_v36, %v4800_v31  ;;  %5356 = vmatpush.msra.mxu2 %v7787_v37  ;;  %5492 = vmatpush.msrb.mxu3 %v7787_v37  ;;  %v5505_v31 = vmul.f32 %v7178_v62, %v8322_v22  ;;  %v9086_v62 = vld [vmem:[#allocation81_spill] sm:$0xff] }
 0x362   : > { %v5201_v3 = vand.u32 4294901760, %v5200_v59 }
 0x363   : > { %v4850_v54 = vadd.f32 %v4849_v1, %v4827_v53  ;;  %5358 = vmatpush.msra.mxu2 %v7793_v49  ;;  %5494 = vmatpush.msrb.mxu3 %v7793_v49  ;;  %v8944_v53 = vand.u32 4294901760, %v8527_v43  ;;  %v5711_v1 = vsub.f32 %v8522_v47, %v5710_v60 }
 0x364   : > { %5202 = vmatmul.f32.vlgmr.msrb.gmra.mxu0 %v5201_v3  ;;  %5334 = vmatmul.f32.vlgmr.msra.gmra.mxu1 %v5197_v29  ;;  %v5840_v3 = vand.u32 4294901760, %v5505_v31 }
 0x365   : > { %v5339_v36 = vsel %vm335_vm0, %v4850_v54, 0  ;;  %5415 = vmatpush.msrb.mxu0 %v7800_v55  ;;  %5554 = vmatpush.msra.mxu1 %v5553_v2  ;;  %v5712_v6 = vand.u32 4294901760, %v5711_v1  ;;  %v7179_v54 = vld [vmem:[%s7497_s10 + $0x20] sm:$0xff] }
 0x366   : > { %v5359_v40 = vand.u32 4294901760, %v5339_v36  ;;  %v8552_v22 = vsub.f32 %v5505_v31, %v5840_v3 }
 0x367   : > { %5418 = vmatpush.msrb.mxu0 %v7806_v61  ;;  %5560 = vmatpush.msra.mxu1 %v5559_v58  ;;  %v5717_v58 = vsub.f32 %v8527_v43, %v8944_v53 }
 0x368   : > { %v5360_v59 = vsub.f32 %v5339_v36, %v5359_v40  ;;  %5259 = vmatmul.f32.vlgmr.msrb.gmra.mxu2 %v5198_v50  ;;  %5395 = vmatmul.f32.vlgmr.msra.gmra.mxu3 %v5359_v40  ;;  %v5504_v36 = vmul.f32 %v7179_v54, %v8329_v13 }
 0x369   : > { %5467 = vmatpush.msrb.mxu2 %v7812_v7  ;;  %5607 = vmatpush.msra.mxu3 %v8478_v46  ;;  %v5718_v53 = vand.u32 4294901760, %v5717_v58  ;;  %v7181_v58 = vld [vmem:[%s7497_s10 + $0x30] sm:$0xff] }
 0x36a   : > { %v5361_v45 = vand.u32 4294901760, %v5360_v59  ;;  %v5506_v31 = vmul.f32 %v7181_v58, %v9086_v62 }
 0x36b   : > { %5471 = vmatpush.msrb.mxu2 %v7819_v26  ;;  %5609 = vmatpush.msra.mxu3 %v8488_v15 }
 0x36c   : > { %v5362_v50 = vsub.f32 %v5360_v59, %v5361_v45  ;;  %5311 = vmatmul.f32.vlgmr.msra.gmra.mxu0 %v5197_v29  ;;  %5446 = vmatmul.f32.vlgmr.msrb.gmra.mxu1 %v5361_v45  ;;  %v5842_v29 = vand.u32 4294901760, %v5504_v36  ;;  %v7180_v45 = vld [vmem:[%s7497_s10 + $0x38] sm:$0xff]  ;;  %s7075_s10 = sld [smem:[#allocation2 + $0x1]] }
 0x36d   : > { %5523 = vmatpush.msra.mxu0 %v8478_v46  ;;  %5659 = vmatpush.msrb.mxu1 %v8478_v46  ;;  %v5869_v46 = vand.u32 4294901760, %v8552_v22 }
 0x36e   : > { %v5363_v2 = vand.u32 4294901760, %v5362_v50  ;;  %v5874_v1 = vsub.f32 %v5504_v36, %v5842_v29  ;;  %v9085_v50 = vld [vmem:[#allocation80_spill] sm:$0xff]  ;;  %v9088_v36 = vand.u32 4294901760, %v8495_v52 }
 0x36f   : > { %5525 = vmatpush.msra.mxu0 %v8488_v15  ;;  %5661 = vmatpush.msrb.mxu1 %v8488_v15  ;;  %v5507_v13 = vmul.f32 %v7180_v45, %v9085_v50 }
 0x370   : > { %5364 = vmatmul.f32.vlgmr.msra.gmra.mxu2 %v5363_v2  ;;  %5496 = vmatmul.f32.vlgmr.msrb.gmra.mxu3 %v5359_v40  ;;  %v5875_v15 = vand.u32 4294901760, %v5874_v1  ;;  %v9087_v2 = vand.u32 4294901760, %v8486_v44 }
 0x371   : > { %5582 = vmatpush.msra.mxu2 %v8486_v44  ;;  %5713 = vmatpush.msrb.mxu3 %v5712_v6  ;;  %v5870_v6 = vsub.f32 %v8552_v22, %v5869_v46  ;;  %v5999_v54 = vand.u32 4294901760, %v5507_v13 }
 0x373   : > { %5585 = vmatpush.msra.mxu2 %v8495_v52  ;;  %5719 = vmatpush.msrb.mxu3 %v5718_v53  ;;  %v5876_v53 = vsub.f32 %v5874_v1, %v5875_v15  ;;  %v5871_v44 = vand.u32 4294901760, %v5870_v6  ;;  %v6027_v45 = vsub.f32 %v5507_v13, %v5999_v54 }
 0x374   : > { %5421 = vmatmul.f32.vlgmr.msrb.gmra.mxu0 %v5360_v59  ;;  %5562 = vmatmul.f32.vlgmr.msra.gmra.mxu1 %v7523_v9  ;;  %v6001_v59 = vand.u32 4294901760, %v5506_v31 }
 0x375   : > { %5634 = vmatpush.msrb.mxu0 %v9087_v2  ;;  %5766 = vmatpush.msra.mxu1 %v8507_v11  ;;  %v5877_v50 = vand.u32 4294901760, %v5876_v53 }
 0x376   : > { %v6033_v52 = vsub.f32 %v5506_v31, %v6001_v59 }
 0x377   : > { %5638 = vmatpush.msrb.mxu0 %v9088_v36  ;;  %5768 = vmatpush.msra.mxu1 %v8516_v51 }
 0x378   : > { %5473 = vmatmul.f32.vlgmr.msrb.gmra.mxu2 %v5359_v40  ;;  %5613 = vmatmul.f32.vlgmr.msra.gmra.mxu3 %v7553_v25  ;;  %v6028_v25 = vand.u32 4294901760, %v6027_v45 }
 0x379   : > { %5682 = vmatpush.msrb.mxu2 %v8507_v11  ;;  %5818 = vmatpush.msra.mxu3 %v8507_v11  ;;  %v6034_v11 = vand.u32 4294901760, %v6033_v52 }
 0x37b   : > { %5684 = vmatpush.msrb.mxu2 %v8516_v51  ;;  %5820 = vmatpush.msra.mxu3 %v8516_v51  ;;  %v6029_v51 = vsub.f32 %v6027_v45, %v6028_v25  ;;  %v6035_v40 = vsub.f32 %v6033_v52, %v6034_v11 }
 0x37c   : > { %5531 = vmatmul.f32.vlgmr.msra.gmra.mxu0 %v7577_v41  ;;  %5663 = vmatmul.f32.vlgmr.msrb.gmra.mxu1 %v7523_v9  ;;  %v9089_v41 = vand.u32 4294901760, %v8527_v43 }
 0x37d   : > { %5741 = vmatpush.msra.mxu0 %v8522_v47  ;;  %5872 = vmatpush.msrb.mxu1 %v5871_v44  ;;  %v6030_v13 = vand.u32 4294901760, %v6029_v51 }
 0x37f   : > { %5744 = vmatpush.msra.mxu0 %v8527_v43  ;;  %5878 = vmatpush.msrb.mxu1 %v5877_v50 }
 0x380   : > { %5588 = vmatmul.f32.vlgmr.msra.gmra.mxu2 %v7541_v18  ;;  %5721 = vmatmul.f32.vlgmr.msrb.gmra.mxu3 %v7547_v21  ;;  %v6036_v18 = vand.u32 4294901760, %v6035_v40 }
 0x381   : > { %5793 = vmatpush.msra.mxu2 %v5710_v60  ;;  %5925 = vmatpush.msrb.mxu3 %v5840_v3 }
 0x383   : > { %5797 = vmatpush.msra.mxu2 %v9089_v41  ;;  %5927 = vmatpush.msrb.mxu3 %v5842_v29 }
 0x384   : > { %5640 = vmatmul.f32.vlgmr.msrb.gmra.mxu0 %v7523_v9  ;;  %5772 = vmatmul.f32.vlgmr.msra.gmra.mxu1 %v7569_v35 }
 0x385   : > { %5841 = vmatpush.msrb.mxu0 %v5840_v3  ;;  %5977 = vmatpush.msra.mxu1 %v5840_v3 }
 0x387   : > { %5843 = vmatpush.msrb.mxu0 %v5842_v29  ;;  %5979 = vmatpush.msra.mxu1 %v5842_v29 }
 0x388   : > { %5690 = vmatmul.f32.vlgmr.msrb.gmra.mxu2 %v7589_v48  ;;  %5822 = vmatmul.f32.vlgmr.msra.gmra.mxu3 %v7547_v21 }
 0x389   : > { %5900 = vmatpush.msrb.mxu2 %v8552_v22  ;;  %6031 = vmatpush.msra.mxu3 %v6030_v13 }
 0x38b   : > { %5903 = vmatpush.msrb.mxu2 %v5874_v1  ;;  %6037 = vmatpush.msra.mxu3 %v6036_v18 }
 0x38c   : > { %5747 = vmatmul.f32.vlgmr.msra.gmra.mxu0 %v7558_v28  ;;  %5880 = vmatmul.f32.vlgmr.msrb.gmra.mxu1 %v7610_v57 }
 0x38d   : > { %5952 = vmatpush.msra.mxu0 %v5869_v46  ;;  %6084 = vmatpush.msrb.mxu1 %v5999_v54 }
 0x38f   : > { %5956 = vmatpush.msra.mxu0 %v5875_v15  ;;  %6086 = vmatpush.msrb.mxu1 %v6001_v59 }
 0x390   : > { %5799 = vmatmul.f32.vlgmr.msra.gmra.mxu2 %v7547_v21  ;;  %5931 = vmatmul.f32.vlgmr.msrb.gmra.mxu3 %v7637_v4 }
 0x391   : > { %6000 = vmatpush.msra.mxu2 %v5999_v54  ;;  %6136 = vmatpush.msrb.mxu3 %v5999_v54 }
 0x393   : > { %6002 = vmatpush.msra.mxu2 %v6001_v59  ;;  %6138 = vmatpush.msrb.mxu3 %v6001_v59 }
 0x394   : > { %5849 = vmatmul.f32.vlgmr.msrb.gmra.mxu0 %v7656_v10  ;;  %5981 = vmatmul.f32.vlgmr.msra.gmra.mxu1 %v7610_v57 }
 0x395   : > { %6059 = vmatpush.msrb.mxu0 %v6027_v45  ;;  %6193 = vmatpush.msra.mxu1 %v7710_v24 }
 0x397   : > { %6062 = vmatpush.msrb.mxu0 %v6033_v52  ;;  %6199 = vmatpush.msra.mxu1 %v7716_v27 }
 0x398   : > { %5906 = vmatmul.f32.vlgmr.msrb.gmra.mxu2 %v7624_v63  ;;  %6039 = vmatmul.f32.vlgmr.msra.gmra.mxu3 %v7626_v0 }
 0x399   : > { %6111 = vmatpush.msrb.mxu2 %v6028_v25  ;;  %6246 = vmatpush.msra.mxu3 %v7682_v14 }
 0x39b   : > { %6115 = vmatpush.msrb.mxu2 %v6034_v11  ;;  %6248 = vmatpush.msra.mxu3 %v7690_v17 }
 0x39c   : > { %5958 = vmatmul.f32.vlgmr.msra.gmra.mxu0 %v7610_v57  ;;  %6090 = vmatmul.f32.vlgmr.msrb.gmra.mxu1 %v7650_v8 }
 0x39d   : > { %6162 = vmatpush.msra.mxu0 %v7682_v14  ;;  %6298 = vmatpush.msrb.mxu1 %v7682_v14 }
 0x39f   : > { %6164 = vmatpush.msra.mxu0 %v7690_v17  ;;  %6300 = vmatpush.msrb.mxu1 %v7690_v17 }
 0x3a0   : > { %6008 = vmatmul.f32.vlgmr.msra.gmra.mxu2 %v7663_v12  ;;  %6140 = vmatmul.f32.vlgmr.msrb.gmra.mxu3 %v7626_v0 }
 0x3a1   : > { %6221 = vmatpush.msra.mxu2 %v7688_v16  ;;  %6355 = vmatpush.msrb.mxu3 %v7747_v39 }
 0x3a3   : > { %6224 = vmatpush.msra.mxu2 %v7698_v20  ;;  %6361 = vmatpush.msrb.mxu3 %v7752_v42 }
 0x3a4   : > { %6065 = vmatmul.f32.vlgmr.msrb.gmra.mxu0 %v7640_v5 }
 0x3a5   : > { %6273 = vmatpush.msrb.mxu0 %v7695_v19 }
 0x3a7   : > { %6277 = vmatpush.msrb.mxu0 %v7706_v23 }
 0x3a8   : > { %6117 = vmatmul.f32.vlgmr.msrb.gmra.mxu2 %v7626_v0 }
 0x3a9   : > { %6324 = vmatpush.msrb.mxu2 %v7722_v30 }
 0x3ab   : > { %6326 = vmatpush.msrb.mxu2 %v7731_v33 }
 0x3c1   : > { %v4910_v9 = vpop.f32.mrf.mxu1 }
 0x3c9   : > { %v4879_v21 = vpop.f32.mrf.mxu0  ;;  %v5011_v35 = vpop.f32.mrf.mxu1 }
 0x3ca   : > { %v4911_v28 = vadd.f32 %v4910_v9, %v4879_v21  ;;  %v4936_v48 = vpop.f32.mrf.mxu2 }
 0x3cb   : > { %v4961_v57 = vpop.f32.mrf.mxu3 }
 0x3cc   : > { %v4937_v63 = vadd.f32 %v4936_v48, %v4911_v28 }
 0x3ce   : > { %v4962_v4 = vadd.f32 %v4961_v57, %v4937_v63 }
 0x3d1   : > { %v4988_v8 = vpop.f32.mrf.mxu0  ;;  %v5123_v10 = vpop.f32.mrf.mxu1 }
 0x3d2   : > { %v4989_v5 = vadd.f32 %v4988_v8, %v4962_v4 }
 0x3d3   : > { %v5072_v12 = vpop.f32.mrf.mxu3 }
 0x3d4   : > { %v8619_v14 = vadd.f32 %v5011_v35, %v4989_v5 }
 0x3d9   : > { %v5098_v16 = vpop.f32.mrf.mxu0  ;;  %v5234_v0 = vpop.f32.mrf.mxu1 }
 0x3db   : > { %v5041_v17 = vpop.f32.mrf.mxu2  ;;  %v5173_v19 = vpop.f32.mrf.mxu3 }
 0x3dc   : > { %v5073_v20 = vadd.f32 %v5072_v12, %v5041_v17 }
 0x3de   : > { %v5099_v23 = vadd.f32 %v5098_v16, %v5073_v20 }
 0x3e0   : > { %v5124_v24 = vadd.f32 %v5123_v10, %v5099_v23 }
 0x3e1   : > { %v5203_v27 = vpop.f32.mrf.mxu0  ;;  %v5335_v42 = vpop.f32.mrf.mxu1 }
 0x3e2   : > { %v5235_v39 = vadd.f32 %v5234_v0, %v5203_v27 }
 0x3e3   : > { %v5150_v47 = vpop.f32.mrf.mxu2  ;;  %v5285_v43 = vpop.f32.mrf.mxu3 }
 0x3e4   : > { %v5151_v60 = vadd.f32 %v5150_v47, %v5124_v24 }
 0x3e6   : > { %v8621_v3 = vadd.f32 %v5173_v19, %v5151_v60 }
 0x3e9   : > { %v5312_v22 = vpop.f32.mrf.mxu0  ;;  %v5447_v15 = vpop.f32.mrf.mxu1 }
 0x3eb   : > { %v5260_v29 = vpop.f32.mrf.mxu2  ;;  %v5396_v46 = vpop.f32.mrf.mxu3 }
 0x3ec   : > { %v5261_v1 = vadd.f32 %v5260_v29, %v5235_v39 }
 0x3ee   : > { %v5286_v58 = vadd.f32 %v5285_v43, %v5261_v1 }
 0x3f0   : > { %v5313_v62 = vadd.f32 %v5312_v22, %v5286_v58 }
 0x3f1   : > { %v5422_v31 = vpop.f32.mrf.mxu0  ;;  %v5563_v53 = vpop.f32.mrf.mxu1 }
 0x3f2   : > { %v8623_v2 = vadd.f32 %v5335_v42, %v5313_v62 }
 0x3f3   : > { %v5365_v6 = vpop.f32.mrf.mxu2  ;;  %v5497_v54 = vpop.f32.mrf.mxu3 }
 0x3f4   : > { %v5397_v36 = vadd.f32 %v5396_v46, %v5365_v6  ;;  %v9091_v46 = vld [vmem:[#allocation17_spill] sm:$0xff]  ;;  %v9094_v6 = vld [vmem:[#allocation19_spill] sm:$0xff] }
 0x3f6   : > { %v5423_v59 = vadd.f32 %v5422_v31, %v5397_v36 }
 0x3f8   : > { %v5448_v44 = vadd.f32 %v5447_v15, %v5423_v59  ;;  %v9093_v15 = vld [vmem:[#allocation18_spill] sm:$0xff] }
 0x3f9   : > { %v5532_v45 = vpop.f32.mrf.mxu0  ;;  %v5664_v51 = vpop.f32.mrf.mxu1 }
 0x3fa   : > { %v5564_v40 = vadd.f32 %v5563_v53, %v5532_v45 }
 0x3fb   : > { %v5474_v50 = vpop.f32.mrf.mxu2  ;;  %v5614_v52 = vpop.f32.mrf.mxu3 }
 0x3fc   : > { %v5475_v25 = vadd.f32 %v5474_v50, %v5448_v44 }
 0x3fe   : > { %v8625_v11 = vadd.f32 %v5497_v54, %v5475_v25  ;;  %v9095_v25 = vld [vmem:[#allocation20_spill] sm:$0xff] }
 0x401   : > { %v5641_v41 = vpop.f32.mrf.mxu0  ;;  %v5773_v48 = vpop.f32.mrf.mxu1 }
 0x403   : > { %v5589_v13 = vpop.f32.mrf.mxu2  ;;  %v5722_v18 = vpop.f32.mrf.mxu3 }
 0x404   : > { %v5590_v9 = vadd.f32 %v5589_v13, %v5564_v40  ;;  %v9097_v13 = vld [vmem:[#allocation21_spill] sm:$0xff] }
 0x406   : > { %v5615_v21 = vadd.f32 %v5614_v52, %v5590_v9 }
 0x408   : > { %v5642_v28 = vadd.f32 %v5641_v41, %v5615_v21 }
 0x409   : > { %v5748_v35 = vpop.f32.mrf.mxu0  ;;  %v5881_v24 = vpop.f32.mrf.mxu1 }
 0x40a   : > { %v5665_v57 = vadd.f32 %v5664_v51, %v5642_v28  ;;  %v9096_v51 = vld [vmem:[#allocation26_spill] sm:$0xff] }
 0x40b   : > { %v5691_v63 = vpop.f32.mrf.mxu2  ;;  %v5823_v10 = vpop.f32.mrf.mxu3  ;;  %v9099_v28 = vld [vmem:[#allocation22_spill] sm:$0xff] }
 0x40c   : > { %v6145_v4 = vsel %vm335_vm0, %v5665_v57, 0  ;;  %v5723_v8 = vadd.f32 %v5722_v18, %v5691_v63  ;;  %v9098_v18 = vld [vmem:[#allocation27_spill] sm:$0xff] }
 0x40d   : > { %v6165_v5 = vand.u32 4294901760, %v6145_v4 }
 0x40e   : > { %v5749_v12 = vadd.f32 %v5748_v35, %v5723_v8 }
 0x40f   : > { %v6166_v16 = vsub.f32 %v6145_v4, %v6165_v5  ;;  %6201 = vmatmul.f32.vlgmr.msra.gmra.mxu1 %v6165_v5 }
 0x410   : > { %6408 = vmatpush.msra.mxu1 %v7722_v30  ;;  %v5774_v19 = vadd.f32 %v5773_v48, %v5749_v12 }
 0x411   : > { %v6167_v0 = vand.u32 4294901760, %v6166_v16  ;;  %6227 = vmatmul.f32.vlgmr.msra.gmra.mxu2 %v6166_v16  ;;  %v5850_v17 = vpop.f32.mrf.mxu0  ;;  %v5982_v62 = vpop.f32.mrf.mxu1 }
 0x412   : > { %6410 = vmatpush.msra.mxu1 %v7731_v33  ;;  %6435 = vmatpush.msra.mxu2 %v7736_v34  ;;  %v9090_v34 = vld [vmem:[#allocation24_spill] sm:$0xff]  ;;  %v5882_v29 = vadd.f32 %v5881_v24, %v5850_v17  ;;  %v9104_v24 = vld [vmem:[#allocation62_spill] sm:$0xff] }
 0x413   : > { %v6168_v20 = vsub.f32 %v6166_v16, %v6167_v0  ;;  %v5800_v23 = vpop.f32.mrf.mxu2  ;;  %6252 = vmatmul.f32.vlgmr.msra.gmra.mxu3 %v6167_v0  ;;  %v5932_v47 = vpop.f32.mrf.mxu3  ;;  %v9101_v17 = vld [vmem:[#allocation52_spill] sm:$0xff] }
 0x414   : > { %v5801_v27 = vadd.f32 %v5800_v23, %v5774_v19  ;;  %6460 = vmatpush.msra.mxu3 %v7722_v30  ;;  %6439 = vmatpush.msra.mxu2 %v7745_v38  ;;  %v9092_v30 = vld [vmem:[#allocation25_spill] sm:$0xff] }
 0x415   : > { %v6169_v39 = vand.u32 4294901760, %v6168_v20  ;;  %v9103_v20 = vld [vmem:[#allocation28_spill] sm:$0xff] }
 0x416   : > { %v5824_v42 = vadd.f32 %v5823_v10, %v5801_v27  ;;  %6462 = vmatpush.msra.mxu3 %v7731_v33  ;;  %v9105_v27 = vld [vmem:[#allocation59_spill] sm:$0xff] }
 0x417   : > { %6170 = vmatmul.f32.vlgmr.msra.gmra.mxu0 %v6169_v39  ;;  %6302 = vmatmul.f32.vlgmr.msrb.gmra.mxu1 %v6165_v5  ;;  %v9106_v39 = vld [vmem:[#allocation58_spill] sm:$0xff] }
 0x418   : > { %v6307_v43 = vsel %vm335_vm0, %v5824_v42, 0  ;;  %6383 = vmatpush.msra.mxu0 %v7729_v32  ;;  %6517 = vmatpush.msrb.mxu1 %v9090_v34  ;;  %v9109_v34 = vld [vmem:[#allocation38_spill] sm:$0xff] }
 0x419   : > { %v6327_v60 = vand.u32 4294901760, %v6307_v43  ;;  %v5959_v22 = vpop.f32.mrf.mxu0  ;;  %v6091_v21 = vpop.f32.mrf.mxu1 }
 0x41a   : > { %6386 = vmatpush.msra.mxu0 %v9091_v46  ;;  %6523 = vmatpush.msrb.mxu1 %v9092_v30  ;;  %v9112_v30 = vld [vmem:[#allocation60_spill] sm:$0xff] }
 0x41b   : > { %v6328_v38 = vsub.f32 %v6307_v43, %v6327_v60  ;;  %v5907_v1 = vpop.f32.mrf.mxu2  ;;  %6363 = vmatmul.f32.vlgmr.msrb.gmra.mxu3 %v6327_v60  ;;  %v6040_v53 = vpop.f32.mrf.mxu3 }
 0x41c   : > { %v5908_v33 = vadd.f32 %v5907_v1, %v5882_v29  ;;  %6570 = vmatpush.msrb.mxu3 %v9093_v15  ;;  %v9111_v29 = vld [vmem:[#allocation34_spill] sm:$0xff]  ;;  %v9113_v1 = vld [vmem:[#allocation92_spill] sm:$0xff] }
 0x41d   : > { %v6329_v58 = vand.u32 4294901760, %v6328_v38 }
 0x41e   : > { %v5933_v31 = vadd.f32 %v5932_v47, %v5908_v33  ;;  %6572 = vmatpush.msrb.mxu3 %v9094_v6  ;;  %v9108_v47 = vld [vmem:[#allocation82_spill] sm:$0xff]  ;;  %v9114_v33 = vld [vmem:[#allocation89_spill] sm:$0xff] }
 0x41f   : > { %v6330_v32 = vsub.f32 %v6328_v38, %v6329_v58  ;;  %6279 = vmatmul.f32.vlgmr.msrb.gmra.mxu0 %v6165_v5  ;;  %6414 = vmatmul.f32.vlgmr.msra.gmra.mxu1 %v6329_v58  ;;  %v9115_v58 = vld [vmem:[#allocation55_spill] sm:$0xff] }
 0x420   : > { %v5960_v54 = vadd.f32 %v5959_v22, %v5933_v31  ;;  %6486 = vmatpush.msrb.mxu0 %v9093_v15  ;;  %6622 = vmatpush.msra.mxu1 %v9093_v15  ;;  %v3781_v15 = vadd.f32 %v9114_v33, %v9113_v1  ;;  %v9116_v31 = vld [vmem:[#allocation88_spill] sm:$0xff]  ;;  %v9143_v1 = vld [vmem:[#allocation67_spill] sm:$0xff] }
 0x421   : > { %v6331_v36 = vand.u32 4294901760, %v6330_v32  ;;  %v6066_v45 = vpop.f32.mrf.mxu0  ;;  %v9117_v32 = vld [vmem:[#allocation36_spill] sm:$0xff] }
 0x422   : > { %v5983_v59 = vadd.f32 %v5982_v62, %v5960_v54  ;;  %6488 = vmatpush.msrb.mxu0 %v9094_v6  ;;  %6624 = vmatpush.msra.mxu1 %v9094_v6 }
 0x423   : > { %v6009_v44 = vpop.f32.mrf.mxu2  ;;  %6332 = vmatmul.f32.vlgmr.msrb.gmra.mxu2 %v6331_v36  ;;  %6464 = vmatmul.f32.vlgmr.msra.gmra.mxu3 %v6327_v60  ;;  %v6141_v4 = vpop.f32.mrf.mxu3  ;;  %v9118_v36 = vld [vmem:[#allocation31_spill] sm:$0xff] }
 0x424   : > { %v6469_v50 = vsel %vm335_vm0, %v5983_v59, 0  ;;  %v6041_v52 = vadd.f32 %v6040_v53, %v6009_v44  ;;  %6545 = vmatpush.msrb.mxu2 %v9095_v25  ;;  %6679 = vmatpush.msra.mxu3 %v9096_v51  ;;  %v9119_v59 = vld [vmem:[#allocation56_spill] sm:$0xff] }
 0x425   : > { %v6489_v41 = vand.u32 4294901760, %v6469_v50  ;;  %v9122_v51 = vld [vmem:[#allocation32_spill] sm:$0xff] }
 0x426   : > { %v6067_v40 = vadd.f32 %v6066_v45, %v6041_v52  ;;  %6548 = vmatpush.msrb.mxu2 %v9097_v13  ;;  %6685 = vmatpush.msra.mxu3 %v9098_v18  ;;  %v9120_v45 = vld [vmem:[#allocation57_spill] sm:$0xff]  ;;  %v9121_v52 = vld [vmem:[#allocation90_spill] sm:$0xff] }
 0x427   : > { %v6490_v9 = vsub.f32 %v6469_v50, %v6489_v41  ;;  %6389 = vmatmul.f32.vlgmr.msra.gmra.mxu0 %v6328_v38  ;;  %6525 = vmatmul.f32.vlgmr.msrb.gmra.mxu1 %v6489_v41  ;;  %v3807_v25 = vadd.f32 %v9121_v52, %v3781_v15  ;;  %v9124_v18 = vld [vmem:[#allocation33_spill] sm:$0xff] }
 0x428   : > { %6597 = vmatpush.msra.mxu0 %v9099_v28  ;;  %6732 = vmatpush.msrb.mxu1 %v7787_v37  ;;  %v6092_v48 = vadd.f32 %v6091_v21, %v6067_v40  ;;  %v9123_v40 = vld [vmem:[#allocation85_spill] sm:$0xff]  ;;  %v9125_v21 = vld [vmem:[#allocation66_spill] sm:$0xff] }
 0x429   : > { %v6491_v35 = vand.u32 4294901760, %v6490_v9  ;;  %v9144_v15 = vld [vmem:[#allocation93_spill] sm:$0xff] }
 0x42a   : > { %6601 = vmatpush.msra.mxu0 %v9084_v56  ;;  %6734 = vmatpush.msrb.mxu1 %v7793_v49 }
 0x42b   : > { %v6492_v57 = vsub.f32 %v6490_v9, %v6491_v35  ;;  %v6118_v63 = vpop.f32.mrf.mxu2  ;;  %6441 = vmatmul.f32.vlgmr.msra.gmra.mxu2 %v6327_v60  ;;  %6576 = vmatmul.f32.vlgmr.msrb.gmra.mxu3 %v6491_v35  ;;  %v9110_v60 = vld [vmem:[#allocation35_spill] sm:$0xff]  ;;  %v9126_v35 = vld [vmem:[#allocation54_spill] sm:$0xff] }
 0x42c   : > { %v6119_v8 = vadd.f32 %v6118_v63, %v6092_v48  ;;  %6648 = vmatpush.msra.mxu2 %v7787_v37  ;;  %6784 = vmatpush.msrb.mxu3 %v7787_v37  ;;  %v1205_v22 = vadd.f32 %v9110_v60, %v9109_v34  ;;  %v9141_v60 = vld [vmem:[#allocation94_spill] sm:$0xff] }
 0x42d   : > { %v6493_v5 = vand.u32 4294901760, %v6492_v57  ;;  %v9127_v57 = vld [vmem:[#allocation86_spill] sm:$0xff] }
 0x42e   : > { %v6142_v10 = vadd.f32 %v6141_v4, %v6119_v8  ;;  %6650 = vmatpush.msra.mxu2 %v7793_v49  ;;  %6786 = vmatpush.msrb.mxu3 %v7793_v49  ;;  %v1231_v54 = vadd.f32 %v9117_v32, %v1205_v22  ;;  %v9128_v4 = vld [vmem:[#allocation42_spill] sm:$0xff]  ;;  %v9142_v22 = vld [vmem:[#allocation91_spill] sm:$0xff] }
 0x42f   : > { %6494 = vmatmul.f32.vlgmr.msrb.gmra.mxu0 %v6493_v5  ;;  %6626 = vmatmul.f32.vlgmr.msra.gmra.mxu1 %v6489_v41  ;;  %v9129_v5 = vld [vmem:[#allocation64_spill] sm:$0xff] }
 0x430   : > { %v6631_v56 = vsel %vm335_vm0, %v6142_v10, 0  ;;  %6707 = vmatpush.msrb.mxu0 %v7800_v55  ;;  %v9100_v55 = vld [vmem:[#allocation53_spill] sm:$0xff] }
 0x431   : > { %v6651_v12 = vand.u32 4294901760, %v6631_v56  ;;  %v2327_v19 = vadd.f32 %v9101_v17, %v9100_v55  ;;  %v9130_v10 = vld [vmem:[#allocation61_spill] sm:$0xff] }
 0x432   : > { %6710 = vmatpush.msrb.mxu0 %v7806_v61  ;;  %v9102_v61 = vld [vmem:[#allocation29_spill] sm:$0xff] }
 0x433   : > { %v6652_v16 = vsub.f32 %v6631_v56, %v6651_v12  ;;  %6551 = vmatmul.f32.vlgmr.msrb.gmra.mxu2 %v6490_v9  ;;  %6687 = vmatmul.f32.vlgmr.msra.gmra.mxu3 %v6651_v12  ;;  %v1043_v23 = vadd.f32 %v9103_v20, %v9102_v61  ;;  %v2353_v42 = vadd.f32 %v9106_v39, %v2327_v19  ;;  %v9134_v55 = vld [vmem:[#allocation37_spill] sm:$0xff]  ;;  %v9135_v19 = vld [vmem:[#allocation63_spill] sm:$0xff] }
 0x434   : > { %6759 = vmatpush.msrb.mxu2 %v7812_v7  ;;  %v2489_v7 = vadd.f32 %v9105_v27, %v9104_v24  ;;  %v1256_v9 = vadd.f32 %v9124_v18, %v1231_v54  ;;  %v2651_v56 = vadd.f32 %v9130_v10, %v9129_v5  ;;  %v9136_v20 = vld [vmem:[#allocation69_spill] sm:$0xff]  ;;  %v9137_v24 = vld [vmem:[#allocation96_spill] sm:$0xff] }
 0x435   : > { %v6653_v37 = vand.u32 4294901760, %v6652_v16  ;;  %v1069_v46 = vadd.f32 %v9111_v29, %v1043_v23  ;;  %v2378_v62 = vadd.f32 %v9115_v58, %v2353_v42  ;;  %v3943_v29 = vadd.f32 %v9142_v22, %v9141_v60  ;;  %v9150_v18 = vld [vmem:[#allocation73_spill] sm:$0xff]  ;;  %v9161_v22 = vld [vmem:[#allocation95_spill] sm:$0xff] }
 0x436   : > { %6763 = vmatpush.msrb.mxu2 %v7819_v26  ;;  %v9107_v26 = vld [vmem:[#allocation83_spill] sm:$0xff]  ;;  %v2515_v38 = vadd.f32 %v9112_v30, %v2489_v7  ;;  %v1283_v8 = vadd.f32 %v9128_v4, %v1256_v9  ;;  %v2677_v23 = vadd.f32 %v9136_v20, %v2651_v56  ;;  %v9138_v7 = vld [vmem:[#allocation45_spill] sm:$0xff]  ;;  %v9151_v9 = vld [vmem:[#allocation70_spill] sm:$0xff] }
 0x437   : > { %v6654_v0 = vsub.f32 %v6652_v16, %v6653_v37  ;;  %6603 = vmatmul.f32.vlgmr.msra.gmra.mxu0 %v6489_v41  ;;  %6738 = vmatmul.f32.vlgmr.msrb.gmra.mxu1 %v6653_v37  ;;  %v3619_v43 = vadd.f32 %v9108_v47, %v9107_v26  ;;  %v1094_v53 = vadd.f32 %v9118_v36, %v1069_v46  ;;  %v9132_v37 = vld [vmem:[#allocation30_spill] sm:$0xff]  ;;  %v9139_v26 = vld [vmem:[#allocation84_spill] sm:$0xff]  ;;  %v9154_v5 = vld [vmem:[#allocation65_spill] sm:$0xff] }
 0x438   : > { %v2405_v44 = vadd.f32 %v9119_v59, %v2378_v62  ;;  %v2540_v50 = vadd.f32 %v9120_v45, %v2515_v38  ;;  %v2702_v33 = vadd.f32 %v9143_v1, %v2677_v23  ;;  %v9145_v62 = vld [vmem:[#allocation99_spill] sm:$0xff]  ;;  %v9155_v56 = vld [vmem:[#allocation98_spill] sm:$0xff]  ;;  %v9159_v23 = vld [vmem:[#allocation100_spill] sm:$0xff] }
 0x439   : > { %v6655_v49 = vand.u32 4294901760, %v6654_v0  ;;  %v3645_v6 = vadd.f32 %v9116_v31, %v3619_v43  ;;  %v1121_v41 = vadd.f32 %v9122_v51, %v1094_v53  ;;  %v9140_v43 = vld [vmem:[#allocation39_spill] sm:$0xff]  ;;  %v3969_v31 = vadd.f32 %v9145_v62, %v3943_v29  ;;  %v9149_v51 = vld [vmem:[#allocation44_spill] sm:$0xff]  ;;  %v9163_v1 = vld [vmem:[#allocation102_spill] sm:$0xff] }
 0x43a   : > { %v2567_v28 = vadd.f32 %v9125_v21, %v2540_v50  ;;  %v8690_v48 = vadd.f32 %v9126_v35, %v2405_v44  ;;  %v8712_v34 = vadd.f32 %v9140_v43, %v1283_v8  ;;  %v9147_v44 = vld [vmem:[#allocation68_spill] sm:$0xff]  ;;  %v9148_v50 = vld [vmem:[#allocation97_spill] sm:$0xff]  ;;  %v2813_v21 = vadd.f32 %v9151_v9, %v9150_v18  ;;  %v9158_v20 = vld [vmem:[#allocation103_spill] sm:$0xff] }
 0x43b   : > { %6656 = vmatmul.f32.vlgmr.msra.gmra.mxu2 %v6655_v49  ;;  %6788 = vmatmul.f32.vlgmr.msrb.gmra.mxu3 %v6651_v12  ;;  %v3670_v13 = vadd.f32 %v9123_v40, %v3645_v6  ;;  %v8698_v0 = vadd.f32 %v9132_v37, %v1121_v41  ;;  %v9133_v49 = vld [vmem:[#allocation40_spill] sm:$0xff]  ;;  %v9146_v6 = vld [vmem:[#allocation43_spill] sm:$0xff]  ;;  %v3994_v52 = vadd.f32 %v9148_v50, %v3969_v31  ;;  %v9156_v37 = vld [vmem:[#allocation41_spill] sm:$0xff] }
 0x43c   : > { %v1367_v17 = vadd.f32 %v9134_v55, %v9133_v49  ;;  %v8703_v61 = vadd.f32 %v9135_v19, %v2567_v28  ;;  %v6796_v42 = vmul.f32 %v8690_v48, %v8690_v48  ;;  %v6793_v36 = vmul.f32 %v8712_v34, %v8712_v34  ;;  %v9167_v50 = vld [vmem:[#allocation101_spill] sm:$0xff] }
 0x43d   : > { %v3697_v63 = vadd.f32 %v9127_v57, %v3670_v13  ;;  %v6792_v46 = vmul.f32 %v8698_v0, %v8698_v0  ;;  %v8733_v13 = vstv %s305_s12  ;;  %v9152_v57 = vld [vmem:[#allocation49_spill] sm:$0xff] }
 0x43e   : > { %v1393_v39 = vadd.f32 %v9138_v7, %v1367_v17  ;;  %v6808_v30 = vsub.f32 %v8619_v14, %v6796_v42  ;;  %v6797_v38 = vmul.f32 %v8703_v61, %v8703_v61  ;;  %v2729_v14 = vadd.f32 %v9147_v44, %v2702_v33  ;;  %v9157_v17 = vld [vmem:[#allocation72_spill] sm:$0xff]  ;;  %v9169_v9 = vld [vmem:[#allocation105_spill] sm:$0xff] }
 0x43f   : > { %6713 = vmatmul.f32.vlgmr.msrb.gmra.mxu0 %v6652_v16  ;;  %v3720_v47 = vadd.f32 %v9139_v26, %v3697_v63  ;;  %v6846_v40 = vadd.f32 %v6796_v42, %v6792_v46  ;;  %v9153_v63 = vld [vmem:[#allocation46_spill] sm:$0xff]  ;;  %v2839_v19 = vadd.f32 %v9157_v17, %v2813_v21  ;;  %v9160_v26 = vld [vmem:[#allocation48_spill] sm:$0xff] }
 0x440   : > { %v1418_v32 = vadd.f32 %v9146_v6, %v1393_v39  ;;  %v6809_v53 = vsub.f32 %v8621_v3, %v6797_v38  ;;  %v1529_v4 = vadd.f32 %v9153_v63, %v9152_v57  ;;  %v6847_v8 = vadd.f32 %v6797_v38, %v6793_v36  ;;  %v9164_v6 = vld [vmem:[#allocation47_spill] sm:$0xff]  ;;  %v9170_v57 = vld [vmem:[#allocation50_spill] sm:$0xff] }
 0x441   : > { %v6804_v54 = vsub.f32 %v3720_v47, %v6792_v46  ;;  %v8741_v10 = vadd.f32 %v9154_v5, %v2729_v14  ;;  %v6850_v55 = vadd.f32 %v6846_v40, %v8733_v13  ;;  %v9166_v14 = vld [vmem:[#allocation51_spill] sm:$0xff]  ;;  %v9168_v40 = vld [vmem:[#allocation74_spill] sm:$0xff] }
 0x442   : > { %v1445_v41 = vadd.f32 %v9149_v51, %v1418_v32  ;;  %v1555_v47 = vadd.f32 %v9160_v26, %v1529_v4  ;;  %v6851_v43 = vadd.f32 %v6847_v8, %v8733_v13 }
 0x443   : > { %6765 = vmatmul.f32.vlgmr.msrb.gmra.mxu2 %v6651_v12  ;;  %v9131_v12 = vld [vmem:[#allocation87_spill] sm:$0xff]  ;;  %v6825_v59 = vadd.f32 %v6808_v30, %v6804_v54  ;;  %v6798_v60 = vmul.f32 %v8741_v10, %v8741_v10 }
 0x444   : > { %v3832_v16 = vadd.f32 %v9131_v12, %v3807_v25  ;;  %v8730_v25 = vstv %s7075_s10  ;;  %v4021_v12 = vadd.f32 %v9155_v56, %v3994_v52  ;;  %v8745_v49 = vadd.f32 %v9156_v37, %v1445_v41  ;;  %v9162_v30 = vld [vmem:[#allocation71_spill] sm:$0xff] }
 0x445   : > { %v6829_v3 = vadd.f32 %v6825_v59, %v8730_v25  ;;  %v2864_v38 = vadd.f32 %v9162_v30, %v2839_v19  ;;  %v1580_v32 = vadd.f32 %v9164_v6, %v1555_v47  ;;  %v9165_v54 = vld [vmem:[#allocation75_spill] sm:$0xff] }
 0x446   : > { %v3859_v27 = vadd.f32 %v9137_v24, %v3832_v16  ;;  %v4105_v24 = vadd.f32 %v9159_v23, %v9158_v20  ;;  %v4044_v29 = vadd.f32 %v9161_v22, %v4021_v12  ;;  %v6794_v46 = vmul.f32 %v8745_v49, %v8745_v49  ;;  %v9171_v12 = vld [vmem:[#allocation104_spill] sm:$0xff] }
 0x447   : > { %v8752_v39 = vmul.f32 %v6850_v55, %v6829_v3 }
 0x448   : > { %v3882_v58 = vadd.f32 %v9144_v15, %v3859_v27  ;;  %v4131_v33 = vadd.f32 %v9163_v1, %v4105_v24 }
 0x449   : > { %7150 = vrcp.f32 %v8752_v39  ;;  %vm6863_vm2 = vweird.f32 %v8752_v39 }
 0x44a   : > { %v6805_v45 = vsub.f32 %v3882_v58, %v6793_v36  ;;  %v6810_v58 = vsub.f32 %v8623_v2, %v6798_v60  ;;  %v2891_v36 = vadd.f32 %v9165_v54, %v2864_v38  ;;  %v4156_v52 = vadd.f32 %v9167_v50, %v4131_v33 }
 0x44b   : > { %v6848_v2 = vadd.f32 %v6798_v60, %v6794_v46  ;;  %v6867_v50 = vand.u32 2147483647, %v8752_v39 }
 0x44c   : > { %v6826_v28 = vadd.f32 %v6809_v53, %v6805_v45  ;;  %v6806_v53 = vsub.f32 %v4044_v29, %v6794_v46  ;;  %v1607_v45 = vadd.f32 %v9166_v14, %v1580_v32  ;;  %v8773_v18 = vadd.f32 %v9168_v40, %v2891_v36 }
 0x44d   : > { %v4183_v21 = vadd.f32 %v9169_v9, %v4156_v52  ;;  %v6852_v5 = vadd.f32 %v6848_v2, %v8733_v13  ;;  %v6869_v52 = vand.u32 2147483648, %v8752_v39  ;;  %vm6868_vm6 = vcmp.eq.f32.partialorder %v6867_v50, 8.507059e+37 }
 0x44e   : > { %v6830_v27 = vadd.f32 %v6826_v28, %v8730_v25  ;;  %v6827_v51 = vadd.f32 %v6810_v58, %v6806_v53  ;;  %v8779_v63 = vadd.f32 %v9170_v57, %v1607_v45  ;;  %v6799_v56 = vmul.f32 %v8773_v18, %v8773_v18 }
 0x450   : > { %v8763_v15 = vmul.f32 %v6851_v43, %v6830_v27  ;;  %v6831_v4 = vadd.f32 %v6827_v51, %v8730_v25  ;;  %v6795_v19 = vmul.f32 %v8779_v63, %v8779_v63  ;;  %v6811_v23 = vsub.f32 %v8625_v11, %v6799_v56 }
 0x452   : > { %7152 = vrcp.f32 %v8763_v15  ;;  %v8792_v20 = vmul.f32 %v6852_v5, %v6831_v4  ;;  %v6849_v38 = vadd.f32 %v6799_v56, %v6795_v19  ;;  %vm6878_vm5 = vweird.f32 %v8763_v15 }
 0x453   : > { %v6882_v4 = vand.u32 2147483647, %v8763_v15 }
 0x454   : > { %7154 = vrcp.f32 %v8792_v20  ;;  %v6853_v36 = vadd.f32 %v6849_v38, %v8733_v13  ;;  %vm6893_vm11 = vweird.f32 %v8792_v20 }
 0x455   : > { %vm6883_vm8 = vcmp.eq.f32.partialorder %v6882_v4, 8.507059e+37 }
 0x48c   : > { %v6202_v35 = vpop.f32.mrf.mxu1 }
 0x494   : > { %v6171_v16 = vpop.f32.mrf.mxu0  ;;  %v6228_v62 = vpop.f32.mrf.mxu2 }
 0x495   : > { %v6203_v42 = vadd.f32 %v6202_v35, %v6171_v16  ;;  %v6303_v59 = vpop.f32.mrf.mxu1  ;;  %v8776_v35 = vpop.eup %7150  ;;  %v4206_v16 = vadd.f32 %v9171_v12, %v4183_v21 }
 0x496   : > { %v6253_v7 = vpop.f32.mrf.mxu3  ;;  %v8782_v8 = vpop.eup %7152  ;;  %v6859_v55 = vmul.f32 %v8776_v35, %v8752_v39  ;;  %vm6864_vm1 = vweird.f32 %v8776_v35  ;;  %v6884_v39 = vand.u32 2147483648, %v8763_v15 }
 0x497   : > { %v6229_v31 = vadd.f32 %v6228_v62, %v6203_v42  ;;  %v6874_v26 = vmul.f32 %v8782_v8, %v8763_v15  ;;  %v6807_v47 = vsub.f32 %v4206_v16, %v6795_v19  ;;  %v8805_v54 = vpop.eup %7154  ;;  %vm8817_vm3 = vmor %vm6863_vm2, %vm6864_vm1  ;;  %vm6879_vm4 = vweird.f32 %v8782_v8 }
 0x498   : > { %v6860_v43 = vsub.f32 1.0, %v6859_v55  ;;  %v6889_v40 = vmul.f32 %v8805_v54, %v8792_v20  ;;  %v6870_v16 = vor.u32 1.1754944e-38, %v6869_v52  ;;  %vm6880_vm7 = vmor %vm6878_vm5, %vm6879_vm4  ;;  %vm6894_vm10 = vweird.f32 %v8805_v54 }
 0x499   : > { %v6254_v41 = vadd.f32 %v6253_v7, %v6229_v31  ;;  %v6800_v7 = vmul.f32 %v8690_v48, %v8698_v0  ;;  %v6828_v29 = vadd.f32 %v6811_v23, %v6807_v47  ;;  %v6875_v30 = vsub.f32 1.0, %v6874_v26  ;;  %vm6895_vm12 = vmor %vm6893_vm11, %vm6894_vm10 }
 0x49a   : > { %v6861_v1 = vmul.f32 %v8776_v35, %v6860_v43  ;;  %v6801_v48 = vmul.f32 %v8703_v61, %v8712_v34  ;;  %v6885_v23 = vor.u32 1.1754944e-38, %v6884_v39 }
 0x49b   : > { %v6833_v33 = vmul.f32 2.0, %v6800_v7  ;;  %v6832_v62 = vadd.f32 %v6828_v29, %v8730_v25  ;;  %v6876_v32 = vmul.f32 %v8782_v8, %v6875_v30 }
 0x49c   : > { %v6280_v44 = vpop.f32.mrf.mxu0  ;;  %v6834_v61 = vmul.f32 2.0, %v6801_v48 }
 0x49d   : > { %v6281_v3 = vadd.f32 %v6280_v44, %v6254_v41  ;;  %v6415_v24 = vpop.f32.mrf.mxu1  ;;  %v6838_v44 = vadd.f32 %v8733_v13, %v6833_v33  ;;  %v8812_v45 = vmul.f32 %v6853_v36, %v6832_v62  ;;  %v6877_v2 = vadd.f32 %v8782_v8, %v6876_v32 }
 0x49e   : > { %v6364_v28 = vpop.f32.mrf.mxu3  ;;  %v6839_v5 = vadd.f32 %v8733_v13, %v6834_v61 }
 0x49f   : > { %v6304_v17 = vadd.f32 %v6303_v59, %v6281_v3  ;;  %v6862_v59 = vadd.f32 %v8776_v35, %v6861_v1  ;;  %7156 = vrcp.f32 %v8812_v45  ;;  %v6881_v55 = vsel %vm6880_vm7, %v8782_v8, %v6877_v2 }
 0x4a0   : > { %v6886_v26 = vsel %vm6883_vm8, %v6885_v23, %v6881_v55  ;;  %vm6908_vm15 = vweird.f32 %v8812_v45 }
 0x4a1   : > { %v6812_v60 = vsub.f32 %v6304_v17, %v6800_v7  ;;  %v6866_v21 = vsel %vm8817_vm3, %v8776_v35, %v6862_v59  ;;  %v6890_v17 = vsub.f32 1.0, %v6889_v40  ;;  %v6802_v7 = vmul.f32 %v8741_v10, %v8745_v49 }
 0x4a2   : > { %v6871_v19 = vsel %vm6868_vm6, %v6870_v16, %v6866_v21 }
 0x4a3   : > { %v6816_v0 = vmul.f32 2.0, %v6812_v60  ;;  %v6891_v60 = vmul.f32 %v8805_v54, %v6890_v17 }
 0x4a4   : > { %v6390_v37 = vpop.f32.mrf.mxu0 }
 0x4a5   : > { %v6526_v53 = vpop.f32.mrf.mxu1  ;;  %v6821_v34 = vadd.f32 %v8730_v25, %v6816_v0  ;;  %v6892_v33 = vadd.f32 %v8805_v54, %v6891_v60 }
 0x4a6   : > { %v6333_v27 = vpop.f32.mrf.mxu2  ;;  %v6465_v46 = vpop.f32.mrf.mxu3 }
 0x4a7   : > { %v6365_v42 = vadd.f32 %v6364_v28, %v6333_v27  ;;  %v6842_v57 = vmul.f32 %v6838_v44, %v6821_v34 }
 0x4a9   : > { %v6391_v22 = vadd.f32 %v6390_v37, %v6365_v42  ;;  %v6872_v27 = vmul.f32 %v6871_v19, %v6842_v57  ;;  %v6914_v57 = vand.u32 2147483648, %v8812_v45 }
 0x4ab   : > { %v6416_v58 = vadd.f32 %v6415_v24, %v6391_v22  ;;  %v7157_v22 = vpop.eup %7156  ;;  %v6919_v8 = vsel %vm6918_vm9, %v6872_v27, 0.0 }
 0x4ac   : > { %v6495_v11 = vpop.f32.mrf.mxu0  ;;  %vm6909_vm14 = vweird.f32 %v7157_v22 }
 0x4ad   : > { %v6527_v28 = vadd.f32 %v6526_v53, %v6495_v11  ;;  %v6627_v42 = vpop.f32.mrf.mxu1  ;;  %v6835_v11 = vmul.f32 2.0, %v6802_v7  ;;  %v6896_v53 = vsel %vm6895_vm12, %v8805_v54, %v6892_v33  ;;  %vm6910_vm0 = vmor %vm6908_vm15, %vm6909_vm14 }
 0x4ae   : > { %v6442_v31 = vpop.f32.mrf.mxu2  ;;  %v6577_v9 = vpop.f32.mrf.mxu3 }
 0x4af   : > { %v6443_v6 = vadd.f32 %v6442_v31, %v6416_v58  ;;  %v6899_v58 = vand.u32 2147483648, %v8792_v20  ;;  %v6840_v36 = vadd.f32 %v8733_v13, %v6835_v11 }
 0x4b1   : > { %v6466_v14 = vadd.f32 %v6465_v46, %v6443_v6  ;;  %v6897_v6 = vand.u32 2147483647, %v8792_v20  ;;  %v6900_v61 = vor.u32 1.1754944e-38, %v6899_v58 }
 0x4b3   : > { %v6813_v51 = vsub.f32 %v6466_v14, %v6801_v48  ;;  %v6904_v48 = vmul.f32 %v7157_v22, %v8812_v45  ;;  %vm6898_vm13 = vcmp.eq.f32.partialorder %v6897_v6, 8.507059e+37 }
 0x4b4   : > { %v6604_v56 = vpop.f32.mrf.mxu0  ;;  %v6901_v52 = vsel %vm6898_vm13, %v6900_v61, %v6896_v53 }
 0x4b5   : > { %v6817_v3 = vmul.f32 2.0, %v6813_v51  ;;  %v6905_v59 = vsub.f32 1.0, %v6904_v48  ;;  %v6739_v44 = vpop.f32.mrf.mxu1  ;;  %v6803_v51 = vmul.f32 %v8773_v18, %v8779_v63 }
 0x4b6   : > { %v6552_v12 = vpop.f32.mrf.mxu2  ;;  %v6688_v30 = vpop.f32.mrf.mxu3 }
 0x4b7   : > { %v6822_v35 = vadd.f32 %v8730_v25, %v6817_v3  ;;  %v6553_v37 = vadd.f32 %v6552_v12, %v6527_v28  ;;  %v6906_v2 = vmul.f32 %v7157_v22, %v6905_v59  ;;  %v6836_v54 = vmul.f32 2.0, %v6803_v51 }
 0x4b8   : > { %v6915_v12 = vor.u32 1.1754944e-38, %v6914_v57 }
 0x4b9   : > { %v6578_v15 = vadd.f32 %v6577_v9, %v6553_v37  ;;  %v6843_v24 = vmul.f32 %v6839_v5, %v6822_v35  ;;  %v6907_v3 = vadd.f32 %v7157_v22, %v6906_v2  ;;  %v6912_v5 = vand.u32 2147483647, %v8812_v45 }
 0x4ba   : > { %v6841_v63 = vadd.f32 %v8733_v13, %v6836_v54 }
 0x4bb   : > { %v6605_v47 = vadd.f32 %v6604_v56, %v6578_v15  ;;  %v6887_v43 = vmul.f32 %v6886_v26, %v6843_v24  ;;  %v6911_v56 = vsel %vm6910_vm0, %v7157_v22, %v6907_v3  ;;  %vm6913_vm1 = vcmp.eq.f32.partialorder %v6912_v5, 8.507059e+37 }
 0x4bc   : > { %v6714_v0 = vpop.f32.mrf.mxu0  ;;  %v6916_v35 = vsel %vm6913_vm1, %v6915_v12, %v6911_v56 }
 0x4bd   : > { %v6628_v29 = vadd.f32 %v6627_v42, %v6605_v47  ;;  %v6920_v46 = vsel %vm6918_vm9, %v6887_v43, 0.0 }
 0x4be   : > { %v6657_v38 = vpop.f32.mrf.mxu2  ;;  %v6921_v1 = vadd.f32 %v6920_v46, %v6919_v8  ;;  %v6789_v40 = vpop.f32.mrf.mxu3 }
 0x4bf   : > { %v6814_v10 = vsub.f32 %v6628_v29, %v6802_v7  ;;  %v6689_v49 = vadd.f32 %v6688_v30, %v6657_v38 }
 0x4c1   : > { %v6818_v62 = vmul.f32 2.0, %v6814_v10  ;;  %v6715_v31 = vadd.f32 %v6714_v0, %v6689_v49 }
 0x4c3   : > { %v6823_v32 = vadd.f32 %v8730_v25, %v6818_v62  ;;  %v6740_v34 = vadd.f32 %v6739_v44, %v6715_v31 }
 0x4c5   : > { %v6844_v14 = vmul.f32 %v6840_v36, %v6823_v32 }
 0x4c6   : > { %v6766_v50 = vpop.f32.mrf.mxu2 }
 0x4c7   : > { %v6767_v41 = vadd.f32 %v6766_v50, %v6740_v34  ;;  %v6902_v20 = vmul.f32 %v6901_v52, %v6844_v14 }
 0x4c9   : > { %v6790_v9 = vadd.f32 %v6789_v40, %v6767_v41  ;;  %v6922_v21 = vsel %vm6918_vm9, %v6902_v20, 0.0 }
 0x4ca   : > { %v6923_v39 = vadd.f32 %v6922_v21, %v6921_v1 }
 0x4cb   : > { %v6815_v28 = vsub.f32 %v6790_v9, %v6803_v51 }
 0x4cd   : > { %v6819_v4 = vmul.f32 2.0, %v6815_v28 }
 0x4cf   : > { %v6824_v18 = vadd.f32 %v8730_v25, %v6819_v4 }
 0x4d1   : > { %v6845_v16 = vmul.f32 %v6841_v63, %v6824_v18 }
 0x4d3   : > { %v6917_v37 = vmul.f32 %v6916_v35, %v6845_v16 }
 0x4d5   : > { %v6924_v55 = vsel %vm6918_vm9, %v6917_v37, 0.0 }
 0x4d6   : > { %v6925_v17 = vadd.f32 %v6924_v55, %v6923_v39 }
 0x4d8   : > { %6926 = vadd.xlane.f32.xlu0 %v6925_v17 }
 0x54b   : > { %v6927_v19 = vpop.xlane.xlu0 %6926 }
 0x54c   : > { %v6928_v23 = vrot.slane %v6927_v19, 4 }
 0x54e   : > { %v6929_v45 = vadd.f32 %v6928_v23, %v6927_v19 }
 0x550   : > { %v6930_v15 = vrot.slane %v6929_v45, 2 }
 0x552   : > { %v6931_v25 = vadd.f32 %v6930_v15, %v6929_v45 }
 0x554   : > { %v6932_v24 = vrot.slane %v6931_v25, 1 }
 0x556   : > { %v6933_v13 = vadd.f32 %v6932_v24, %v6931_v25 }
 0x558   : > { %7084 = vpush %v6933_v13 }
 0x589   : > { %s7085_s8 = spop %7084 }
 0x58a   : > { %v6935_v27 = vstv %s7085_s8 }
 0x58b   : > { %6936 = vst [vmem:[%s302_s27] sm:$0xff] %v6935_v27 }
 0x58c   : > { %7284 = shalt.err (!%p7281_p5)
}
 0x58d   : > { %7094 = dma.vmem_to_hbm [thread:$0]  (%p7418_p11), %s6951_s15, 128, %s6953_s11, %s6938_s7  }
 0x58e PF: > { %s6964_s24 = sand.u32 1, %s7319_s18   ;;  %p9174_p9 = scmp.ge.s32.totalorder %s7331_s21, 2 }
 0x58f   : > { %s6965_s0 = scalar_lea.sflag [#allocation4], %s6964_s24 }
 0x590   : > { %p7108_p10 = pnand %p9174_p9, %p7422_p12 }
 0x592   : > { %p7109_p1 = pneg %p7108_p10 }
 0x594   : > { %7314 = dma.done.wait (%p7109_p1), %s6965_s0, 128  }
 0x595   : > { %7316 = vsyncadd (%p7109_p1), %s6965_s0, 4294967168  ;;  %s9175_s21 = sld [smem:[#allocation15_spill]]  ;;  %s9178_s18 = smov %s7323_s19 }
 0x596   : > { %s9176_s10 = sld [smem:[#allocation14_spill]] }
 0x597   : > { %s9177_s20 = sld [smem:[#allocation16_spill]] }
 0x59b   : > { %p22_p2 = scmp.ge.s32.totalorder %s9175_s21, 4  }
 0x59c   : > { %s9179_s19 = smov %s9176_s10 }
 0x59d   :  { %24 = sbr.rel (!%p22_p2) target bundleno = 10 (0xa), region = 103 }
 0x5a2   :  { %6971 = vsyncpa [#allocation3], 1 }
 0x5a3   :  { %6973 = vsyncpa [#allocation3 + $0x1], 1 }
 0x5a4   :  { %6974 = vsyncpa [#allocation8], 1 }
 0x5a5   :  { %6976 = vsyncpa [#allocation8 + $0x1], 1 }
 0x5a6   :  { %6977 = vsyncpa [#allocation4], 1 }
 0x5a7   :  { %6979 = vsyncpa [#allocation4 + $0x1], 1 }
 0x5a8   :  { %6980 = vsyncpa [#allocation5], 1 }
 0x5a9   :  { %6982 = vsyncpa [#allocation5 + $0x1], 1 }

</bundles_post_ra>
